<compile_context>
chip_gen: v7x
topology: tpu7x:2x2x1
jax: 0.10.0
libtpu: 0.0.40
codegen_flags: <defaults>
</compile_context>

<pallas_src>
import jax
import jax.numpy as jnp
from jax.experimental import pallas as pl
from jax.experimental.pallas import tpu as pltpu

# ---- model hyper-parameters (synthetic, deterministic) ----------------------
VQVAE_VOCAB = 119          # args['vocab_size']  (num_embeddings of the VQVAE)
LOC_VOCAB   = 9            # args['loc_vocab_size']
VOCAB       = VQVAE_VOCAB + LOC_VOCAB   # = 128 (lane friendly)
D_MODEL     = 64           # latent_dim
N_HEADS     = 4            # heads
N_LAYERS    = 2            # N
BLOCK_SIZE  = 16           # block_size
HEAD_DIM    = D_MODEL // N_HEADS        # 16
LN_EPS      = 1e-5

# ---- packed per-layer parameter slab: one (L, VEC_ROWS, 4*D) f32 input ------
# row r holds a small vector in lanes [:width]; per-head q/k/v biases get one row
# per head (lanes [:HEAD_DIM]) so the kernel never slices lanes at a non-zero offset.
ROW_LN1_G, ROW_LN1_B = 0, 1
ROW_BPROJ            = 2
ROW_LN2_G, ROW_LN2_B = 3, 4
ROW_BFC              = 5                      # full 4*D lanes
ROW_BFC2             = 6
ROW_LNF_G, ROW_LNF_B = 7, 8                   # final LN stored in the layer-0 slot
ROW_BQ               = 9
ROW_BK               = ROW_BQ + N_HEADS
ROW_BV               = ROW_BK + N_HEADS
VEC_ROWS             = ((ROW_BV + N_HEADS + 7) // 8) * 8   # 24


# ---- in-kernel helpers (also used by the pure-JAX reference) ----------------
def _layernorm(x, g, b):
    mu = jnp.mean(x, axis=-1, keepdims=True)
    xc = x - mu
    var = jnp.mean(xc * xc, axis=-1, keepdims=True)
    return xc * jax.lax.rsqrt(var + LN_EPS) * g + b


def _gelu(x):
    # TODO(synk): GPT reference implementation not provided; using the tanh GELU
    # approximation (NewGELU / nanoGPT flavor), which lowers cleanly to the EUP.
    return 0.5 * x * (1.0 + jnp.tanh(0.7978845608028654 * (x + 0.044715 * x * x * x)))


# ---- the Pallas kernel: full GPT forward for one batch block ----------------
def gpt_kernel(idx_ref, wte_ref, wpe_ref, wqkv_ref, wproj_ref,
               wfc_ref, wfc2_ref, whead_ref, vecs_ref, out_ref):
    BB, T, _ = idx_ref.shape
    V, D = wte_ref.shape
    hd = HEAD_DIM
    M = BB * T                                   # all dense matmuls run on (M, ·) rows

    # ---- fused token embedding: exact gather as one-hot @ wte (MXU) + positional add
    idx = idx_ref[...].reshape(M, 1)                                        # int32
    lane = jax.lax.broadcasted_iota(jnp.int32, (M, V), 1)
    onehot = jnp.where(lane == idx, 1.0, 0.0).astype(jnp.bfloat16)          # (M, V)
    x = jnp.dot(onehot, wte_ref[...], preferred_element_type=jnp.float32)   # (M, D) f32
    x = (x.reshape(BB, T, D) + wpe_ref[...][None, :, :]).reshape(M, D)

    # ---- additive causal bias, built once and reused by every head / layer ----
    r = jax.lax.broadcasted_iota(jnp.int32, (T, T), 0)
    c = jax.lax.broadcasted_iota(jnp.int32, (T, T), 1)
    causal_bias = jnp.where(c <= r, 0.0, -1e30).astype(jnp.float32)         # (T, T)
    scale = jnp.float32(1.0 / (hd ** 0.5))

    for l in range(N_LAYERS):
        # ------------- causal multi-head self-attention (pre-LN) -------------
        g = vecs_ref[l, ROW_LN1_G:ROW_LN1_G + 1, :D]
        b = vecs_ref[l, ROW_LN1_B:ROW_LN1_B + 1, :D]
        hb = _layernorm(x, g, b).astype(jnp.bfloat16)                       # (M, D)

        y = jnp.zeros((M, D), jnp.float32)
        for hh in range(N_HEADS):
            # per-head weights are leading-dim indexed -> no 16-lane activation slices
            wq = wqkv_ref[(l * 3 + 0) * N_HEADS + hh]                       # (D, hd) bf16
            wk = wqkv_ref[(l * 3 + 1) * N_HEADS + hh]
            wv = wqkv_ref[(l * 3 + 2) * N_HEADS + hh]
            bq = vecs_ref[l, ROW_BQ + hh:ROW_BQ + hh + 1, :hd]
            bk = vecs_ref[l, ROW_BK + hh:ROW_BK + hh + 1, :hd]
            bv = vecs_ref[l, ROW_BV + hh:ROW_BV + hh + 1, :hd]

            q = (jnp.dot(hb, wq, preferred_element_type=jnp.float32) + bq).reshape(BB, T, hd)
            k = (jnp.dot(hb, wk, preferred_element_type=jnp.float32) + bk).reshape(BB, T, hd)
            v = (jnp.dot(hb, wv, preferred_element_type=jnp.float32) + bv).reshape(BB, T, hd)

            s = jnp.einsum("btd,bsd->bts", q.astype(jnp.bfloat16), k.astype(jnp.bfloat16),
                           preferred_element_type=jnp.float32) * scale
            s = s + causal_bias[None, :, :]
            s = s - jnp.max(s, axis=-1, keepdims=True)
            p = jnp.exp(s)
            p = p * pl.reciprocal(jnp.sum(p, axis=-1, keepdims=True), approx=True)
            o = jnp.einsum("bts,bsd->btd", p.astype(jnp.bfloat16), v.astype(jnp.bfloat16),
                           preferred_element_type=jnp.float32)              # (BB, T, hd)

            # concat-free: fold the head concatenation into the output projection (sum of
            # per-head projections), so no lane re-stitching of head outputs is needed.
            y = y + jnp.dot(o.reshape(M, hd).astype(jnp.bfloat16),
                            wproj_ref[l * N_HEADS + hh],
                            preferred_element_type=jnp.float32)
        x = x + y + vecs_ref[l, ROW_BPROJ:ROW_BPROJ + 1, :D]

        # ------------------------ MLP (pre-LN, tanh GELU) ---------------------
        g = vecs_ref[l, ROW_LN2_G:ROW_LN2_G + 1, :D]
        b = vecs_ref[l, ROW_LN2_B:ROW_LN2_B + 1, :D]
        h1 = _layernorm(x, g, b).astype(jnp.bfloat16)
        h1 = jnp.dot(h1, wfc_ref[l], preferred_element_type=jnp.float32)
        h1 = _gelu(h1 + vecs_ref[l, ROW_BFC:ROW_BFC + 1, :])
        h2 = jnp.dot(h1.astype(jnp.bfloat16), wfc2_ref[l], preferred_element_type=jnp.float32)
        x = x + h2 + vecs_ref[l, ROW_BFC2:ROW_BFC2 + 1, :D]

    # ---- final LayerNorm + bias-free vocab head (lane-dense V = 128 output) ----
    g = vecs_ref[0, ROW_LNF_G:ROW_LNF_G + 1, :D]
    b = vecs_ref[0, ROW_LNF_B:ROW_LNF_B + 1, :D]
    xf = _layernorm(x, g, b).astype(jnp.bfloat16)
    logits = jnp.dot(xf, whead_ref[...], preferred_element_type=jnp.float32)  # (M, V)
    out_ref[...] = logits.reshape(BB, T, V)


# ---- chip-aware batch blocking ----------------------------------------------
def _tensorcores_per_chip():
    """Best-effort TensorCore count: v7x (and v4/v5p megacore) expose 2 cores."""
    try:
        kind = jax.devices()[0].device_kind.lower()
    except Exception:
        return 1
    return 2 if any(tag in kind for tag in ("v7", "7x", "v4", "v5p")) else 1


def _pick_batch_block(batch):
    """Single-TC chips (v5e/v6e): fold the whole batch into ONE grid step (kills per-step
    overhead, doubles MXU row fill). Multi-TC chips (v7x): keep a parallel batch grid axis
    so megacore sharding gives each core a slice."""
    cores = _tensorcores_per_chip()
    if cores > 1 and batch % cores == 0:
        return batch // cores
    return batch


def gpt_pallas(toks, params):
    B, T = toks.shape
    V, D = params["wte"].shape
    L, H, hd = N_LAYERS, N_HEADS, HEAD_DIM

    BB = _pick_batch_block(B)
    grid = (B // BB,)

    idx = toks.astype(jnp.int32).reshape(B, T, 1)          # (T, 1) trailing dims: block == full dims
    wqkv = params["wqkv"].reshape(L * 3 * H, D, hd)         # flatten leading dims (3-D blocks only)
    wproj = params["wproj"].reshape(L * H, hd, D)
    weights = [params["wte"], params["wpe"], wqkv, wproj,
               params["wfc"], params["wfc2"], params["whead"], params["vecs"]]

    def rep(arr):                                           # weights: full-array block, reused
        nd = arr.ndim
        return pl.BlockSpec(arr.shape, lambda b, nd=nd: (0,) * nd)

    in_specs = [pl.BlockSpec((BB, T, 1), lambda b: (b, 0, 0))] + [rep(w) for w in weights]
    out_spec = pl.BlockSpec((BB, T, V), lambda b: (b, 0, 0))

    return pl.pallas_call(
        gpt_kernel,
        out_shape=jax.ShapeDtypeStruct((B, T, V), jnp.float32),
        grid_spec=pltpu.PrefetchScalarGridSpec(
            num_scalar_prefetch=0,
            grid=grid,
            in_specs=in_specs,
            out_specs=out_spec,
        ),
        compiler_params=pltpu.CompilerParams(dimension_semantics=("parallel",)),
    )(idx, *weights)


# ---- forward() semantics ------------------------------------------------------
@jax.jit
def vqvae_transformer_forward(indices, params):
    """Eval-mode forward: (logits, target) = (GPT(indices[:, :-1]), indices[:, 1:])."""
    # TODO(synk): training-mode pkeep/bernoulli token corruption is not applied (eval path).
    target = indices[:, 1:]
    toks = indices[:, :-1]
    logits = gpt_pallas(toks, params)
    return logits, target


# ---- deterministic parameter init (GPT-style, packed layout) ------------------
def init_params(key):
    D, V, L, H, hd, T = D_MODEL, VOCAB, N_LAYERS, N_HEADS, HEAD_DIM, BLOCK_SIZE
    ks = jax.random.split(key, 13)
    n = lambda k, shape: 0.02 * jax.random.normal(k, shape, dtype=jnp.float32)

    vecs = jnp.zeros((L, VEC_ROWS, 4 * D), jnp.float32)
    vecs = vecs.at[:, ROW_LN1_G, :D].set(1.0)
    vecs = vecs.at[:, ROW_LN2_G, :D].set(1.0)
    vecs = vecs.at[0, ROW_LNF_G, :D].set(1.0)
    # small random biases so every bias path is exercised
    vecs = vecs.at[:, ROW_BPROJ, :D].set(n(ks[7], (L, D)))
    vecs = vecs.at[:, ROW_BFC, :].set(n(ks[8], (L, 4 * D)))
    vecs = vecs.at[:, ROW_BFC2, :D].set(n(ks[9], (L, D)))
    vecs = vecs.at[:, ROW_BQ:ROW_BQ + H, :hd].set(n(ks[10], (L, H, hd)))
    vecs = vecs.at[:, ROW_BK:ROW_BK + H, :hd].set(n(ks[11], (L, H, hd)))
    vecs = vecs.at[:, ROW_BV:ROW_BV + H, :hd].set(n(ks[12], (L, H, hd)))

    bf16 = jnp.bfloat16
    return {
        # matmul weights are bf16 MXU operands; all LN / bias vectors stay f32.
        "wte":   n(ks[0], (V, D)).astype(bf16),
        "wpe":   n(ks[1], (T, D)),                       # added in f32, not a matmul operand
        "wqkv":  n(ks[2], (L, 3, H, D, hd)).astype(bf16),
        "wproj": n(ks[3], (L, H, hd, D)).astype(bf16),
        "wfc":   n(ks[4], (L, D, 4 * D)).astype(bf16),
        "wfc2":  n(ks[5], (L, 4 * D, D)).astype(bf16),
        "whead": n(ks[6], (D, V)).astype(bf16),          # bias-free head (minGPT convention)
        "vecs":  vecs,
    }


# ---- pure-JAX f32 reference (same bf16-stored weights) for a numerical check ---
def _ref_forward(toks, params):
    D, H, hd, L = D_MODEL, N_HEADS, HEAD_DIM, N_LAYERS
    f = lambda a: a.astype(jnp.float32)
    wte, wpe = f(params["wte"]), f(params["wpe"])
    wqkv, wproj = f(params["wqkv"]), f(params["wproj"])
    wfc, wfc2, whead = f(params["wfc"]), f(params["wfc2"]), f(params["whead"])
    vecs = params["vecs"]
    B, T = toks.shape
    x = wte[toks] + wpe[None, :T]
    mask = jnp.tril(jnp.ones((T, T), bool))
    for l in range(L):
        h = _layernorm(x, vecs[l, ROW_LN1_G, :D], vecs[l, ROW_LN1_B, :D])
        y = jnp.zeros_like(x)
        for hh in range(H):
            q = h @ wqkv[l, 0, hh] + vecs[l, ROW_BQ + hh, :hd]
            k = h @ wqkv[l, 1, hh] + vecs[l, ROW_BK + hh, :hd]
            v = h @ wqkv[l, 2, hh] + vecs[l, ROW_BV + hh, :hd]
            s = jnp.einsum("btd,bsd->bts", q, k) / (hd ** 0.5)
            s = jnp.where(mask[None, :, :], s, -jnp.inf)
            p = jax.nn.softmax(s, axis=-1)
            y = y + jnp.einsum("bts,bsd->btd", p, v) @ wproj[l, hh]
        x = x + y + vecs[l, ROW_BPROJ, :D]
        h = _layernorm(x, vecs[l, ROW_LN2_G, :D], vecs[l, ROW_LN2_B, :D])
        h = _gelu(h @ wfc[l] + vecs[l, ROW_BFC, :])
        x = x + h @ wfc2[l] + vecs[l, ROW_BFC2, :D]
    xf = _layernorm(x, vecs[0, ROW_LNF_G, :D], vecs[0, ROW_LNF_B, :D])
    return xf @ whead


if __name__ == "__main__":
    key = jax.random.PRNGKey(0)
    B = 2
    SEQ = BLOCK_SIZE + 1                         # forward consumes indices[:, :-1]
    indices = jax.random.randint(key, (B, SEQ), 0, VOCAB, dtype=jnp.int32)
    params = init_params(jax.random.PRNGKey(1))

    logits, target = vqvae_transformer_forward(indices, params)
    jax.block_until_ready((logits, target))

    assert logits.shape == (B, BLOCK_SIZE, VOCAB), logits.shape
    assert target.shape == (B, BLOCK_SIZE), target.shape
    assert bool(jnp.all(jnp.isfinite(logits)))
    assert bool(jnp.array_equal(target, indices[:, 1:]))

    # numerical check vs a pure-JAX f32 reference (only bf16 activation casts +
    # approx-reciprocal softmax differ -> generous tolerance)
    ref = _ref_forward(indices[:, :-1], params)
    err = float(jnp.max(jnp.abs(logits - ref)))
    assert err < 3e-2, f"kernel vs reference max abs err {err}"

    print("KERNEL_OK")
</pallas_src>

<mosaic_0001>
module attributes {stable_mosaic.version = 11 : i64} {
  func.func @gpt_kernel(%arg0: i32, %arg1: memref<2x16x1xi32, #tpu.memory_space<vmem>>, %arg2: memref<128x64xbf16, #tpu.memory_space<vmem>>, %arg3: memref<16x64xf32, #tpu.memory_space<vmem>>, %arg4: memref<24x64x16xbf16, #tpu.memory_space<vmem>>, %arg5: memref<8x16x64xbf16, #tpu.memory_space<vmem>>, %arg6: memref<2x64x256xbf16, #tpu.memory_space<vmem>>, %arg7: memref<2x256x64xbf16, #tpu.memory_space<vmem>>, %arg8: memref<64x128xbf16, #tpu.memory_space<vmem>>, %arg9: memref<2x24x256xf32, #tpu.memory_space<vmem>>, %arg10: memref<2x16x128xf32, #tpu.memory_space<vmem>>) attributes {dimension_semantics = [#tpu.dimension_semantics<parallel>], iteration_bounds = array<i64: 1>, scalar_prefetch = 0 : i64, scratch_operands = 0 : i64, tpu.core_type = #tpu.core_type<tc>, window_params = [{transform_indices = @transform_0, window_bounds = array<i64: 2, 16, 1>}, {pipeline_mode = #tpu.pipeline_mode<synchronous>, transform_indices = @transform_1, window_bounds = array<i64: 128, 64>}, {pipeline_mode = #tpu.pipeline_mode<synchronous>, transform_indices = @transform_2, window_bounds = array<i64: 16, 64>}, {pipeline_mode = #tpu.pipeline_mode<synchronous>, transform_indices = @transform_3, window_bounds = array<i64: 24, 64, 16>}, {pipeline_mode = #tpu.pipeline_mode<synchronous>, transform_indices = @transform_4, window_bounds = array<i64: 8, 16, 64>}, {pipeline_mode = #tpu.pipeline_mode<synchronous>, transform_indices = @transform_5, window_bounds = array<i64: 2, 64, 256>}, {pipeline_mode = #tpu.pipeline_mode<synchronous>, transform_indices = @transform_6, window_bounds = array<i64: 2, 256, 64>}, {pipeline_mode = #tpu.pipeline_mode<synchronous>, transform_indices = @transform_7, window_bounds = array<i64: 64, 128>}, {pipeline_mode = #tpu.pipeline_mode<synchronous>, transform_indices = @transform_8, window_bounds = array<i64: 2, 24, 256>}, {transform_indices = @transform_9, window_bounds = array<i64: 2, 16, 128>}]} {
    %c0 = arith.constant 0 : index
    %c0_0 = arith.constant 0 : index
    %c0_1 = arith.constant 0 : index
    %0 = vector.load %arg1[%c0, %c0_0, %c0_1] : memref<2x16x1xi32, #tpu.memory_space<vmem>>, vector<2x16x1xi32>
    %1 = vector.shape_cast %0 : vector<2x16x1xi32> to vector<32x1xi32>
    %2 = tpu.iota {dimensions = array<i32: 1>} : vector<32x128xi32>
    %3 = vector.broadcast %1 : vector<32x1xi32> to vector<32x128xi32>
    %4 = arith.cmpi eq, %2, %3 : vector<32x128xi32>
    %cst = arith.constant 1.000000e+00 : f32
    %cst_2 = arith.constant 0.000000e+00 : f32
    %5 = vector.broadcast %cst : f32 to vector<32x128xf32>
    %6 = vector.broadcast %cst_2 : f32 to vector<32x128xf32>
    %7 = arith.select %4, %5, %6 : vector<32x128xi1>, vector<32x128xf32>
    %8 = arith.truncf %7 : vector<32x128xf32> to vector<32x128xbf16>
    %c0_3 = arith.constant 0 : index
    %c0_4 = arith.constant 0 : index
    %9 = vector.load %arg2[%c0_3, %c0_4] : memref<128x64xbf16, #tpu.memory_space<vmem>>, vector<128x64xbf16>
    %cst_5 = arith.constant dense<0.000000e+00> : vector<32x64xf32>
    %10 = tpu.matmul %8, %9, %cst_5 {dimension_numbers = #tpu.dot_dimension_numbers<[1], [0], [0], [1], [0, 0, 1, 1], [], []>} : vector<32x128xbf16>, vector<128x64xbf16>, vector<32x64xf32> -> vector<32x64xf32>
    %11 = vector.shape_cast %10 : vector<32x64xf32> to vector<2x16x64xf32>
    %c0_6 = arith.constant 0 : index
    %c0_7 = arith.constant 0 : index
    %12 = vector.load %arg3[%c0_6, %c0_7] : memref<16x64xf32, #tpu.memory_space<vmem>>, vector<16x64xf32>
    %13 = vector.shape_cast %12 : vector<16x64xf32> to vector<1x16x64xf32>
    %14 = vector.broadcast %13 : vector<1x16x64xf32> to vector<2x16x64xf32>
    %15 = arith.addf %11, %14 : vector<2x16x64xf32>
    %16 = vector.shape_cast %15 : vector<2x16x64xf32> to vector<32x64xf32>
    %17 = tpu.iota {dimensions = array<i32: 0>} : vector<16x16xi32>
    %18 = tpu.iota {dimensions = array<i32: 1>} : vector<16x16xi32>
    %19 = arith.cmpi sle, %18, %17 : vector<16x16xi32>
    %cst_8 = arith.constant 0.000000e+00 : f32
    %cst_9 = arith.constant -1.000000e+30 : f32
    %20 = vector.broadcast %cst_8 : f32 to vector<16x16xf32>
    %21 = vector.broadcast %cst_9 : f32 to vector<16x16xf32>
    %22 = arith.select %19, %20, %21 : vector<16x16xi1>, vector<16x16xf32>
    %c0_10 = arith.constant 0 : index
    %c0_11 = arith.constant 0 : index
    %c0_12 = arith.constant 0 : index
    %23 = vector.load %arg9[%c0_10, %c0_11, %c0_12] : memref<2x24x256xf32, #tpu.memory_space<vmem>>, vector<1x1x64xf32>
    %24 = vector.shape_cast %23 : vector<1x1x64xf32> to vector<1x64xf32>
    %c0_13 = arith.constant 0 : index
    %c1 = arith.constant 1 : index
    %c0_14 = arith.constant 0 : index
    %25 = vector.load %arg9[%c0_13, %c1, %c0_14] : memref<2x24x256xf32, #tpu.memory_space<vmem>>, vector<1x1x64xf32>
    %26 = vector.shape_cast %25 : vector<1x1x64xf32> to vector<1x64xf32>
    %cst_15 = arith.constant dense<0.000000e+00> : vector<32xf32>
    %27 = vector.multi_reduction <add>, %16, %cst_15 [1] : vector<32x64xf32> to vector<32xf32>
    %28 = vector.shape_cast %27 : vector<32xf32> to vector<32x1xf32>
    %cst_16 = arith.constant 6.400000e+01 : f32
    %29 = vector.broadcast %cst_16 : f32 to vector<32x1xf32>
    %30 = arith.divf %28, %29 : vector<32x1xf32>
    %31 = vector.broadcast %30 : vector<32x1xf32> to vector<32x64xf32>
    %32 = arith.subf %16, %31 : vector<32x64xf32>
    %33 = arith.mulf %32, %32 : vector<32x64xf32>
    %cst_17 = arith.constant dense<0.000000e+00> : vector<32xf32>
    %34 = vector.multi_reduction <add>, %33, %cst_17 [1] : vector<32x64xf32> to vector<32xf32>
    %35 = vector.shape_cast %34 : vector<32xf32> to vector<32x1xf32>
    %cst_18 = arith.constant 6.400000e+01 : f32
    %36 = vector.broadcast %cst_18 : f32 to vector<32x1xf32>
    %37 = arith.divf %35, %36 : vector<32x1xf32>
    %cst_19 = arith.constant 9.99999974E-6 : f32
    %38 = vector.broadcast %cst_19 : f32 to vector<32x1xf32>
    %39 = arith.addf %37, %38 : vector<32x1xf32>
    %40 = math.rsqrt %39 : vector<32x1xf32>
    %41 = vector.broadcast %40 : vector<32x1xf32> to vector<32x64xf32>
    %42 = arith.mulf %32, %41 : vector<32x64xf32>
    %43 = vector.broadcast %24 : vector<1x64xf32> to vector<32x64xf32>
    %44 = arith.mulf %42, %43 : vector<32x64xf32>
    %45 = vector.broadcast %26 : vector<1x64xf32> to vector<32x64xf32>
    %46 = arith.addf %44, %45 : vector<32x64xf32>
    %47 = arith.truncf %46 : vector<32x64xf32> to vector<32x64xbf16>
    %cst_20 = arith.constant 0.000000e+00 : f32
    %48 = vector.broadcast %cst_20 : f32 to vector<32x64xf32>
    %c0_21 = arith.constant 0 : index
    %c0_22 = arith.constant 0 : index
    %c0_23 = arith.constant 0 : index
    %49 = vector.load %arg4[%c0_21, %c0_22, %c0_23] : memref<24x64x16xbf16, #tpu.memory_space<vmem>>, vector<1x64x16xbf16>
    %50 = vector.shape_cast %49 : vector<1x64x16xbf16> to vector<64x16xbf16>
    %c4 = arith.constant 4 : index
    %c0_24 = arith.constant 0 : index
    %c0_25 = arith.constant 0 : index
    %51 = vector.load %arg4[%c4, %c0_24, %c0_25] : memref<24x64x16xbf16, #tpu.memory_space<vmem>>, vector<1x64x16xbf16>
    %52 = vector.shape_cast %51 : vector<1x64x16xbf16> to vector<64x16xbf16>
    %c8 = arith.constant 8 : index
    %c0_26 = arith.constant 0 : index
    %c0_27 = arith.constant 0 : index
    %53 = vector.load %arg4[%c8, %c0_26, %c0_27] : memref<24x64x16xbf16, #tpu.memory_space<vmem>>, vector<1x64x16xbf16>
    %54 = vector.shape_cast %53 : vector<1x64x16xbf16> to vector<64x16xbf16>
    %c0_28 = arith.constant 0 : index
    %c9 = arith.constant 9 : index
    %c0_29 = arith.constant 0 : index
    %55 = vector.load %arg9[%c0_28, %c9, %c0_29] : memref<2x24x256xf32, #tpu.memory_space<vmem>>, vector<1x1x16xf32>
    %56 = vector.shape_cast %55 : vector<1x1x16xf32> to vector<1x16xf32>
    %c0_30 = arith.constant 0 : index
    %c13 = arith.constant 13 : index
    %c0_31 = arith.constant 0 : index
    %57 = vector.load %arg9[%c0_30, %c13, %c0_31] : memref<2x24x256xf32, #tpu.memory_space<vmem>>, vector<1x1x16xf32>
    %58 = vector.shape_cast %57 : vector<1x1x16xf32> to vector<1x16xf32>
    %c0_32 = arith.constant 0 : index
    %c17 = arith.constant 17 : index
    %c0_33 = arith.constant 0 : index
    %59 = vector.load %arg9[%c0_32, %c17, %c0_33] : memref<2x24x256xf32, #tpu.memory_space<vmem>>, vector<1x1x16xf32>
    %60 = vector.shape_cast %59 : vector<1x1x16xf32> to vector<1x16xf32>
    %cst_34 = arith.constant dense<0.000000e+00> : vector<32x16xf32>
    %61 = tpu.matmul %47, %50, %cst_34 {dimension_numbers = #tpu.dot_dimension_numbers<[1], [0], [0], [1], [0, 0, 1, 1], [], []>} : vector<32x64xbf16>, vector<64x16xbf16>, vector<32x16xf32> -> vector<32x16xf32>
    %62 = vector.broadcast %56 : vector<1x16xf32> to vector<32x16xf32>
    %63 = arith.addf %61, %62 : vector<32x16xf32>
    %64 = vector.shape_cast %63 : vector<32x16xf32> to vector<2x16x16xf32>
    %cst_35 = arith.constant dense<0.000000e+00> : vector<32x16xf32>
    %65 = tpu.matmul %47, %52, %cst_35 {dimension_numbers = #tpu.dot_dimension_numbers<[1], [0], [0], [1], [0, 0, 1, 1], [], []>} : vector<32x64xbf16>, vector<64x16xbf16>, vector<32x16xf32> -> vector<32x16xf32>
    %66 = vector.broadcast %58 : vector<1x16xf32> to vector<32x16xf32>
    %67 = arith.addf %65, %66 : vector<32x16xf32>
    %68 = vector.shape_cast %67 : vector<32x16xf32> to vector<2x16x16xf32>
    %cst_36 = arith.constant dense<0.000000e+00> : vector<32x16xf32>
    %69 = tpu.matmul %47, %54, %cst_36 {dimension_numbers = #tpu.dot_dimension_numbers<[1], [0], [0], [1], [0, 0, 1, 1], [], []>} : vector<32x64xbf16>, vector<64x16xbf16>, vector<32x16xf32> -> vector<32x16xf32>
    %70 = vector.broadcast %60 : vector<1x16xf32> to vector<32x16xf32>
    %71 = arith.addf %69, %70 : vector<32x16xf32>
    %72 = vector.shape_cast %71 : vector<32x16xf32> to vector<2x16x16xf32>
    %73 = arith.truncf %64 : vector<2x16x16xf32> to vector<2x16x16xbf16>
    %74 = arith.truncf %68 : vector<2x16x16xf32> to vector<2x16x16xbf16>
    "tpu.trace_start"() <{level = 10 : i32, message = "btd,bsd->bts"}> : () -> ()
    %cst_37 = arith.constant dense<0.000000e+00> : vector<2x16x16xf32>
    %75 = tpu.matmul %73, %74, %cst_37 {dimension_numbers = #tpu.dot_dimension_numbers<[2], [2], [1], [1], [0, 0, 0, 1, 1, 1], [0], [0]>} : vector<2x16x16xbf16>, vector<2x16x16xbf16>, vector<2x16x16xf32> -> vector<2x16x16xf32>
    "tpu.trace_stop"() : () -> ()
    %cst_38 = arith.constant 2.500000e-01 : f32
    %76 = vector.broadcast %cst_38 : f32 to vector<2x16x16xf32>
    %77 = arith.mulf %75, %76 : vector<2x16x16xf32>
    %78 = vector.shape_cast %22 : vector<16x16xf32> to vector<1x16x16xf32>
    %79 = vector.broadcast %78 : vector<1x16x16xf32> to vector<2x16x16xf32>
    %80 = arith.addf %77, %79 : vector<2x16x16xf32>
    %cst_39 = arith.constant dense<0xFF800000> : vector<2x16xf32>
    %81 = vector.multi_reduction <maximumf>, %80, %cst_39 [2] : vector<2x16x16xf32> to vector<2x16xf32>
    %82 = vector.shape_cast %81 : vector<2x16xf32> to vector<2x16x1xf32>
    %83 = vector.broadcast %82 : vector<2x16x1xf32> to vector<2x16x16xf32>
    %84 = arith.subf %80, %83 : vector<2x16x16xf32>
    %85 = math.exp %84 : vector<2x16x16xf32>
    %cst_40 = arith.constant dense<0.000000e+00> : vector<2x16xf32>
    %86 = vector.multi_reduction <add>, %85, %cst_40 [2] : vector<2x16x16xf32> to vector<2x16xf32>
    %87 = vector.shape_cast %86 : vector<2x16xf32> to vector<2x16x1xf32>
    %88 = tpu.reciprocal %87 {approx = true} : vector<2x16x1xf32> -> vector<2x16x1xf32>
    %89 = vector.broadcast %88 : vector<2x16x1xf32> to vector<2x16x16xf32>
    %90 = arith.mulf %85, %89 : vector<2x16x16xf32>
    %91 = arith.truncf %90 : vector<2x16x16xf32> to vector<2x16x16xbf16>
    %92 = arith.truncf %72 : vector<2x16x16xf32> to vector<2x16x16xbf16>
    "tpu.trace_start"() <{level = 10 : i32, message = "bts,bsd->btd"}> : () -> ()
    %cst_41 = arith.constant dense<0.000000e+00> : vector<2x16x16xf32>
    %93 = tpu.matmul %91, %92, %cst_41 {dimension_numbers = #tpu.dot_dimension_numbers<[2], [1], [1], [2], [0, 0, 0, 1, 1, 2], [0], [0]>} : vector<2x16x16xbf16>, vector<2x16x16xbf16>, vector<2x16x16xf32> -> vector<2x16x16xf32>
    "tpu.trace_stop"() : () -> ()
    %94 = vector.shape_cast %93 : vector<2x16x16xf32> to vector<32x16xf32>
    %95 = arith.truncf %94 : vector<32x16xf32> to vector<32x16xbf16>
    %c0_42 = arith.constant 0 : index
    %c0_43 = arith.constant 0 : index
    %c0_44 = arith.constant 0 : index
    %96 = vector.load %arg5[%c0_42, %c0_43, %c0_44] : memref<8x16x64xbf16, #tpu.memory_space<vmem>>, vector<1x16x64xbf16>
    %97 = vector.shape_cast %96 : vector<1x16x64xbf16> to vector<16x64xbf16>
    %cst_45 = arith.constant dense<0.000000e+00> : vector<32x64xf32>
    %98 = tpu.matmul %95, %97, %cst_45 {dimension_numbers = #tpu.dot_dimension_numbers<[1], [0], [0], [1], [0, 0, 1, 1], [], []>} : vector<32x16xbf16>, vector<16x64xbf16>, vector<32x64xf32> -> vector<32x64xf32>
    %99 = arith.addf %48, %98 : vector<32x64xf32>
    %c1_46 = arith.constant 1 : index
    %c0_47 = arith.constant 0 : index
    %c0_48 = arith.constant 0 : index
    %100 = vector.load %arg4[%c1_46, %c0_47, %c0_48] : memref<24x64x16xbf16, #tpu.memory_space<vmem>>, vector<1x64x16xbf16>
    %101 = vector.shape_cast %100 : vector<1x64x16xbf16> to vector<64x16xbf16>
    %c5 = arith.constant 5 : index
    %c0_49 = arith.constant 0 : index
    %c0_50 = arith.constant 0 : index
    %102 = vector.load %arg4[%c5, %c0_49, %c0_50] : memref<24x64x16xbf16, #tpu.memory_space<vmem>>, vector<1x64x16xbf16>
    %103 = vector.shape_cast %102 : vector<1x64x16xbf16> to vector<64x16xbf16>
    %c9_51 = arith.constant 9 : index
    %c0_52 = arith.constant 0 : index
    %c0_53 = arith.constant 0 : index
    %104 = vector.load %arg4[%c9_51, %c0_52, %c0_53] : memref<24x64x16xbf16, #tpu.memory_space<vmem>>, vector<1x64x16xbf16>
    %105 = vector.shape_cast %104 : vector<1x64x16xbf16> to vector<64x16xbf16>
    %c0_54 = arith.constant 0 : index
    %c10 = arith.constant 10 : index
    %c0_55 = arith.constant 0 : index
    %106 = vector.load %arg9[%c0_54, %c10, %c0_55] : memref<2x24x256xf32, #tpu.memory_space<vmem>>, vector<1x1x16xf32>
    %107 = vector.shape_cast %106 : vector<1x1x16xf32> to vector<1x16xf32>
    %c0_56 = arith.constant 0 : index
    %c14 = arith.constant 14 : index
    %c0_57 = arith.constant 0 : index
    %108 = vector.load %arg9[%c0_56, %c14, %c0_57] : memref<2x24x256xf32, #tpu.memory_space<vmem>>, vector<1x1x16xf32>
    %109 = vector.shape_cast %108 : vector<1x1x16xf32> to vector<1x16xf32>
    %c0_58 = arith.constant 0 : index
    %c18 = arith.constant 18 : index
    %c0_59 = arith.constant 0 : index
    %110 = vector.load %arg9[%c0_58, %c18, %c0_59] : memref<2x24x256xf32, #tpu.memory_space<vmem>>, vector<1x1x16xf32>
    %111 = vector.shape_cast %110 : vector<1x1x16xf32> to vector<1x16xf32>
    %cst_60 = arith.constant dense<0.000000e+00> : vector<32x16xf32>
    %112 = tpu.matmul %47, %101, %cst_60 {dimension_numbers = #tpu.dot_dimension_numbers<[1], [0], [0], [1], [0, 0, 1, 1], [], []>} : vector<32x64xbf16>, vector<64x16xbf16>, vector<32x16xf32> -> vector<32x16xf32>
    %113 = vector.broadcast %107 : vector<1x16xf32> to vector<32x16xf32>
    %114 = arith.addf %112, %113 : vector<32x16xf32>
    %115 = vector.shape_cast %114 : vector<32x16xf32> to vector<2x16x16xf32>
    %cst_61 = arith.constant dense<0.000000e+00> : vector<32x16xf32>
    %116 = tpu.matmul %47, %103, %cst_61 {dimension_numbers = #tpu.dot_dimension_numbers<[1], [0], [0], [1], [0, 0, 1, 1], [], []>} : vector<32x64xbf16>, vector<64x16xbf16>, vector<32x16xf32> -> vector<32x16xf32>
    %117 = vector.broadcast %109 : vector<1x16xf32> to vector<32x16xf32>
    %118 = arith.addf %116, %117 : vector<32x16xf32>
    %119 = vector.shape_cast %118 : vector<32x16xf32> to vector<2x16x16xf32>
    %cst_62 = arith.constant dense<0.000000e+00> : vector<32x16xf32>
    %120 = tpu.matmul %47, %105, %cst_62 {dimension_numbers = #tpu.dot_dimension_numbers<[1], [0], [0], [1], [0, 0, 1, 1], [], []>} : vector<32x64xbf16>, vector<64x16xbf16>, vector<32x16xf32> -> vector<32x16xf32>
    %121 = vector.broadcast %111 : vector<1x16xf32> to vector<32x16xf32>
    %122 = arith.addf %120, %121 : vector<32x16xf32>
    %123 = vector.shape_cast %122 : vector<32x16xf32> to vector<2x16x16xf32>
    %124 = arith.truncf %115 : vector<2x16x16xf32> to vector<2x16x16xbf16>
    %125 = arith.truncf %119 : vector<2x16x16xf32> to vector<2x16x16xbf16>
    "tpu.trace_start"() <{level = 10 : i32, message = "btd,bsd->bts"}> : () -> ()
    %cst_63 = arith.constant dense<0.000000e+00> : vector<2x16x16xf32>
    %126 = tpu.matmul %124, %125, %cst_63 {dimension_numbers = #tpu.dot_dimension_numbers<[2], [2], [1], [1], [0, 0, 0, 1, 1, 1], [0], [0]>} : vector<2x16x16xbf16>, vector<2x16x16xbf16>, vector<2x16x16xf32> -> vector<2x16x16xf32>
    "tpu.trace_stop"() : () -> ()
    %cst_64 = arith.constant 2.500000e-01 : f32
    %127 = vector.broadcast %cst_64 : f32 to vector<2x16x16xf32>
    %128 = arith.mulf %126, %127 : vector<2x16x16xf32>
    %129 = vector.shape_cast %22 : vector<16x16xf32> to vector<1x16x16xf32>
    %130 = vector.broadcast %129 : vector<1x16x16xf32> to vector<2x16x16xf32>
    %131 = arith.addf %128, %130 : vector<2x16x16xf32>
    %cst_65 = arith.constant dense<0xFF800000> : vector<2x16xf32>
    %132 = vector.multi_reduction <maximumf>, %131, %cst_65 [2] : vector<2x16x16xf32> to vector<2x16xf32>
    %133 = vector.shape_cast %132 : vector<2x16xf32> to vector<2x16x1xf32>
    %134 = vector.broadcast %133 : vector<2x16x1xf32> to vector<2x16x16xf32>
    %135 = arith.subf %131, %134 : vector<2x16x16xf32>
    %136 = math.exp %135 : vector<2x16x16xf32>
    %cst_66 = arith.constant dense<0.000000e+00> : vector<2x16xf32>
    %137 = vector.multi_reduction <add>, %136, %cst_66 [2] : vector<2x16x16xf32> to vector<2x16xf32>
    %138 = vector.shape_cast %137 : vector<2x16xf32> to vector<2x16x1xf32>
    %139 = tpu.reciprocal %138 {approx = true} : vector<2x16x1xf32> -> vector<2x16x1xf32>
    %140 = vector.broadcast %139 : vector<2x16x1xf32> to vector<2x16x16xf32>
    %141 = arith.mulf %136, %140 : vector<2x16x16xf32>
    %142 = arith.truncf %141 : vector<2x16x16xf32> to vector<2x16x16xbf16>
    %143 = arith.truncf %123 : vector<2x16x16xf32> to vector<2x16x16xbf16>
    "tpu.trace_start"() <{level = 10 : i32, message = "bts,bsd->btd"}> : () -> ()
    %cst_67 = arith.constant dense<0.000000e+00> : vector<2x16x16xf32>
    %144 = tpu.matmul %142, %143, %cst_67 {dimension_numbers = #tpu.dot_dimension_numbers<[2], [1], [1], [2], [0, 0, 0, 1, 1, 2], [0], [0]>} : vector<2x16x16xbf16>, vector<2x16x16xbf16>, vector<2x16x16xf32> -> vector<2x16x16xf32>
    "tpu.trace_stop"() : () -> ()
    %145 = vector.shape_cast %144 : vector<2x16x16xf32> to vector<32x16xf32>
    %146 = arith.truncf %145 : vector<32x16xf32> to vector<32x16xbf16>
    %c1_68 = arith.constant 1 : index
    %c0_69 = arith.constant 0 : index
    %c0_70 = arith.constant 0 : index
    %147 = vector.load %arg5[%c1_68, %c0_69, %c0_70] : memref<8x16x64xbf16, #tpu.memory_space<vmem>>, vector<1x16x64xbf16>
    %148 = vector.shape_cast %147 : vector<1x16x64xbf16> to vector<16x64xbf16>
    %cst_71 = arith.constant dense<0.000000e+00> : vector<32x64xf32>
    %149 = tpu.matmul %146, %148, %cst_71 {dimension_numbers = #tpu.dot_dimension_numbers<[1], [0], [0], [1], [0, 0, 1, 1], [], []>} : vector<32x16xbf16>, vector<16x64xbf16>, vector<32x64xf32> -> vector<32x64xf32>
    %150 = arith.addf %99, %149 : vector<32x64xf32>
    %c2 = arith.constant 2 : index
    %c0_72 = arith.constant 0 : index
    %c0_73 = arith.constant 0 : index
    %151 = vector.load %arg4[%c2, %c0_72, %c0_73] : memref<24x64x16xbf16, #tpu.memory_space<vmem>>, vector<1x64x16xbf16>
    %152 = vector.shape_cast %151 : vector<1x64x16xbf16> to vector<64x16xbf16>
    %c6 = arith.constant 6 : index
    %c0_74 = arith.constant 0 : index
    %c0_75 = arith.constant 0 : index
    %153 = vector.load %arg4[%c6, %c0_74, %c0_75] : memref<24x64x16xbf16, #tpu.memory_space<vmem>>, vector<1x64x16xbf16>
    %154 = vector.shape_cast %153 : vector<1x64x16xbf16> to vector<64x16xbf16>
    %c10_76 = arith.constant 10 : index
    %c0_77 = arith.constant 0 : index
    %c0_78 = arith.constant 0 : index
    %155 = vector.load %arg4[%c10_76, %c0_77, %c0_78] : memref<24x64x16xbf16, #tpu.memory_space<vmem>>, vector<1x64x16xbf16>
    %156 = vector.shape_cast %155 : vector<1x64x16xbf16> to vector<64x16xbf16>
    %c0_79 = arith.constant 0 : index
    %c11 = arith.constant 11 : index
    %c0_80 = arith.constant 0 : index
    %157 = vector.load %arg9[%c0_79, %c11, %c0_80] : memref<2x24x256xf32, #tpu.memory_space<vmem>>, vector<1x1x16xf32>
    %158 = vector.shape_cast %157 : vector<1x1x16xf32> to vector<1x16xf32>
    %c0_81 = arith.constant 0 : index
    %c15 = arith.constant 15 : index
    %c0_82 = arith.constant 0 : index
    %159 = vector.load %arg9[%c0_81, %c15, %c0_82] : memref<2x24x256xf32, #tpu.memory_space<vmem>>, vector<1x1x16xf32>
    %160 = vector.shape_cast %159 : vector<1x1x16xf32> to vector<1x16xf32>
    %c0_83 = arith.constant 0 : index
    %c19 = arith.constant 19 : index
    %c0_84 = arith.constant 0 : index
    %161 = vector.load %arg9[%c0_83, %c19, %c0_84] : memref<2x24x256xf32, #tpu.memory_space<vmem>>, vector<1x1x16xf32>
    %162 = vector.shape_cast %161 : vector<1x1x16xf32> to vector<1x16xf32>
    %cst_85 = arith.constant dense<0.000000e+00> : vector<32x16xf32>
    %163 = tpu.matmul %47, %152, %cst_85 {dimension_numbers = #tpu.dot_dimension_numbers<[1], [0], [0], [1], [0, 0, 1, 1], [], []>} : vector<32x64xbf16>, vector<64x16xbf16>, vector<32x16xf32> -> vector<32x16xf32>
    %164 = vector.broadcast %158 : vector<1x16xf32> to vector<32x16xf32>
    %165 = arith.addf %163, %164 : vector<32x16xf32>
    %166 = vector.shape_cast %165 : vector<32x16xf32> to vector<2x16x16xf32>
    %cst_86 = arith.constant dense<0.000000e+00> : vector<32x16xf32>
    %167 = tpu.matmul %47, %154, %cst_86 {dimension_numbers = #tpu.dot_dimension_numbers<[1], [0], [0], [1], [0, 0, 1, 1], [], []>} : vector<32x64xbf16>, vector<64x16xbf16>, vector<32x16xf32> -> vector<32x16xf32>
    %168 = vector.broadcast %160 : vector<1x16xf32> to vector<32x16xf32>
    %169 = arith.addf %167, %168 : vector<32x16xf32>
    %170 = vector.shape_cast %169 : vector<32x16xf32> to vector<2x16x16xf32>
    %cst_87 = arith.constant dense<0.000000e+00> : vector<32x16xf32>
    %171 = tpu.matmul %47, %156, %cst_87 {dimension_numbers = #tpu.dot_dimension_numbers<[1], [0], [0], [1], [0, 0, 1, 1], [], []>} : vector<32x64xbf16>, vector<64x16xbf16>, vector<32x16xf32> -> vector<32x16xf32>
    %172 = vector.broadcast %162 : vector<1x16xf32> to vector<32x16xf32>
    %173 = arith.addf %171, %172 : vector<32x16xf32>
    %174 = vector.shape_cast %173 : vector<32x16xf32> to vector<2x16x16xf32>
    %175 = arith.truncf %166 : vector<2x16x16xf32> to vector<2x16x16xbf16>
    %176 = arith.truncf %170 : vector<2x16x16xf32> to vector<2x16x16xbf16>
    "tpu.trace_start"() <{level = 10 : i32, message = "btd,bsd->bts"}> : () -> ()
    %cst_88 = arith.constant dense<0.000000e+00> : vector<2x16x16xf32>
    %177 = tpu.matmul %175, %176, %cst_88 {dimension_numbers = #tpu.dot_dimension_numbers<[2], [2], [1], [1], [0, 0, 0, 1, 1, 1], [0], [0]>} : vector<2x16x16xbf16>, vector<2x16x16xbf16>, vector<2x16x16xf32> -> vector<2x16x16xf32>
    "tpu.trace_stop"() : () -> ()
    %cst_89 = arith.constant 2.500000e-01 : f32
    %178 = vector.broadcast %cst_89 : f32 to vector<2x16x16xf32>
    %179 = arith.mulf %177, %178 : vector<2x16x16xf32>
    %180 = vector.shape_cast %22 : vector<16x16xf32> to vector<1x16x16xf32>
    %181 = vector.broadcast %180 : vector<1x16x16xf32> to vector<2x16x16xf32>
    %182 = arith.addf %179, %181 : vector<2x16x16xf32>
    %cst_90 = arith.constant dense<0xFF800000> : vector<2x16xf32>
    %183 = vector.multi_reduction <maximumf>, %182, %cst_90 [2] : vector<2x16x16xf32> to vector<2x16xf32>
    %184 = vector.shape_cast %183 : vector<2x16xf32> to vector<2x16x1xf32>
    %185 = vector.broadcast %184 : vector<2x16x1xf32> to vector<2x16x16xf32>
    %186 = arith.subf %182, %185 : vector<2x16x16xf32>
    %187 = math.exp %186 : vector<2x16x16xf32>
    %cst_91 = arith.constant dense<0.000000e+00> : vector<2x16xf32>
    %188 = vector.multi_reduction <add>, %187, %cst_91 [2] : vector<2x16x16xf32> to vector<2x16xf32>
    %189 = vector.shape_cast %188 : vector<2x16xf32> to vector<2x16x1xf32>
    %190 = tpu.reciprocal %189 {approx = true} : vector<2x16x1xf32> -> vector<2x16x1xf32>
    %191 = vector.broadcast %190 : vector<2x16x1xf32> to vector<2x16x16xf32>
    %192 = arith.mulf %187, %191 : vector<2x16x16xf32>
    %193 = arith.truncf %192 : vector<2x16x16xf32> to vector<2x16x16xbf16>
    %194 = arith.truncf %174 : vector<2x16x16xf32> to vector<2x16x16xbf16>
    "tpu.trace_start"() <{level = 10 : i32, message = "bts,bsd->btd"}> : () -> ()
    %cst_92 = arith.constant dense<0.000000e+00> : vector<2x16x16xf32>
    %195 = tpu.matmul %193, %194, %cst_92 {dimension_numbers = #tpu.dot_dimension_numbers<[2], [1], [1], [2], [0, 0, 0, 1, 1, 2], [0], [0]>} : vector<2x16x16xbf16>, vector<2x16x16xbf16>, vector<2x16x16xf32> -> vector<2x16x16xf32>
    "tpu.trace_stop"() : () -> ()
    %196 = vector.shape_cast %195 : vector<2x16x16xf32> to vector<32x16xf32>
    %197 = arith.truncf %196 : vector<32x16xf32> to vector<32x16xbf16>
    %c2_93 = arith.constant 2 : index
    %c0_94 = arith.constant 0 : index
    %c0_95 = arith.constant 0 : index
    %198 = vector.load %arg5[%c2_93, %c0_94, %c0_95] : memref<8x16x64xbf16, #tpu.memory_space<vmem>>, vector<1x16x64xbf16>
    %199 = vector.shape_cast %198 : vector<1x16x64xbf16> to vector<16x64xbf16>
    %cst_96 = arith.constant dense<0.000000e+00> : vector<32x64xf32>
    %200 = tpu.matmul %197, %199, %cst_96 {dimension_numbers = #tpu.dot_dimension_numbers<[1], [0], [0], [1], [0, 0, 1, 1], [], []>} : vector<32x16xbf16>, vector<16x64xbf16>, vector<32x64xf32> -> vector<32x64xf32>
    %201 = arith.addf %150, %200 : vector<32x64xf32>
    %c3 = arith.constant 3 : index
    %c0_97 = arith.constant 0 : index
    %c0_98 = arith.constant 0 : index
    %202 = vector.load %arg4[%c3, %c0_97, %c0_98] : memref<24x64x16xbf16, #tpu.memory_space<vmem>>, vector<1x64x16xbf16>
    %203 = vector.shape_cast %202 : vector<1x64x16xbf16> to vector<64x16xbf16>
    %c7 = arith.constant 7 : index
    %c0_99 = arith.constant 0 : index
    %c0_100 = arith.constant 0 : index
    %204 = vector.load %arg4[%c7, %c0_99, %c0_100] : memref<24x64x16xbf16, #tpu.memory_space<vmem>>, vector<1x64x16xbf16>
    %205 = vector.shape_cast %204 : vector<1x64x16xbf16> to vector<64x16xbf16>
    %c11_101 = arith.constant 11 : index
    %c0_102 = arith.constant 0 : index
    %c0_103 = arith.constant 0 : index
    %206 = vector.load %arg4[%c11_101, %c0_102, %c0_103] : memref<24x64x16xbf16, #tpu.memory_space<vmem>>, vector<1x64x16xbf16>
    %207 = vector.shape_cast %206 : vector<1x64x16xbf16> to vector<64x16xbf16>
    %c0_104 = arith.constant 0 : index
    %c12 = arith.constant 12 : index
    %c0_105 = arith.constant 0 : index
    %208 = vector.load %arg9[%c0_104, %c12, %c0_105] : memref<2x24x256xf32, #tpu.memory_space<vmem>>, vector<1x1x16xf32>
    %209 = vector.shape_cast %208 : vector<1x1x16xf32> to vector<1x16xf32>
    %c0_106 = arith.constant 0 : index
    %c16 = arith.constant 16 : index
    %c0_107 = arith.constant 0 : index
    %210 = vector.load %arg9[%c0_106, %c16, %c0_107] : memref<2x24x256xf32, #tpu.memory_space<vmem>>, vector<1x1x16xf32>
    %211 = vector.shape_cast %210 : vector<1x1x16xf32> to vector<1x16xf32>
    %c0_108 = arith.constant 0 : index
    %c20 = arith.constant 20 : index
    %c0_109 = arith.constant 0 : index
    %212 = vector.load %arg9[%c0_108, %c20, %c0_109] : memref<2x24x256xf32, #tpu.memory_space<vmem>>, vector<1x1x16xf32>
    %213 = vector.shape_cast %212 : vector<1x1x16xf32> to vector<1x16xf32>
    %cst_110 = arith.constant dense<0.000000e+00> : vector<32x16xf32>
    %214 = tpu.matmul %47, %203, %cst_110 {dimension_numbers = #tpu.dot_dimension_numbers<[1], [0], [0], [1], [0, 0, 1, 1], [], []>} : vector<32x64xbf16>, vector<64x16xbf16>, vector<32x16xf32> -> vector<32x16xf32>
    %215 = vector.broadcast %209 : vector<1x16xf32> to vector<32x16xf32>
    %216 = arith.addf %214, %215 : vector<32x16xf32>
    %217 = vector.shape_cast %216 : vector<32x16xf32> to vector<2x16x16xf32>
    %cst_111 = arith.constant dense<0.000000e+00> : vector<32x16xf32>
    %218 = tpu.matmul %47, %205, %cst_111 {dimension_numbers = #tpu.dot_dimension_numbers<[1], [0], [0], [1], [0, 0, 1, 1], [], []>} : vector<32x64xbf16>, vector<64x16xbf16>, vector<32x16xf32> -> vector<32x16xf32>
    %219 = vector.broadcast %211 : vector<1x16xf32> to vector<32x16xf32>
    %220 = arith.addf %218, %219 : vector<32x16xf32>
    %221 = vector.shape_cast %220 : vector<32x16xf32> to vector<2x16x16xf32>
    %cst_112 = arith.constant dense<0.000000e+00> : vector<32x16xf32>
    %222 = tpu.matmul %47, %207, %cst_112 {dimension_numbers = #tpu.dot_dimension_numbers<[1], [0], [0], [1], [0, 0, 1, 1], [], []>} : vector<32x64xbf16>, vector<64x16xbf16>, vector<32x16xf32> -> vector<32x16xf32>
    %223 = vector.broadcast %213 : vector<1x16xf32> to vector<32x16xf32>
    %224 = arith.addf %222, %223 : vector<32x16xf32>
    %225 = vector.shape_cast %224 : vector<32x16xf32> to vector<2x16x16xf32>
    %226 = arith.truncf %217 : vector<2x16x16xf32> to vector<2x16x16xbf16>
    %227 = arith.truncf %221 : vector<2x16x16xf32> to vector<2x16x16xbf16>
    "tpu.trace_start"() <{level = 10 : i32, message = "btd,bsd->bts"}> : () -> ()
    %cst_113 = arith.constant dense<0.000000e+00> : vector<2x16x16xf32>
    %228 = tpu.matmul %226, %227, %cst_113 {dimension_numbers = #tpu.dot_dimension_numbers<[2], [2], [1], [1], [0, 0, 0, 1, 1, 1], [0], [0]>} : vector<2x16x16xbf16>, vector<2x16x16xbf16>, vector<2x16x16xf32> -> vector<2x16x16xf32>
    "tpu.trace_stop"() : () -> ()
    %cst_114 = arith.constant 2.500000e-01 : f32
    %229 = vector.broadcast %cst_114 : f32 to vector<2x16x16xf32>
    %230 = arith.mulf %228, %229 : vector<2x16x16xf32>
    %231 = vector.shape_cast %22 : vector<16x16xf32> to vector<1x16x16xf32>
    %232 = vector.broadcast %231 : vector<1x16x16xf32> to vector<2x16x16xf32>
    %233 = arith.addf %230, %232 : vector<2x16x16xf32>
    %cst_115 = arith.constant dense<0xFF800000> : vector<2x16xf32>
    %234 = vector.multi_reduction <maximumf>, %233, %cst_115 [2] : vector<2x16x16xf32> to vector<2x16xf32>
    %235 = vector.shape_cast %234 : vector<2x16xf32> to vector<2x16x1xf32>
    %236 = vector.broadcast %235 : vector<2x16x1xf32> to vector<2x16x16xf32>
    %237 = arith.subf %233, %236 : vector<2x16x16xf32>
    %238 = math.exp %237 : vector<2x16x16xf32>
    %cst_116 = arith.constant dense<0.000000e+00> : vector<2x16xf32>
    %239 = vector.multi_reduction <add>, %238, %cst_116 [2] : vector<2x16x16xf32> to vector<2x16xf32>
    %240 = vector.shape_cast %239 : vector<2x16xf32> to vector<2x16x1xf32>
    %241 = tpu.reciprocal %240 {approx = true} : vector<2x16x1xf32> -> vector<2x16x1xf32>
    %242 = vector.broadcast %241 : vector<2x16x1xf32> to vector<2x16x16xf32>
    %243 = arith.mulf %238, %242 : vector<2x16x16xf32>
    %244 = arith.truncf %243 : vector<2x16x16xf32> to vector<2x16x16xbf16>
    %245 = arith.truncf %225 : vector<2x16x16xf32> to vector<2x16x16xbf16>
    "tpu.trace_start"() <{level = 10 : i32, message = "bts,bsd->btd"}> : () -> ()
    %cst_117 = arith.constant dense<0.000000e+00> : vector<2x16x16xf32>
    %246 = tpu.matmul %244, %245, %cst_117 {dimension_numbers = #tpu.dot_dimension_numbers<[2], [1], [1], [2], [0, 0, 0, 1, 1, 2], [0], [0]>} : vector<2x16x16xbf16>, vector<2x16x16xbf16>, vector<2x16x16xf32> -> vector<2x16x16xf32>
    "tpu.trace_stop"() : () -> ()
    %247 = vector.shape_cast %246 : vector<2x16x16xf32> to vector<32x16xf32>
    %248 = arith.truncf %247 : vector<32x16xf32> to vector<32x16xbf16>
    %c3_118 = arith.constant 3 : index
    %c0_119 = arith.constant 0 : index
    %c0_120 = arith.constant 0 : index
    %249 = vector.load %arg5[%c3_118, %c0_119, %c0_120] : memref<8x16x64xbf16, #tpu.memory_space<vmem>>, vector<1x16x64xbf16>
    %250 = vector.shape_cast %249 : vector<1x16x64xbf16> to vector<16x64xbf16>
    %cst_121 = arith.constant dense<0.000000e+00> : vector<32x64xf32>
    %251 = tpu.matmul %248, %250, %cst_121 {dimension_numbers = #tpu.dot_dimension_numbers<[1], [0], [0], [1], [0, 0, 1, 1], [], []>} : vector<32x16xbf16>, vector<16x64xbf16>, vector<32x64xf32> -> vector<32x64xf32>
    %252 = arith.addf %201, %251 : vector<32x64xf32>
    %253 = arith.addf %16, %252 : vector<32x64xf32>
    %c0_122 = arith.constant 0 : index
    %c2_123 = arith.constant 2 : index
    %c0_124 = arith.constant 0 : index
    %254 = vector.load %arg9[%c0_122, %c2_123, %c0_124] : memref<2x24x256xf32, #tpu.memory_space<vmem>>, vector<1x1x64xf32>
    %255 = vector.shape_cast %254 : vector<1x1x64xf32> to vector<1x64xf32>
    %256 = vector.broadcast %255 : vector<1x64xf32> to vector<32x64xf32>
    %257 = arith.addf %253, %256 : vector<32x64xf32>
    %c0_125 = arith.constant 0 : index
    %c3_126 = arith.constant 3 : index
    %c0_127 = arith.constant 0 : index
    %258 = vector.load %arg9[%c0_125, %c3_126, %c0_127] : memref<2x24x256xf32, #tpu.memory_space<vmem>>, vector<1x1x64xf32>
    %259 = vector.shape_cast %258 : vector<1x1x64xf32> to vector<1x64xf32>
    %c0_128 = arith.constant 0 : index
    %c4_129 = arith.constant 4 : index
    %c0_130 = arith.constant 0 : index
    %260 = vector.load %arg9[%c0_128, %c4_129, %c0_130] : memref<2x24x256xf32, #tpu.memory_space<vmem>>, vector<1x1x64xf32>
    %261 = vector.shape_cast %260 : vector<1x1x64xf32> to vector<1x64xf32>
    %cst_131 = arith.constant dense<0.000000e+00> : vector<32xf32>
    %262 = vector.multi_reduction <add>, %257, %cst_131 [1] : vector<32x64xf32> to vector<32xf32>
    %263 = vector.shape_cast %262 : vector<32xf32> to vector<32x1xf32>
    %cst_132 = arith.constant 6.400000e+01 : f32
    %264 = vector.broadcast %cst_132 : f32 to vector<32x1xf32>
    %265 = arith.divf %263, %264 : vector<32x1xf32>
    %266 = vector.broadcast %265 : vector<32x1xf32> to vector<32x64xf32>
    %267 = arith.subf %257, %266 : vector<32x64xf32>
    %268 = arith.mulf %267, %267 : vector<32x64xf32>
    %cst_133 = arith.constant dense<0.000000e+00> : vector<32xf32>
    %269 = vector.multi_reduction <add>, %268, %cst_133 [1] : vector<32x64xf32> to vector<32xf32>
    %270 = vector.shape_cast %269 : vector<32xf32> to vector<32x1xf32>
    %cst_134 = arith.constant 6.400000e+01 : f32
    %271 = vector.broadcast %cst_134 : f32 to vector<32x1xf32>
    %272 = arith.divf %270, %271 : vector<32x1xf32>
    %cst_135 = arith.constant 9.99999974E-6 : f32
    %273 = vector.broadcast %cst_135 : f32 to vector<32x1xf32>
    %274 = arith.addf %272, %273 : vector<32x1xf32>
    %275 = math.rsqrt %274 : vector<32x1xf32>
    %276 = vector.broadcast %275 : vector<32x1xf32> to vector<32x64xf32>
    %277 = arith.mulf %267, %276 : vector<32x64xf32>
    %278 = vector.broadcast %259 : vector<1x64xf32> to vector<32x64xf32>
    %279 = arith.mulf %277, %278 : vector<32x64xf32>
    %280 = vector.broadcast %261 : vector<1x64xf32> to vector<32x64xf32>
    %281 = arith.addf %279, %280 : vector<32x64xf32>
    %282 = arith.truncf %281 : vector<32x64xf32> to vector<32x64xbf16>
    %c0_136 = arith.constant 0 : index
    %c0_137 = arith.constant 0 : index
    %c0_138 = arith.constant 0 : index
    %283 = vector.load %arg6[%c0_136, %c0_137, %c0_138] : memref<2x64x256xbf16, #tpu.memory_space<vmem>>, vector<1x64x256xbf16>
    %284 = vector.shape_cast %283 : vector<1x64x256xbf16> to vector<64x256xbf16>
    %cst_139 = arith.constant dense<0.000000e+00> : vector<32x256xf32>
    %285 = tpu.matmul %282, %284, %cst_139 {dimension_numbers = #tpu.dot_dimension_numbers<[1], [0], [0], [1], [0, 0, 1, 1], [], []>} : vector<32x64xbf16>, vector<64x256xbf16>, vector<32x256xf32> -> vector<32x256xf32>
    %c0_140 = arith.constant 0 : index
    %c5_141 = arith.constant 5 : index
    %c0_142 = arith.constant 0 : index
    %286 = vector.load %arg9[%c0_140, %c5_141, %c0_142] : memref<2x24x256xf32, #tpu.memory_space<vmem>>, vector<1x1x256xf32>
    %287 = vector.shape_cast %286 : vector<1x1x256xf32> to vector<1x256xf32>
    %288 = vector.broadcast %287 : vector<1x256xf32> to vector<32x256xf32>
    %289 = arith.addf %285, %288 : vector<32x256xf32>
    %cst_143 = arith.constant 5.000000e-01 : f32
    %290 = vector.broadcast %cst_143 : f32 to vector<32x256xf32>
    %291 = arith.mulf %290, %289 : vector<32x256xf32>
    %cst_144 = arith.constant 4.471500e-02 : f32
    %292 = vector.broadcast %cst_144 : f32 to vector<32x256xf32>
    %293 = arith.mulf %292, %289 : vector<32x256xf32>
    %294 = arith.mulf %293, %289 : vector<32x256xf32>
    %295 = arith.mulf %294, %289 : vector<32x256xf32>
    %296 = arith.addf %289, %295 : vector<32x256xf32>
    %cst_145 = arith.constant 0.797884583 : f32
    %297 = vector.broadcast %cst_145 : f32 to vector<32x256xf32>
    %298 = arith.mulf %297, %296 : vector<32x256xf32>
    %299 = math.tanh %298 : vector<32x256xf32>
    %cst_146 = arith.constant 1.000000e+00 : f32
    %300 = vector.broadcast %cst_146 : f32 to vector<32x256xf32>
    %301 = arith.addf %300, %299 : vector<32x256xf32>
    %302 = arith.mulf %291, %301 : vector<32x256xf32>
    %303 = arith.truncf %302 : vector<32x256xf32> to vector<32x256xbf16>
    %c0_147 = arith.constant 0 : index
    %c0_148 = arith.constant 0 : index
    %c0_149 = arith.constant 0 : index
    %304 = vector.load %arg7[%c0_147, %c0_148, %c0_149] : memref<2x256x64xbf16, #tpu.memory_space<vmem>>, vector<1x256x64xbf16>
    %305 = vector.shape_cast %304 : vector<1x256x64xbf16> to vector<256x64xbf16>
    %cst_150 = arith.constant dense<0.000000e+00> : vector<32x64xf32>
    %306 = tpu.matmul %303, %305, %cst_150 {dimension_numbers = #tpu.dot_dimension_numbers<[1], [0], [0], [1], [0, 0, 1, 1], [], []>} : vector<32x256xbf16>, vector<256x64xbf16>, vector<32x64xf32> -> vector<32x64xf32>
    %307 = arith.addf %257, %306 : vector<32x64xf32>
    %c0_151 = arith.constant 0 : index
    %c6_152 = arith.constant 6 : index
    %c0_153 = arith.constant 0 : index
    %308 = vector.load %arg9[%c0_151, %c6_152, %c0_153] : memref<2x24x256xf32, #tpu.memory_space<vmem>>, vector<1x1x64xf32>
    %309 = vector.shape_cast %308 : vector<1x1x64xf32> to vector<1x64xf32>
    %310 = vector.broadcast %309 : vector<1x64xf32> to vector<32x64xf32>
    %311 = arith.addf %307, %310 : vector<32x64xf32>
    %c1_154 = arith.constant 1 : index
    %c0_155 = arith.constant 0 : index
    %c0_156 = arith.constant 0 : index
    %312 = vector.load %arg9[%c1_154, %c0_155, %c0_156] : memref<2x24x256xf32, #tpu.memory_space<vmem>>, vector<1x1x64xf32>
    %313 = vector.shape_cast %312 : vector<1x1x64xf32> to vector<1x64xf32>
    %c1_157 = arith.constant 1 : index
    %c1_158 = arith.constant 1 : index
    %c0_159 = arith.constant 0 : index
    %314 = vector.load %arg9[%c1_157, %c1_158, %c0_159] : memref<2x24x256xf32, #tpu.memory_space<vmem>>, vector<1x1x64xf32>
    %315 = vector.shape_cast %314 : vector<1x1x64xf32> to vector<1x64xf32>
    %cst_160 = arith.constant dense<0.000000e+00> : vector<32xf32>
    %316 = vector.multi_reduction <add>, %311, %cst_160 [1] : vector<32x64xf32> to vector<32xf32>
    %317 = vector.shape_cast %316 : vector<32xf32> to vector<32x1xf32>
    %cst_161 = arith.constant 6.400000e+01 : f32
    %318 = vector.broadcast %cst_161 : f32 to vector<32x1xf32>
    %319 = arith.divf %317, %318 : vector<32x1xf32>
    %320 = vector.broadcast %319 : vector<32x1xf32> to vector<32x64xf32>
    %321 = arith.subf %311, %320 : vector<32x64xf32>
    %322 = arith.mulf %321, %321 : vector<32x64xf32>
    %cst_162 = arith.constant dense<0.000000e+00> : vector<32xf32>
    %323 = vector.multi_reduction <add>, %322, %cst_162 [1] : vector<32x64xf32> to vector<32xf32>
    %324 = vector.shape_cast %323 : vector<32xf32> to vector<32x1xf32>
    %cst_163 = arith.constant 6.400000e+01 : f32
    %325 = vector.broadcast %cst_163 : f32 to vector<32x1xf32>
    %326 = arith.divf %324, %325 : vector<32x1xf32>
    %cst_164 = arith.constant 9.99999974E-6 : f32
    %327 = vector.broadcast %cst_164 : f32 to vector<32x1xf32>
    %328 = arith.addf %326, %327 : vector<32x1xf32>
    %329 = math.rsqrt %328 : vector<32x1xf32>
    %330 = vector.broadcast %329 : vector<32x1xf32> to vector<32x64xf32>
    %331 = arith.mulf %321, %330 : vector<32x64xf32>
    %332 = vector.broadcast %313 : vector<1x64xf32> to vector<32x64xf32>
    %333 = arith.mulf %331, %332 : vector<32x64xf32>
    %334 = vector.broadcast %315 : vector<1x64xf32> to vector<32x64xf32>
    %335 = arith.addf %333, %334 : vector<32x64xf32>
    %336 = arith.truncf %335 : vector<32x64xf32> to vector<32x64xbf16>
    %cst_165 = arith.constant 0.000000e+00 : f32
    %337 = vector.broadcast %cst_165 : f32 to vector<32x64xf32>
    %c12_166 = arith.constant 12 : index
    %c0_167 = arith.constant 0 : index
    %c0_168 = arith.constant 0 : index
    %338 = vector.load %arg4[%c12_166, %c0_167, %c0_168] : memref<24x64x16xbf16, #tpu.memory_space<vmem>>, vector<1x64x16xbf16>
    %339 = vector.shape_cast %338 : vector<1x64x16xbf16> to vector<64x16xbf16>
    %c16_169 = arith.constant 16 : index
    %c0_170 = arith.constant 0 : index
    %c0_171 = arith.constant 0 : index
    %340 = vector.load %arg4[%c16_169, %c0_170, %c0_171] : memref<24x64x16xbf16, #tpu.memory_space<vmem>>, vector<1x64x16xbf16>
    %341 = vector.shape_cast %340 : vector<1x64x16xbf16> to vector<64x16xbf16>
    %c20_172 = arith.constant 20 : index
    %c0_173 = arith.constant 0 : index
    %c0_174 = arith.constant 0 : index
    %342 = vector.load %arg4[%c20_172, %c0_173, %c0_174] : memref<24x64x16xbf16, #tpu.memory_space<vmem>>, vector<1x64x16xbf16>
    %343 = vector.shape_cast %342 : vector<1x64x16xbf16> to vector<64x16xbf16>
    %c1_175 = arith.constant 1 : index
    %c9_176 = arith.constant 9 : index
    %c0_177 = arith.constant 0 : index
    %344 = vector.load %arg9[%c1_175, %c9_176, %c0_177] : memref<2x24x256xf32, #tpu.memory_space<vmem>>, vector<1x1x16xf32>
    %345 = vector.shape_cast %344 : vector<1x1x16xf32> to vector<1x16xf32>
    %c1_178 = arith.constant 1 : index
    %c13_179 = arith.constant 13 : index
    %c0_180 = arith.constant 0 : index
    %346 = vector.load %arg9[%c1_178, %c13_179, %c0_180] : memref<2x24x256xf32, #tpu.memory_space<vmem>>, vector<1x1x16xf32>
    %347 = vector.shape_cast %346 : vector<1x1x16xf32> to vector<1x16xf32>
    %c1_181 = arith.constant 1 : index
    %c17_182 = arith.constant 17 : index
    %c0_183 = arith.constant 0 : index
    %348 = vector.load %arg9[%c1_181, %c17_182, %c0_183] : memref<2x24x256xf32, #tpu.memory_space<vmem>>, vector<1x1x16xf32>
    %349 = vector.shape_cast %348 : vector<1x1x16xf32> to vector<1x16xf32>
    %cst_184 = arith.constant dense<0.000000e+00> : vector<32x16xf32>
    %350 = tpu.matmul %336, %339, %cst_184 {dimension_numbers = #tpu.dot_dimension_numbers<[1], [0], [0], [1], [0, 0, 1, 1], [], []>} : vector<32x64xbf16>, vector<64x16xbf16>, vector<32x16xf32> -> vector<32x16xf32>
    %351 = vector.broadcast %345 : vector<1x16xf32> to vector<32x16xf32>
    %352 = arith.addf %350, %351 : vector<32x16xf32>
    %353 = vector.shape_cast %352 : vector<32x16xf32> to vector<2x16x16xf32>
    %cst_185 = arith.constant dense<0.000000e+00> : vector<32x16xf32>
    %354 = tpu.matmul %336, %341, %cst_185 {dimension_numbers = #tpu.dot_dimension_numbers<[1], [0], [0], [1], [0, 0, 1, 1], [], []>} : vector<32x64xbf16>, vector<64x16xbf16>, vector<32x16xf32> -> vector<32x16xf32>
    %355 = vector.broadcast %347 : vector<1x16xf32> to vector<32x16xf32>
    %356 = arith.addf %354, %355 : vector<32x16xf32>
    %357 = vector.shape_cast %356 : vector<32x16xf32> to vector<2x16x16xf32>
    %cst_186 = arith.constant dense<0.000000e+00> : vector<32x16xf32>
    %358 = tpu.matmul %336, %343, %cst_186 {dimension_numbers = #tpu.dot_dimension_numbers<[1], [0], [0], [1], [0, 0, 1, 1], [], []>} : vector<32x64xbf16>, vector<64x16xbf16>, vector<32x16xf32> -> vector<32x16xf32>
    %359 = vector.broadcast %349 : vector<1x16xf32> to vector<32x16xf32>
    %360 = arith.addf %358, %359 : vector<32x16xf32>
    %361 = vector.shape_cast %360 : vector<32x16xf32> to vector<2x16x16xf32>
    %362 = arith.truncf %353 : vector<2x16x16xf32> to vector<2x16x16xbf16>
    %363 = arith.truncf %357 : vector<2x16x16xf32> to vector<2x16x16xbf16>
    "tpu.trace_start"() <{level = 10 : i32, message = "btd,bsd->bts"}> : () -> ()
    %cst_187 = arith.constant dense<0.000000e+00> : vector<2x16x16xf32>
    %364 = tpu.matmul %362, %363, %cst_187 {dimension_numbers = #tpu.dot_dimension_numbers<[2], [2], [1], [1], [0, 0, 0, 1, 1, 1], [0], [0]>} : vector<2x16x16xbf16>, vector<2x16x16xbf16>, vector<2x16x16xf32> -> vector<2x16x16xf32>
    "tpu.trace_stop"() : () -> ()
    %cst_188 = arith.constant 2.500000e-01 : f32
    %365 = vector.broadcast %cst_188 : f32 to vector<2x16x16xf32>
    %366 = arith.mulf %364, %365 : vector<2x16x16xf32>
    %367 = vector.shape_cast %22 : vector<16x16xf32> to vector<1x16x16xf32>
    %368 = vector.broadcast %367 : vector<1x16x16xf32> to vector<2x16x16xf32>
    %369 = arith.addf %366, %368 : vector<2x16x16xf32>
    %cst_189 = arith.constant dense<0xFF800000> : vector<2x16xf32>
    %370 = vector.multi_reduction <maximumf>, %369, %cst_189 [2] : vector<2x16x16xf32> to vector<2x16xf32>
    %371 = vector.shape_cast %370 : vector<2x16xf32> to vector<2x16x1xf32>
    %372 = vector.broadcast %371 : vector<2x16x1xf32> to vector<2x16x16xf32>
    %373 = arith.subf %369, %372 : vector<2x16x16xf32>
    %374 = math.exp %373 : vector<2x16x16xf32>
    %cst_190 = arith.constant dense<0.000000e+00> : vector<2x16xf32>
    %375 = vector.multi_reduction <add>, %374, %cst_190 [2] : vector<2x16x16xf32> to vector<2x16xf32>
    %376 = vector.shape_cast %375 : vector<2x16xf32> to vector<2x16x1xf32>
    %377 = tpu.reciprocal %376 {approx = true} : vector<2x16x1xf32> -> vector<2x16x1xf32>
    %378 = vector.broadcast %377 : vector<2x16x1xf32> to vector<2x16x16xf32>
    %379 = arith.mulf %374, %378 : vector<2x16x16xf32>
    %380 = arith.truncf %379 : vector<2x16x16xf32> to vector<2x16x16xbf16>
    %381 = arith.truncf %361 : vector<2x16x16xf32> to vector<2x16x16xbf16>
    "tpu.trace_start"() <{level = 10 : i32, message = "bts,bsd->btd"}> : () -> ()
    %cst_191 = arith.constant dense<0.000000e+00> : vector<2x16x16xf32>
    %382 = tpu.matmul %380, %381, %cst_191 {dimension_numbers = #tpu.dot_dimension_numbers<[2], [1], [1], [2], [0, 0, 0, 1, 1, 2], [0], [0]>} : vector<2x16x16xbf16>, vector<2x16x16xbf16>, vector<2x16x16xf32> -> vector<2x16x16xf32>
    "tpu.trace_stop"() : () -> ()
    %383 = vector.shape_cast %382 : vector<2x16x16xf32> to vector<32x16xf32>
    %384 = arith.truncf %383 : vector<32x16xf32> to vector<32x16xbf16>
    %c4_192 = arith.constant 4 : index
    %c0_193 = arith.constant 0 : index
    %c0_194 = arith.constant 0 : index
    %385 = vector.load %arg5[%c4_192, %c0_193, %c0_194] : memref<8x16x64xbf16, #tpu.memory_space<vmem>>, vector<1x16x64xbf16>
    %386 = vector.shape_cast %385 : vector<1x16x64xbf16> to vector<16x64xbf16>
    %cst_195 = arith.constant dense<0.000000e+00> : vector<32x64xf32>
    %387 = tpu.matmul %384, %386, %cst_195 {dimension_numbers = #tpu.dot_dimension_numbers<[1], [0], [0], [1], [0, 0, 1, 1], [], []>} : vector<32x16xbf16>, vector<16x64xbf16>, vector<32x64xf32> -> vector<32x64xf32>
    %388 = arith.addf %337, %387 : vector<32x64xf32>
    %c13_196 = arith.constant 13 : index
    %c0_197 = arith.constant 0 : index
    %c0_198 = arith.constant 0 : index
    %389 = vector.load %arg4[%c13_196, %c0_197, %c0_198] : memref<24x64x16xbf16, #tpu.memory_space<vmem>>, vector<1x64x16xbf16>
    %390 = vector.shape_cast %389 : vector<1x64x16xbf16> to vector<64x16xbf16>
    %c17_199 = arith.constant 17 : index
    %c0_200 = arith.constant 0 : index
    %c0_201 = arith.constant 0 : index
    %391 = vector.load %arg4[%c17_199, %c0_200, %c0_201] : memref<24x64x16xbf16, #tpu.memory_space<vmem>>, vector<1x64x16xbf16>
    %392 = vector.shape_cast %391 : vector<1x64x16xbf16> to vector<64x16xbf16>
    %c21 = arith.constant 21 : index
    %c0_202 = arith.constant 0 : index
    %c0_203 = arith.constant 0 : index
    %393 = vector.load %arg4[%c21, %c0_202, %c0_203] : memref<24x64x16xbf16, #tpu.memory_space<vmem>>, vector<1x64x16xbf16>
    %394 = vector.shape_cast %393 : vector<1x64x16xbf16> to vector<64x16xbf16>
    %c1_204 = arith.constant 1 : index
    %c10_205 = arith.constant 10 : index
    %c0_206 = arith.constant 0 : index
    %395 = vector.load %arg9[%c1_204, %c10_205, %c0_206] : memref<2x24x256xf32, #tpu.memory_space<vmem>>, vector<1x1x16xf32>
    %396 = vector.shape_cast %395 : vector<1x1x16xf32> to vector<1x16xf32>
    %c1_207 = arith.constant 1 : index
    %c14_208 = arith.constant 14 : index
    %c0_209 = arith.constant 0 : index
    %397 = vector.load %arg9[%c1_207, %c14_208, %c0_209] : memref<2x24x256xf32, #tpu.memory_space<vmem>>, vector<1x1x16xf32>
    %398 = vector.shape_cast %397 : vector<1x1x16xf32> to vector<1x16xf32>
    %c1_210 = arith.constant 1 : index
    %c18_211 = arith.constant 18 : index
    %c0_212 = arith.constant 0 : index
    %399 = vector.load %arg9[%c1_210, %c18_211, %c0_212] : memref<2x24x256xf32, #tpu.memory_space<vmem>>, vector<1x1x16xf32>
    %400 = vector.shape_cast %399 : vector<1x1x16xf32> to vector<1x16xf32>
    %cst_213 = arith.constant dense<0.000000e+00> : vector<32x16xf32>
    %401 = tpu.matmul %336, %390, %cst_213 {dimension_numbers = #tpu.dot_dimension_numbers<[1], [0], [0], [1], [0, 0, 1, 1], [], []>} : vector<32x64xbf16>, vector<64x16xbf16>, vector<32x16xf32> -> vector<32x16xf32>
    %402 = vector.broadcast %396 : vector<1x16xf32> to vector<32x16xf32>
    %403 = arith.addf %401, %402 : vector<32x16xf32>
    %404 = vector.shape_cast %403 : vector<32x16xf32> to vector<2x16x16xf32>
    %cst_214 = arith.constant dense<0.000000e+00> : vector<32x16xf32>
    %405 = tpu.matmul %336, %392, %cst_214 {dimension_numbers = #tpu.dot_dimension_numbers<[1], [0], [0], [1], [0, 0, 1, 1], [], []>} : vector<32x64xbf16>, vector<64x16xbf16>, vector<32x16xf32> -> vector<32x16xf32>
    %406 = vector.broadcast %398 : vector<1x16xf32> to vector<32x16xf32>
    %407 = arith.addf %405, %406 : vector<32x16xf32>
    %408 = vector.shape_cast %407 : vector<32x16xf32> to vector<2x16x16xf32>
    %cst_215 = arith.constant dense<0.000000e+00> : vector<32x16xf32>
    %409 = tpu.matmul %336, %394, %cst_215 {dimension_numbers = #tpu.dot_dimension_numbers<[1], [0], [0], [1], [0, 0, 1, 1], [], []>} : vector<32x64xbf16>, vector<64x16xbf16>, vector<32x16xf32> -> vector<32x16xf32>
    %410 = vector.broadcast %400 : vector<1x16xf32> to vector<32x16xf32>
    %411 = arith.addf %409, %410 : vector<32x16xf32>
    %412 = vector.shape_cast %411 : vector<32x16xf32> to vector<2x16x16xf32>
    %413 = arith.truncf %404 : vector<2x16x16xf32> to vector<2x16x16xbf16>
    %414 = arith.truncf %408 : vector<2x16x16xf32> to vector<2x16x16xbf16>
    "tpu.trace_start"() <{level = 10 : i32, message = "btd,bsd->bts"}> : () -> ()
    %cst_216 = arith.constant dense<0.000000e+00> : vector<2x16x16xf32>
    %415 = tpu.matmul %413, %414, %cst_216 {dimension_numbers = #tpu.dot_dimension_numbers<[2], [2], [1], [1], [0, 0, 0, 1, 1, 1], [0], [0]>} : vector<2x16x16xbf16>, vector<2x16x16xbf16>, vector<2x16x16xf32> -> vector<2x16x16xf32>
    "tpu.trace_stop"() : () -> ()
    %cst_217 = arith.constant 2.500000e-01 : f32
    %416 = vector.broadcast %cst_217 : f32 to vector<2x16x16xf32>
    %417 = arith.mulf %415, %416 : vector<2x16x16xf32>
    %418 = vector.shape_cast %22 : vector<16x16xf32> to vector<1x16x16xf32>
    %419 = vector.broadcast %418 : vector<1x16x16xf32> to vector<2x16x16xf32>
    %420 = arith.addf %417, %419 : vector<2x16x16xf32>
    %cst_218 = arith.constant dense<0xFF800000> : vector<2x16xf32>
    %421 = vector.multi_reduction <maximumf>, %420, %cst_218 [2] : vector<2x16x16xf32> to vector<2x16xf32>
    %422 = vector.shape_cast %421 : vector<2x16xf32> to vector<2x16x1xf32>
    %423 = vector.broadcast %422 : vector<2x16x1xf32> to vector<2x16x16xf32>
    %424 = arith.subf %420, %423 : vector<2x16x16xf32>
    %425 = math.exp %424 : vector<2x16x16xf32>
    %cst_219 = arith.constant dense<0.000000e+00> : vector<2x16xf32>
    %426 = vector.multi_reduction <add>, %425, %cst_219 [2] : vector<2x16x16xf32> to vector<2x16xf32>
    %427 = vector.shape_cast %426 : vector<2x16xf32> to vector<2x16x1xf32>
    %428 = tpu.reciprocal %427 {approx = true} : vector<2x16x1xf32> -> vector<2x16x1xf32>
    %429 = vector.broadcast %428 : vector<2x16x1xf32> to vector<2x16x16xf32>
    %430 = arith.mulf %425, %429 : vector<2x16x16xf32>
    %431 = arith.truncf %430 : vector<2x16x16xf32> to vector<2x16x16xbf16>
    %432 = arith.truncf %412 : vector<2x16x16xf32> to vector<2x16x16xbf16>
    "tpu.trace_start"() <{level = 10 : i32, message = "bts,bsd->btd"}> : () -> ()
    %cst_220 = arith.constant dense<0.000000e+00> : vector<2x16x16xf32>
    %433 = tpu.matmul %431, %432, %cst_220 {dimension_numbers = #tpu.dot_dimension_numbers<[2], [1], [1], [2], [0, 0, 0, 1, 1, 2], [0], [0]>} : vector<2x16x16xbf16>, vector<2x16x16xbf16>, vector<2x16x16xf32> -> vector<2x16x16xf32>
    "tpu.trace_stop"() : () -> ()
    %434 = vector.shape_cast %433 : vector<2x16x16xf32> to vector<32x16xf32>
    %435 = arith.truncf %434 : vector<32x16xf32> to vector<32x16xbf16>
    %c5_221 = arith.constant 5 : index
    %c0_222 = arith.constant 0 : index
    %c0_223 = arith.constant 0 : index
    %436 = vector.load %arg5[%c5_221, %c0_222, %c0_223] : memref<8x16x64xbf16, #tpu.memory_space<vmem>>, vector<1x16x64xbf16>
    %437 = vector.shape_cast %436 : vector<1x16x64xbf16> to vector<16x64xbf16>
    %cst_224 = arith.constant dense<0.000000e+00> : vector<32x64xf32>
    %438 = tpu.matmul %435, %437, %cst_224 {dimension_numbers = #tpu.dot_dimension_numbers<[1], [0], [0], [1], [0, 0, 1, 1], [], []>} : vector<32x16xbf16>, vector<16x64xbf16>, vector<32x64xf32> -> vector<32x64xf32>
    %439 = arith.addf %388, %438 : vector<32x64xf32>
    %c14_225 = arith.constant 14 : index
    %c0_226 = arith.constant 0 : index
    %c0_227 = arith.constant 0 : index
    %440 = vector.load %arg4[%c14_225, %c0_226, %c0_227] : memref<24x64x16xbf16, #tpu.memory_space<vmem>>, vector<1x64x16xbf16>
    %441 = vector.shape_cast %440 : vector<1x64x16xbf16> to vector<64x16xbf16>
    %c18_228 = arith.constant 18 : index
    %c0_229 = arith.constant 0 : index
    %c0_230 = arith.constant 0 : index
    %442 = vector.load %arg4[%c18_228, %c0_229, %c0_230] : memref<24x64x16xbf16, #tpu.memory_space<vmem>>, vector<1x64x16xbf16>
    %443 = vector.shape_cast %442 : vector<1x64x16xbf16> to vector<64x16xbf16>
    %c22 = arith.constant 22 : index
    %c0_231 = arith.constant 0 : index
    %c0_232 = arith.constant 0 : index
    %444 = vector.load %arg4[%c22, %c0_231, %c0_232] : memref<24x64x16xbf16, #tpu.memory_space<vmem>>, vector<1x64x16xbf16>
    %445 = vector.shape_cast %444 : vector<1x64x16xbf16> to vector<64x16xbf16>
    %c1_233 = arith.constant 1 : index
    %c11_234 = arith.constant 11 : index
    %c0_235 = arith.constant 0 : index
    %446 = vector.load %arg9[%c1_233, %c11_234, %c0_235] : memref<2x24x256xf32, #tpu.memory_space<vmem>>, vector<1x1x16xf32>
    %447 = vector.shape_cast %446 : vector<1x1x16xf32> to vector<1x16xf32>
    %c1_236 = arith.constant 1 : index
    %c15_237 = arith.constant 15 : index
    %c0_238 = arith.constant 0 : index
    %448 = vector.load %arg9[%c1_236, %c15_237, %c0_238] : memref<2x24x256xf32, #tpu.memory_space<vmem>>, vector<1x1x16xf32>
    %449 = vector.shape_cast %448 : vector<1x1x16xf32> to vector<1x16xf32>
    %c1_239 = arith.constant 1 : index
    %c19_240 = arith.constant 19 : index
    %c0_241 = arith.constant 0 : index
    %450 = vector.load %arg9[%c1_239, %c19_240, %c0_241] : memref<2x24x256xf32, #tpu.memory_space<vmem>>, vector<1x1x16xf32>
    %451 = vector.shape_cast %450 : vector<1x1x16xf32> to vector<1x16xf32>
    %cst_242 = arith.constant dense<0.000000e+00> : vector<32x16xf32>
    %452 = tpu.matmul %336, %441, %cst_242 {dimension_numbers = #tpu.dot_dimension_numbers<[1], [0], [0], [1], [0, 0, 1, 1], [], []>} : vector<32x64xbf16>, vector<64x16xbf16>, vector<32x16xf32> -> vector<32x16xf32>
    %453 = vector.broadcast %447 : vector<1x16xf32> to vector<32x16xf32>
    %454 = arith.addf %452, %453 : vector<32x16xf32>
    %455 = vector.shape_cast %454 : vector<32x16xf32> to vector<2x16x16xf32>
    %cst_243 = arith.constant dense<0.000000e+00> : vector<32x16xf32>
    %456 = tpu.matmul %336, %443, %cst_243 {dimension_numbers = #tpu.dot_dimension_numbers<[1], [0], [0], [1], [0, 0, 1, 1], [], []>} : vector<32x64xbf16>, vector<64x16xbf16>, vector<32x16xf32> -> vector<32x16xf32>
    %457 = vector.broadcast %449 : vector<1x16xf32> to vector<32x16xf32>
    %458 = arith.addf %456, %457 : vector<32x16xf32>
    %459 = vector.shape_cast %458 : vector<32x16xf32> to vector<2x16x16xf32>
    %cst_244 = arith.constant dense<0.000000e+00> : vector<32x16xf32>
    %460 = tpu.matmul %336, %445, %cst_244 {dimension_numbers = #tpu.dot_dimension_numbers<[1], [0], [0], [1], [0, 0, 1, 1], [], []>} : vector<32x64xbf16>, vector<64x16xbf16>, vector<32x16xf32> -> vector<32x16xf32>
    %461 = vector.broadcast %451 : vector<1x16xf32> to vector<32x16xf32>
    %462 = arith.addf %460, %461 : vector<32x16xf32>
    %463 = vector.shape_cast %462 : vector<32x16xf32> to vector<2x16x16xf32>
    %464 = arith.truncf %455 : vector<2x16x16xf32> to vector<2x16x16xbf16>
    %465 = arith.truncf %459 : vector<2x16x16xf32> to vector<2x16x16xbf16>
    "tpu.trace_start"() <{level = 10 : i32, message = "btd,bsd->bts"}> : () -> ()
    %cst_245 = arith.constant dense<0.000000e+00> : vector<2x16x16xf32>
    %466 = tpu.matmul %464, %465, %cst_245 {dimension_numbers = #tpu.dot_dimension_numbers<[2], [2], [1], [1], [0, 0, 0, 1, 1, 1], [0], [0]>} : vector<2x16x16xbf16>, vector<2x16x16xbf16>, vector<2x16x16xf32> -> vector<2x16x16xf32>
    "tpu.trace_stop"() : () -> ()
    %cst_246 = arith.constant 2.500000e-01 : f32
    %467 = vector.broadcast %cst_246 : f32 to vector<2x16x16xf32>
    %468 = arith.mulf %466, %467 : vector<2x16x16xf32>
    %469 = vector.shape_cast %22 : vector<16x16xf32> to vector<1x16x16xf32>
    %470 = vector.broadcast %469 : vector<1x16x16xf32> to vector<2x16x16xf32>
    %471 = arith.addf %468, %470 : vector<2x16x16xf32>
    %cst_247 = arith.constant dense<0xFF800000> : vector<2x16xf32>
    %472 = vector.multi_reduction <maximumf>, %471, %cst_247 [2] : vector<2x16x16xf32> to vector<2x16xf32>
    %473 = vector.shape_cast %472 : vector<2x16xf32> to vector<2x16x1xf32>
    %474 = vector.broadcast %473 : vector<2x16x1xf32> to vector<2x16x16xf32>
    %475 = arith.subf %471, %474 : vector<2x16x16xf32>
    %476 = math.exp %475 : vector<2x16x16xf32>
    %cst_248 = arith.constant dense<0.000000e+00> : vector<2x16xf32>
    %477 = vector.multi_reduction <add>, %476, %cst_248 [2] : vector<2x16x16xf32> to vector<2x16xf32>
    %478 = vector.shape_cast %477 : vector<2x16xf32> to vector<2x16x1xf32>
    %479 = tpu.reciprocal %478 {approx = true} : vector<2x16x1xf32> -> vector<2x16x1xf32>
    %480 = vector.broadcast %479 : vector<2x16x1xf32> to vector<2x16x16xf32>
    %481 = arith.mulf %476, %480 : vector<2x16x16xf32>
    %482 = arith.truncf %481 : vector<2x16x16xf32> to vector<2x16x16xbf16>
    %483 = arith.truncf %463 : vector<2x16x16xf32> to vector<2x16x16xbf16>
    "tpu.trace_start"() <{level = 10 : i32, message = "bts,bsd->btd"}> : () -> ()
    %cst_249 = arith.constant dense<0.000000e+00> : vector<2x16x16xf32>
    %484 = tpu.matmul %482, %483, %cst_249 {dimension_numbers = #tpu.dot_dimension_numbers<[2], [1], [1], [2], [0, 0, 0, 1, 1, 2], [0], [0]>} : vector<2x16x16xbf16>, vector<2x16x16xbf16>, vector<2x16x16xf32> -> vector<2x16x16xf32>
    "tpu.trace_stop"() : () -> ()
    %485 = vector.shape_cast %484 : vector<2x16x16xf32> to vector<32x16xf32>
    %486 = arith.truncf %485 : vector<32x16xf32> to vector<32x16xbf16>
    %c6_250 = arith.constant 6 : index
    %c0_251 = arith.constant 0 : index
    %c0_252 = arith.constant 0 : index
    %487 = vector.load %arg5[%c6_250, %c0_251, %c0_252] : memref<8x16x64xbf16, #tpu.memory_space<vmem>>, vector<1x16x64xbf16>
    %488 = vector.shape_cast %487 : vector<1x16x64xbf16> to vector<16x64xbf16>
    %cst_253 = arith.constant dense<0.000000e+00> : vector<32x64xf32>
    %489 = tpu.matmul %486, %488, %cst_253 {dimension_numbers = #tpu.dot_dimension_numbers<[1], [0], [0], [1], [0, 0, 1, 1], [], []>} : vector<32x16xbf16>, vector<16x64xbf16>, vector<32x64xf32> -> vector<32x64xf32>
    %490 = arith.addf %439, %489 : vector<32x64xf32>
    %c15_254 = arith.constant 15 : index
    %c0_255 = arith.constant 0 : index
    %c0_256 = arith.constant 0 : index
    %491 = vector.load %arg4[%c15_254, %c0_255, %c0_256] : memref<24x64x16xbf16, #tpu.memory_space<vmem>>, vector<1x64x16xbf16>
    %492 = vector.shape_cast %491 : vector<1x64x16xbf16> to vector<64x16xbf16>
    %c19_257 = arith.constant 19 : index
    %c0_258 = arith.constant 0 : index
    %c0_259 = arith.constant 0 : index
    %493 = vector.load %arg4[%c19_257, %c0_258, %c0_259] : memref<24x64x16xbf16, #tpu.memory_space<vmem>>, vector<1x64x16xbf16>
    %494 = vector.shape_cast %493 : vector<1x64x16xbf16> to vector<64x16xbf16>
    %c23 = arith.constant 23 : index
    %c0_260 = arith.constant 0 : index
    %c0_261 = arith.constant 0 : index
    %495 = vector.load %arg4[%c23, %c0_260, %c0_261] : memref<24x64x16xbf16, #tpu.memory_space<vmem>>, vector<1x64x16xbf16>
    %496 = vector.shape_cast %495 : vector<1x64x16xbf16> to vector<64x16xbf16>
    %c1_262 = arith.constant 1 : index
    %c12_263 = arith.constant 12 : index
    %c0_264 = arith.constant 0 : index
    %497 = vector.load %arg9[%c1_262, %c12_263, %c0_264] : memref<2x24x256xf32, #tpu.memory_space<vmem>>, vector<1x1x16xf32>
    %498 = vector.shape_cast %497 : vector<1x1x16xf32> to vector<1x16xf32>
    %c1_265 = arith.constant 1 : index
    %c16_266 = arith.constant 16 : index
    %c0_267 = arith.constant 0 : index
    %499 = vector.load %arg9[%c1_265, %c16_266, %c0_267] : memref<2x24x256xf32, #tpu.memory_space<vmem>>, vector<1x1x16xf32>
    %500 = vector.shape_cast %499 : vector<1x1x16xf32> to vector<1x16xf32>
    %c1_268 = arith.constant 1 : index
    %c20_269 = arith.constant 20 : index
    %c0_270 = arith.constant 0 : index
    %501 = vector.load %arg9[%c1_268, %c20_269, %c0_270] : memref<2x24x256xf32, #tpu.memory_space<vmem>>, vector<1x1x16xf32>
    %502 = vector.shape_cast %501 : vector<1x1x16xf32> to vector<1x16xf32>
    %cst_271 = arith.constant dense<0.000000e+00> : vector<32x16xf32>
    %503 = tpu.matmul %336, %492, %cst_271 {dimension_numbers = #tpu.dot_dimension_numbers<[1], [0], [0], [1], [0, 0, 1, 1], [], []>} : vector<32x64xbf16>, vector<64x16xbf16>, vector<32x16xf32> -> vector<32x16xf32>
    %504 = vector.broadcast %498 : vector<1x16xf32> to vector<32x16xf32>
    %505 = arith.addf %503, %504 : vector<32x16xf32>
    %506 = vector.shape_cast %505 : vector<32x16xf32> to vector<2x16x16xf32>
    %cst_272 = arith.constant dense<0.000000e+00> : vector<32x16xf32>
    %507 = tpu.matmul %336, %494, %cst_272 {dimension_numbers = #tpu.dot_dimension_numbers<[1], [0], [0], [1], [0, 0, 1, 1], [], []>} : vector<32x64xbf16>, vector<64x16xbf16>, vector<32x16xf32> -> vector<32x16xf32>
    %508 = vector.broadcast %500 : vector<1x16xf32> to vector<32x16xf32>
    %509 = arith.addf %507, %508 : vector<32x16xf32>
    %510 = vector.shape_cast %509 : vector<32x16xf32> to vector<2x16x16xf32>
    %cst_273 = arith.constant dense<0.000000e+00> : vector<32x16xf32>
    %511 = tpu.matmul %336, %496, %cst_273 {dimension_numbers = #tpu.dot_dimension_numbers<[1], [0], [0], [1], [0, 0, 1, 1], [], []>} : vector<32x64xbf16>, vector<64x16xbf16>, vector<32x16xf32> -> vector<32x16xf32>
    %512 = vector.broadcast %502 : vector<1x16xf32> to vector<32x16xf32>
    %513 = arith.addf %511, %512 : vector<32x16xf32>
    %514 = vector.shape_cast %513 : vector<32x16xf32> to vector<2x16x16xf32>
    %515 = arith.truncf %506 : vector<2x16x16xf32> to vector<2x16x16xbf16>
    %516 = arith.truncf %510 : vector<2x16x16xf32> to vector<2x16x16xbf16>
    "tpu.trace_start"() <{level = 10 : i32, message = "btd,bsd->bts"}> : () -> ()
    %cst_274 = arith.constant dense<0.000000e+00> : vector<2x16x16xf32>
    %517 = tpu.matmul %515, %516, %cst_274 {dimension_numbers = #tpu.dot_dimension_numbers<[2], [2], [1], [1], [0, 0, 0, 1, 1, 1], [0], [0]>} : vector<2x16x16xbf16>, vector<2x16x16xbf16>, vector<2x16x16xf32> -> vector<2x16x16xf32>
    "tpu.trace_stop"() : () -> ()
    %cst_275 = arith.constant 2.500000e-01 : f32
    %518 = vector.broadcast %cst_275 : f32 to vector<2x16x16xf32>
    %519 = arith.mulf %517, %518 : vector<2x16x16xf32>
    %520 = vector.shape_cast %22 : vector<16x16xf32> to vector<1x16x16xf32>
    %521 = vector.broadcast %520 : vector<1x16x16xf32> to vector<2x16x16xf32>
    %522 = arith.addf %519, %521 : vector<2x16x16xf32>
    %cst_276 = arith.constant dense<0xFF800000> : vector<2x16xf32>
    %523 = vector.multi_reduction <maximumf>, %522, %cst_276 [2] : vector<2x16x16xf32> to vector<2x16xf32>
    %524 = vector.shape_cast %523 : vector<2x16xf32> to vector<2x16x1xf32>
    %525 = vector.broadcast %524 : vector<2x16x1xf32> to vector<2x16x16xf32>
    %526 = arith.subf %522, %525 : vector<2x16x16xf32>
    %527 = math.exp %526 : vector<2x16x16xf32>
    %cst_277 = arith.constant dense<0.000000e+00> : vector<2x16xf32>
    %528 = vector.multi_reduction <add>, %527, %cst_277 [2] : vector<2x16x16xf32> to vector<2x16xf32>
    %529 = vector.shape_cast %528 : vector<2x16xf32> to vector<2x16x1xf32>
    %530 = tpu.reciprocal %529 {approx = true} : vector<2x16x1xf32> -> vector<2x16x1xf32>
    %531 = vector.broadcast %530 : vector<2x16x1xf32> to vector<2x16x16xf32>
    %532 = arith.mulf %527, %531 : vector<2x16x16xf32>
    %533 = arith.truncf %532 : vector<2x16x16xf32> to vector<2x16x16xbf16>
    %534 = arith.truncf %514 : vector<2x16x16xf32> to vector<2x16x16xbf16>
    "tpu.trace_start"() <{level = 10 : i32, message = "bts,bsd->btd"}> : () -> ()
    %cst_278 = arith.constant dense<0.000000e+00> : vector<2x16x16xf32>
    %535 = tpu.matmul %533, %534, %cst_278 {dimension_numbers = #tpu.dot_dimension_numbers<[2], [1], [1], [2], [0, 0, 0, 1, 1, 2], [0], [0]>} : vector<2x16x16xbf16>, vector<2x16x16xbf16>, vector<2x16x16xf32> -> vector<2x16x16xf32>
    "tpu.trace_stop"() : () -> ()
    %536 = vector.shape_cast %535 : vector<2x16x16xf32> to vector<32x16xf32>
    %537 = arith.truncf %536 : vector<32x16xf32> to vector<32x16xbf16>
    %c7_279 = arith.constant 7 : index
    %c0_280 = arith.constant 0 : index
    %c0_281 = arith.constant 0 : index
    %538 = vector.load %arg5[%c7_279, %c0_280, %c0_281] : memref<8x16x64xbf16, #tpu.memory_space<vmem>>, vector<1x16x64xbf16>
    %539 = vector.shape_cast %538 : vector<1x16x64xbf16> to vector<16x64xbf16>
    %cst_282 = arith.constant dense<0.000000e+00> : vector<32x64xf32>
    %540 = tpu.matmul %537, %539, %cst_282 {dimension_numbers = #tpu.dot_dimension_numbers<[1], [0], [0], [1], [0, 0, 1, 1], [], []>} : vector<32x16xbf16>, vector<16x64xbf16>, vector<32x64xf32> -> vector<32x64xf32>
    %541 = arith.addf %490, %540 : vector<32x64xf32>
    %542 = arith.addf %311, %541 : vector<32x64xf32>
    %c1_283 = arith.constant 1 : index
    %c2_284 = arith.constant 2 : index
    %c0_285 = arith.constant 0 : index
    %543 = vector.load %arg9[%c1_283, %c2_284, %c0_285] : memref<2x24x256xf32, #tpu.memory_space<vmem>>, vector<1x1x64xf32>
    %544 = vector.shape_cast %543 : vector<1x1x64xf32> to vector<1x64xf32>
    %545 = vector.broadcast %544 : vector<1x64xf32> to vector<32x64xf32>
    %546 = arith.addf %542, %545 : vector<32x64xf32>
    %c1_286 = arith.constant 1 : index
    %c3_287 = arith.constant 3 : index
    %c0_288 = arith.constant 0 : index
    %547 = vector.load %arg9[%c1_286, %c3_287, %c0_288] : memref<2x24x256xf32, #tpu.memory_space<vmem>>, vector<1x1x64xf32>
    %548 = vector.shape_cast %547 : vector<1x1x64xf32> to vector<1x64xf32>
    %c1_289 = arith.constant 1 : index
    %c4_290 = arith.constant 4 : index
    %c0_291 = arith.constant 0 : index
    %549 = vector.load %arg9[%c1_289, %c4_290, %c0_291] : memref<2x24x256xf32, #tpu.memory_space<vmem>>, vector<1x1x64xf32>
    %550 = vector.shape_cast %549 : vector<1x1x64xf32> to vector<1x64xf32>
    %cst_292 = arith.constant dense<0.000000e+00> : vector<32xf32>
    %551 = vector.multi_reduction <add>, %546, %cst_292 [1] : vector<32x64xf32> to vector<32xf32>
    %552 = vector.shape_cast %551 : vector<32xf32> to vector<32x1xf32>
    %cst_293 = arith.constant 6.400000e+01 : f32
    %553 = vector.broadcast %cst_293 : f32 to vector<32x1xf32>
    %554 = arith.divf %552, %553 : vector<32x1xf32>
    %555 = vector.broadcast %554 : vector<32x1xf32> to vector<32x64xf32>
    %556 = arith.subf %546, %555 : vector<32x64xf32>
    %557 = arith.mulf %556, %556 : vector<32x64xf32>
    %cst_294 = arith.constant dense<0.000000e+00> : vector<32xf32>
    %558 = vector.multi_reduction <add>, %557, %cst_294 [1] : vector<32x64xf32> to vector<32xf32>
    %559 = vector.shape_cast %558 : vector<32xf32> to vector<32x1xf32>
    %cst_295 = arith.constant 6.400000e+01 : f32
    %560 = vector.broadcast %cst_295 : f32 to vector<32x1xf32>
    %561 = arith.divf %559, %560 : vector<32x1xf32>
    %cst_296 = arith.constant 9.99999974E-6 : f32
    %562 = vector.broadcast %cst_296 : f32 to vector<32x1xf32>
    %563 = arith.addf %561, %562 : vector<32x1xf32>
    %564 = math.rsqrt %563 : vector<32x1xf32>
    %565 = vector.broadcast %564 : vector<32x1xf32> to vector<32x64xf32>
    %566 = arith.mulf %556, %565 : vector<32x64xf32>
    %567 = vector.broadcast %548 : vector<1x64xf32> to vector<32x64xf32>
    %568 = arith.mulf %566, %567 : vector<32x64xf32>
    %569 = vector.broadcast %550 : vector<1x64xf32> to vector<32x64xf32>
    %570 = arith.addf %568, %569 : vector<32x64xf32>
    %571 = arith.truncf %570 : vector<32x64xf32> to vector<32x64xbf16>
    %c1_297 = arith.constant 1 : index
    %c0_298 = arith.constant 0 : index
    %c0_299 = arith.constant 0 : index
    %572 = vector.load %arg6[%c1_297, %c0_298, %c0_299] : memref<2x64x256xbf16, #tpu.memory_space<vmem>>, vector<1x64x256xbf16>
    %573 = vector.shape_cast %572 : vector<1x64x256xbf16> to vector<64x256xbf16>
    %cst_300 = arith.constant dense<0.000000e+00> : vector<32x256xf32>
    %574 = tpu.matmul %571, %573, %cst_300 {dimension_numbers = #tpu.dot_dimension_numbers<[1], [0], [0], [1], [0, 0, 1, 1], [], []>} : vector<32x64xbf16>, vector<64x256xbf16>, vector<32x256xf32> -> vector<32x256xf32>
    %c1_301 = arith.constant 1 : index
    %c5_302 = arith.constant 5 : index
    %c0_303 = arith.constant 0 : index
    %575 = vector.load %arg9[%c1_301, %c5_302, %c0_303] : memref<2x24x256xf32, #tpu.memory_space<vmem>>, vector<1x1x256xf32>
    %576 = vector.shape_cast %575 : vector<1x1x256xf32> to vector<1x256xf32>
    %577 = vector.broadcast %576 : vector<1x256xf32> to vector<32x256xf32>
    %578 = arith.addf %574, %577 : vector<32x256xf32>
    %cst_304 = arith.constant 5.000000e-01 : f32
    %579 = vector.broadcast %cst_304 : f32 to vector<32x256xf32>
    %580 = arith.mulf %579, %578 : vector<32x256xf32>
    %cst_305 = arith.constant 4.471500e-02 : f32
    %581 = vector.broadcast %cst_305 : f32 to vector<32x256xf32>
    %582 = arith.mulf %581, %578 : vector<32x256xf32>
    %583 = arith.mulf %582, %578 : vector<32x256xf32>
    %584 = arith.mulf %583, %578 : vector<32x256xf32>
    %585 = arith.addf %578, %584 : vector<32x256xf32>
    %cst_306 = arith.constant 0.797884583 : f32
    %586 = vector.broadcast %cst_306 : f32 to vector<32x256xf32>
    %587 = arith.mulf %586, %585 : vector<32x256xf32>
    %588 = math.tanh %587 : vector<32x256xf32>
    %cst_307 = arith.constant 1.000000e+00 : f32
    %589 = vector.broadcast %cst_307 : f32 to vector<32x256xf32>
    %590 = arith.addf %589, %588 : vector<32x256xf32>
    %591 = arith.mulf %580, %590 : vector<32x256xf32>
    %592 = arith.truncf %591 : vector<32x256xf32> to vector<32x256xbf16>
    %c1_308 = arith.constant 1 : index
    %c0_309 = arith.constant 0 : index
    %c0_310 = arith.constant 0 : index
    %593 = vector.load %arg7[%c1_308, %c0_309, %c0_310] : memref<2x256x64xbf16, #tpu.memory_space<vmem>>, vector<1x256x64xbf16>
    %594 = vector.shape_cast %593 : vector<1x256x64xbf16> to vector<256x64xbf16>
    %cst_311 = arith.constant dense<0.000000e+00> : vector<32x64xf32>
    %595 = tpu.matmul %592, %594, %cst_311 {dimension_numbers = #tpu.dot_dimension_numbers<[1], [0], [0], [1], [0, 0, 1, 1], [], []>} : vector<32x256xbf16>, vector<256x64xbf16>, vector<32x64xf32> -> vector<32x64xf32>
    %596 = arith.addf %546, %595 : vector<32x64xf32>
    %c1_312 = arith.constant 1 : index
    %c6_313 = arith.constant 6 : index
    %c0_314 = arith.constant 0 : index
    %597 = vector.load %arg9[%c1_312, %c6_313, %c0_314] : memref<2x24x256xf32, #tpu.memory_space<vmem>>, vector<1x1x64xf32>
    %598 = vector.shape_cast %597 : vector<1x1x64xf32> to vector<1x64xf32>
    %599 = vector.broadcast %598 : vector<1x64xf32> to vector<32x64xf32>
    %600 = arith.addf %596, %599 : vector<32x64xf32>
    %c0_315 = arith.constant 0 : index
    %c7_316 = arith.constant 7 : index
    %c0_317 = arith.constant 0 : index
    %601 = vector.load %arg9[%c0_315, %c7_316, %c0_317] : memref<2x24x256xf32, #tpu.memory_space<vmem>>, vector<1x1x64xf32>
    %602 = vector.shape_cast %601 : vector<1x1x64xf32> to vector<1x64xf32>
    %c0_318 = arith.constant 0 : index
    %c8_319 = arith.constant 8 : index
    %c0_320 = arith.constant 0 : index
    %603 = vector.load %arg9[%c0_318, %c8_319, %c0_320] : memref<2x24x256xf32, #tpu.memory_space<vmem>>, vector<1x1x64xf32>
    %604 = vector.shape_cast %603 : vector<1x1x64xf32> to vector<1x64xf32>
    %cst_321 = arith.constant dense<0.000000e+00> : vector<32xf32>
    %605 = vector.multi_reduction <add>, %600, %cst_321 [1] : vector<32x64xf32> to vector<32xf32>
    %606 = vector.shape_cast %605 : vector<32xf32> to vector<32x1xf32>
    %cst_322 = arith.constant 6.400000e+01 : f32
    %607 = vector.broadcast %cst_322 : f32 to vector<32x1xf32>
    %608 = arith.divf %606, %607 : vector<32x1xf32>
    %609 = vector.broadcast %608 : vector<32x1xf32> to vector<32x64xf32>
    %610 = arith.subf %600, %609 : vector<32x64xf32>
    %611 = arith.mulf %610, %610 : vector<32x64xf32>
    %cst_323 = arith.constant dense<0.000000e+00> : vector<32xf32>
    %612 = vector.multi_reduction <add>, %611, %cst_323 [1] : vector<32x64xf32> to vector<32xf32>
    %613 = vector.shape_cast %612 : vector<32xf32> to vector<32x1xf32>
    %cst_324 = arith.constant 6.400000e+01 : f32
    %614 = vector.broadcast %cst_324 : f32 to vector<32x1xf32>
    %615 = arith.divf %613, %614 : vector<32x1xf32>
    %cst_325 = arith.constant 9.99999974E-6 : f32
    %616 = vector.broadcast %cst_325 : f32 to vector<32x1xf32>
    %617 = arith.addf %615, %616 : vector<32x1xf32>
    %618 = math.rsqrt %617 : vector<32x1xf32>
    %619 = vector.broadcast %618 : vector<32x1xf32> to vector<32x64xf32>
    %620 = arith.mulf %610, %619 : vector<32x64xf32>
    %621 = vector.broadcast %602 : vector<1x64xf32> to vector<32x64xf32>
    %622 = arith.mulf %620, %621 : vector<32x64xf32>
    %623 = vector.broadcast %604 : vector<1x64xf32> to vector<32x64xf32>
    %624 = arith.addf %622, %623 : vector<32x64xf32>
    %625 = arith.truncf %624 : vector<32x64xf32> to vector<32x64xbf16>
    %c0_326 = arith.constant 0 : index
    %c0_327 = arith.constant 0 : index
    %626 = vector.load %arg8[%c0_326, %c0_327] : memref<64x128xbf16, #tpu.memory_space<vmem>>, vector<64x128xbf16>
    %cst_328 = arith.constant dense<0.000000e+00> : vector<32x128xf32>
    %627 = tpu.matmul %625, %626, %cst_328 {dimension_numbers = #tpu.dot_dimension_numbers<[1], [0], [0], [1], [0, 0, 1, 1], [], []>} : vector<32x64xbf16>, vector<64x128xbf16>, vector<32x128xf32> -> vector<32x128xf32>
    %628 = vector.shape_cast %627 : vector<32x128xf32> to vector<2x16x128xf32>
    %c0_329 = arith.constant 0 : index
    %c0_330 = arith.constant 0 : index
    %c0_331 = arith.constant 0 : index
    %629 = vector.load %arg10[%c0_329, %c0_330, %c0_331] : memref<2x16x128xf32, #tpu.memory_space<vmem>>, vector<2x16x128xf32>
    tpu.vector_store %arg10[%c0_329, %c0_330, %c0_331], %628 {strides = array<i32>} : memref<2x16x128xf32, #tpu.memory_space<vmem>>, vector<2x16x128xf32>,
    return
  }
  func.func @transform_0(%arg0: i32) -> (i32, i32, i32) {
    %c0_i32 = arith.constant 0 : i32
    %c0_i32_0 = arith.constant 0 : i32
    %c0_i32_1 = arith.constant 0 : i32
    return %arg0, %c0_i32, %c0_i32_0 : i32, i32, i32
  }
  func.func @transform_1(%arg0: i32) -> (i32, i32) {
    %c0_i32 = arith.constant 0 : i32
    %c0_i32_0 = arith.constant 0 : i32
    %c0_i32_1 = arith.constant 0 : i32
    return %c0_i32, %c0_i32_0 : i32, i32
  }
  func.func @transform_2(%arg0: i32) -> (i32, i32) {
    %c0_i32 = arith.constant 0 : i32
    %c0_i32_0 = arith.constant 0 : i32
    %c0_i32_1 = arith.constant 0 : i32
    return %c0_i32, %c0_i32_0 : i32, i32
  }
  func.func @transform_3(%arg0: i32) -> (i32, i32, i32) {
    %c0_i32 = arith.constant 0 : i32
    %c0_i32_0 = arith.constant 0 : i32
    %c0_i32_1 = arith.constant 0 : i32
    %c0_i32_2 = arith.constant 0 : i32
    return %c0_i32, %c0_i32_0, %c0_i32_1 : i32, i32, i32
  }
  func.func @transform_4(%arg0: i32) -> (i32, i32, i32) {
    %c0_i32 = arith.constant 0 : i32
    %c0_i32_0 = arith.constant 0 : i32
    %c0_i32_1 = arith.constant 0 : i32
    %c0_i32_2 = arith.constant 0 : i32
    return %c0_i32, %c0_i32_0, %c0_i32_1 : i32, i32, i32
  }
  func.func @transform_5(%arg0: i32) -> (i32, i32, i32) {
    %c0_i32 = arith.constant 0 : i32
    %c0_i32_0 = arith.constant 0 : i32
    %c0_i32_1 = arith.constant 0 : i32
    %c0_i32_2 = arith.constant 0 : i32
    return %c0_i32, %c0_i32_0, %c0_i32_1 : i32, i32, i32
  }
  func.func @transform_6(%arg0: i32) -> (i32, i32, i32) {
    %c0_i32 = arith.constant 0 : i32
    %c0_i32_0 = arith.constant 0 : i32
    %c0_i32_1 = arith.constant 0 : i32
    %c0_i32_2 = arith.constant 0 : i32
    return %c0_i32, %c0_i32_0, %c0_i32_1 : i32, i32, i32
  }
  func.func @transform_7(%arg0: i32) -> (i32, i32) {
    %c0_i32 = arith.constant 0 : i32
    %c0_i32_0 = arith.constant 0 : i32
    %c0_i32_1 = arith.constant 0 : i32
    return %c0_i32, %c0_i32_0 : i32, i32
  }
  func.func @transform_8(%arg0: i32) -> (i32, i32, i32) {
    %c0_i32 = arith.constant 0 : i32
    %c0_i32_0 = arith.constant 0 : i32
    %c0_i32_1 = arith.constant 0 : i32
    %c0_i32_2 = arith.constant 0 : i32
    return %c0_i32, %c0_i32_0, %c0_i32_1 : i32, i32, i32
  }
  func.func @transform_9(%arg0: i32) -> (i32, i32, i32) {
    %c0_i32 = arith.constant 0 : i32
    %c0_i32_0 = arith.constant 0 : i32
    %c0_i32_1 = arith.constant 0 : i32
    return %arg0, %c0_i32, %c0_i32_0 : i32, i32, i32
  }
}

</mosaic_0001>

<bundles_post_ra>
// kernel: vqvae_transformer_forward.1
= control target key start
LH: loop header
LB: loop body
LE: loop exit
PB: predicated region body
PF: predicated region fallthrough
CT: control target
= control target key end

     0   :  { %v7708_v2 = vmov 0   ;;  %s9068_s0 = inlined_call_operand.vmem [shape: s32[2,16,1], index: 0, kind: input, shape index: {}]   ;;  %s9069_s1 = inlined_call_operand.vmem [shape: bf16[128,64], index: 1, kind: input, shape index: {}]   ;;  %s9070_s2 = inlined_call_operand.vmem [shape: f32[16,64], index: 2, kind: input, shape index: {}]   ;;  %s9071_s3 = inlined_call_operand.vmem [shape: bf16[24,64,16], index: 3, kind: input, shape index: {}]   ;;  %s9072_s4 = inlined_call_operand.vmem [shape: bf16[8,16,64], index: 4, kind: input, shape index: {}]   ;;  %s9073_s5 = inlined_call_operand.vmem [shape: bf16[2,64,256], index: 5, kind: input, shape index: {}]   ;;  %s9074_s6 = inlined_call_operand.vmem [shape: bf16[2,256,64], index: 6, kind: input, shape index: {}]   ;;  %s9075_s7 = inlined_call_operand.vmem [shape: bf16[64,128], index: 7, kind: input, shape index: {}]   ;;  %s9076_s8 = inlined_call_operand.vmem [shape: f32[2,24,256], index: 8, kind: input, shape index: {}]   ;;  %s9077_s9 = inlined_call_operand.hbm [shape: f32[2,16,128], index: 9, kind: output, shape index: {}]  }
   0x1   :  { %v36_v0 = vld [vmem:[%s9068_s0 + $0x10] sm:$0xff]  ;;  %v34_v1 = vld [vmem:[%s9068_s0] sm:$0xff]  ;;  %7311 = vset.pattern.permute.xlu1 %v7708_v2  ;;  %7310 = vset.pattern.permute.xlu0 %v7708_v2  ;;  %v37_v3 = vld [vmem:[%s9068_s0 + $0x18] sm:$0xff] }
   0x2   :  { %v35_v4 = vld [vmem:[%s9068_s0 + $0x8] sm:$0xff]  ;;  %47 = vperm.xlu1 %7311, %v36_v0   ;;  %41 = vperm.xlu0 %7310, %v34_v1   ;;  %v7312_v5 = vld [vmem:[%s9069_s1] sm:$0xff]   ;;  %v7314_v7 = vld [vmem:[%s9069_s1 + $0x10] sm:$0xff]  }
   0x3   :  { %v7313_v6 = vld [vmem:[%s9069_s1 + $0x8] sm:$0xff]   ;;  %6718 = vmatprep.subr.bf16.mxu0 %v7312_v5  ;;  %v7315_v8 = vld [vmem:[%s9069_s1 + $0x18] sm:$0xff]   ;;  %v7316_v9 = vld [vmem:[%s9069_s1 + $0x20] sm:$0xff]  }
   0x4   :  { %6719 = vmatpush3.bf16.msra.mxu0 %v7312_v5  ;;  %v7317_v10 = vld [vmem:[%s9069_s1 + $0x28] sm:$0xff]   ;;  %v7318_v11 = vld [vmem:[%s9069_s1 + $0x30] sm:$0xff]   ;;  %v7319_v12 = vld [vmem:[%s9069_s1 + $0x38] sm:$0xff]  }
   0x5   :  { %6720 = vmatprep.subr.bf16.mxu0 %v7313_v6 }
   0x6   :  { %50 = vperm.xlu1 %7311, %v37_v3   ;;  %44 = vperm.xlu0 %7310, %v35_v4  }
   0x8   :  { %6721 = vmatpush3.bf16.msra.mxu0 %v7313_v6 }
   0x9   :  { %6722 = vmatprep.subr.bf16.mxu0 %v7314_v7 }
   0xc   :  { %6723 = vmatpush3.bf16.msra.mxu0 %v7314_v7 }
   0xd   :  { %6724 = vmatprep.subr.bf16.mxu0 %v7315_v8 }
  0x10   :  { %6725 = vmatpush3.bf16.msra.mxu0 %v7315_v8 }
  0x11   :  { %6726 = vmatprep.subr.bf16.mxu0 %v7316_v9 }
  0x14   :  { %6727 = vmatpush3.bf16.msra.mxu0 %v7316_v9 }
  0x15   :  { %6728 = vmatprep.subr.bf16.mxu0 %v7317_v10 }
  0x18   :  { %6729 = vmatpush3.bf16.msra.mxu0 %v7317_v10 }
  0x19   :  { %6730 = vmatprep.subr.bf16.mxu0 %v7318_v11 }
  0x1c   :  { %6731 = vmatpush3.bf16.msra.mxu0 %v7318_v11 }
  0x1d   :  { %6732 = vmatprep.subr.bf16.mxu0 %v7319_v12 }
  0x20   :  { %6733 = vmatpush3.bf16.msra.mxu0 %v7319_v12 }
  0x21   :  { %14 = vsyncpa [#allocation3], 0  ;;  %v38_v13 = vlaneseq  ;;  %v7709_v19 = vmov 1.0|1.0   ;;  %v175_v20 = vld [vmem:[%s9070_s2] sm:$0xff]  ;;  %v176_v23 = vld [vmem:[%s9070_s2 + $0x8] sm:$0xff] }
  0x22   :  { %vm190_vm6 = vcmask 523264   ;;  %v7320_v54 = vld [vmem:[%s9071_s3] sm:$0xff]   ;;  %v7321_v55 = vld [vmem:[%s9071_s3 + $0x8] sm:$0xff]   ;;  %v7322_v56 = vld [vmem:[%s9071_s3 + $0x10] sm:$0xff]   ;;  %vm7711_vm7 = vmmov 0   ;;  %vm512_vm8 = vcmask 130048  }
  0x23   :  { %v7805_v16 = vand.u32 127, %v38_v13  ;;  %6738 = vmatprep.subr.bf16.mxu1 %v7320_v54  ;;  %v7323_v57 = vld [vmem:[%s9071_s3 + $0x18] sm:$0xff]   ;;  %v7324_v58 = vld [vmem:[%s9071_s3 + $0x80] sm:$0xff]   ;;  %s7713_s12 = smov [#allocation2]  }
  0x24   :  { %6739 = vmatpush3.bf16.msra.mxu1 %v7320_v54  ;;  %v188_v9 = vld [vmem:[%s9076_s8] ss:$0 sm:$0xff]  ;;  %v281_v54 = vld [vmem:[%s9076_s8 + $0x15] ss:$0 sm:$0xff]  ;;  %s5874_s13 = sshll.u32 %s7713_s12, 4  ;;  %s5875_s13 = int_to_ptr.vmem [resolvable:$true] %s5874_s13 }
  0x25   :  { %6740 = vmatprep.subr.bf16.mxu1 %v7321_v55  ;;  %p7689_p1 = scmp.lt.s32.totalorder %s5875_s13, %s5875_s13 }
  0x28   :  { %6741 = vmatpush3.bf16.msra.mxu1 %v7321_v55 }
  0x29   :  { %6742 = vmatprep.subr.bf16.mxu1 %v7322_v56 }
  0x2c   :  { %6743 = vmatpush3.bf16.msra.mxu1 %v7322_v56 }
  0x2d   :  { %6744 = vmatprep.subr.bf16.mxu1 %v7323_v57 }
  0x30   :  { %6745 = vmatpush3.bf16.msra.mxu1 %v7323_v57 }
  0x31   :  { %6750 = vmatprep.subr.bf16.mxu1 %v7324_v58 }
  0x81   :  { %v48_v14 = vpop.permute.xlu1 %47  ;;  %v42_v15 = vpop.permute.xlu0 %41 }
  0x82   :  { %vm54_vm0 = vcmp.eq.s32.totalorder %v7805_v16, %v48_v14  ;;  %vm52_vm4 = vcmp.eq.s32.totalorder %v7805_v16, %v42_v15 }
  0x85   :  { %v51_v17 = vpop.permute.xlu1 %50  ;;  %v45_v18 = vpop.permute.xlu0 %44 }
  0x86   :  { %vm55_vm1 = vcmp.eq.s32.totalorder %v7805_v16, %v51_v17  ;;  %vm53_vm2 = vcmp.eq.s32.totalorder %v7805_v16, %v45_v18  ;;  %v189_v17 = vld [vmem:[%s9076_s8 + $0x1] ss:$0 sm:$0xff] }
  0x87   :  { %vm5896_vm3 = vmpackc.low %vm55_vm1, %vm54_vm0 }
  0x88   :  { %vm5894_vm5 = vmpackc.low %vm53_vm2, %vm52_vm4 }
  0x89   :  { %6734 = vmatprep.mubr.msk.bf16.mxu0 %vm5894_vm5, %v7709_v19 }
  0x8a   :  { %6735 = vmatmul.mubr.msk.bf16.vlgmr.msra.gmra.mrb[0].mxu0 %vm5896_vm3, %v7709_v19 }
 0x15d   :  { %v6736_v21 = vpop.f32.mrb[0].mxu0 }
 0x15e   :  { %v160_v22 = vpop.f32.mrb[1].mxu0  ;;  %v7819_v27 = vadd.f32 %v6736_v21, %v175_v20 }
 0x15f   :  { %v7817_v24 = vadd.f32 %v175_v20, %v160_v22  ;;  %v6737_v25 = vpop.f32.mrb[2].mxu0 }
 0x160   :  { %v163_v26 = vpop.f32.mrb[3].mxu0  ;;  %v7827_v31 = vadd.f32 %v6737_v25, %v176_v23  ;;  %v197_v32 = vsel %vm190_vm6, %v7819_v27, 0.0 }
 0x161   :  { %v7821_v28 = vadd.f32 %v176_v23, %v163_v26  ;;  %v191_v29 = vsel %vm190_vm6, %v7817_v24, 0.0 }
 0x162   :  { %192 = vadd.xlane.f32.xlu0 %v191_v29  ;;  %v200_v33 = vsel %vm190_vm6, %v7827_v31, 0.0 }
 0x163   :  { %v194_v30 = vsel %vm190_vm6, %v7821_v28, 0.0 }
 0x164   :  { %195 = vadd.xlane.f32.xlu1 %v194_v30 }
 0x166   :  { %198 = vadd.xlane.f32.xlu0 %v197_v32 }
 0x16a   :  { %201 = vadd.xlane.f32.xlu0 %v200_v33 }
 0x1ef   :  { %v193_v34 = vpop.xlane.xlu0 %192 }
 0x1f0   :  { %v204_v35 = vmul.f32 0.015625, %v193_v34  ;;  %v7325_v34 = vld [vmem:[%s9071_s3 + $0x88] sm:$0xff]  }
 0x1f1   :  { %v196_v36 = vpop.xlane.xlu1 %195 }
 0x1f2   :  { %v208_v37 = vsub.f32 %v7817_v24, %v204_v35  ;;  %v205_v38 = vmul.f32 0.015625, %v196_v36  ;;  %v7326_v35 = vld [vmem:[%s9071_s3 + $0x90] sm:$0xff]   ;;  %v7327_v36 = vld [vmem:[%s9071_s3 + $0x98] sm:$0xff]  }
 0x1f3   :  { %v199_v39 = vpop.xlane.xlu0 %198 }
 0x1f4   :  { %v209_v40 = vsub.f32 %v7821_v28, %v205_v38  ;;  %v206_v41 = vmul.f32 0.015625, %v199_v39  ;;  %v212_v42 = vmul.f32 %v208_v37, %v208_v37  ;;  %v7329_v38 = vld [vmem:[%s9071_s3 + $0x108] sm:$0xff]   ;;  %v7330_v39 = vld [vmem:[%s9071_s3 + $0x110] sm:$0xff]  }
 0x1f6   :  { %v210_v43 = vsub.f32 %v7819_v27, %v206_v41  ;;  %v216_v44 = vsel %vm190_vm6, %v212_v42, 0.0  ;;  %v213_v45 = vmul.f32 %v209_v40, %v209_v40  ;;  %v7710_v41 = vmov 0.0  }
 0x1f7   :  { %v202_v46 = vpop.xlane.xlu0 %201  ;;  %217 = vadd.xlane.f32.xlu1 %v216_v44  ;;  %6786 = vmatprep.subr.bf16.mxu0 %v7710_v41 }
 0x1f8   :  { %v207_v47 = vmul.f32 0.015625, %v202_v46  ;;  %v219_v48 = vsel %vm190_vm6, %v213_v45, 0.0  ;;  %v214_v49 = vmul.f32 %v210_v43, %v210_v43  ;;  %6788 = vmatprep.mubr.msk.bf16.mxu0 %vm7711_vm7, %v7710_v41 }
 0x1f9   :  { %220 = vadd.xlane.f32.xlu0 %v219_v48 }
 0x1fa   :  { %v211_v50 = vsub.f32 %v7827_v31, %v207_v47  ;;  %v222_v51 = vsel %vm190_vm6, %v214_v49, 0.0 }
 0x1fb   :  { %223 = vadd.xlane.f32.xlu1 %v222_v51 }
 0x1fc   :  { %v215_v52 = vmul.f32 %v211_v50, %v211_v50 }
 0x1fe   :  { %v225_v53 = vsel %vm190_vm6, %v215_v52, 0.0 }
 0x1ff   :  { %226 = vadd.xlane.f32.xlu0 %v225_v53 }
 0x284   :  { %v218_v59 = vpop.xlane.xlu1 %217 }
 0x285   :  { %v228_v60 = vmul.f32 0.015625, %v218_v59 }
 0x286   :  { %v221_v61 = vpop.xlane.xlu0 %220 }
 0x287   :  { %v232_v62 = vadd.f32 1e-05, %v228_v60  ;;  %v229_v63 = vmul.f32 0.015625, %v221_v61 }
 0x288   :  { %v224_v0 = vpop.xlane.xlu1 %223 }
 0x289   :  { %7484 = vrsqrt.f32 %v232_v62  ;;  %v233_v1 = vadd.f32 1e-05, %v229_v63  ;;  %v230_v3 = vmul.f32 0.015625, %v224_v0 }
 0x28b   :  { %7486 = vrsqrt.f32 %v233_v1  ;;  %v234_v4 = vadd.f32 1e-05, %v230_v3  ;;  %v282_v3 = vld [vmem:[%s9076_s8 + $0x21] ss:$0 sm:$0xff] }
 0x28c   :  { %v227_v5 = vpop.xlane.xlu0 %226 }
 0x28d   :  { %7488 = vrsqrt.f32 %v234_v4  ;;  %v231_v6 = vmul.f32 0.015625, %v227_v5 }
 0x28f   :  { %v235_v7 = vadd.f32 1e-05, %v231_v6 }
 0x291   :  { %7490 = vrsqrt.f32 %v235_v7 }
 0x293   :  { %v7485_v8 = vpop.eup %7484 }
 0x294   :  { %v240_v10 = vmul.f32 %v7485_v8, %v208_v37  ;;  %v7328_v37 = vld [vmem:[%s9071_s3 + $0x100] sm:$0xff]  }
 0x295   :  { %v7487_v11 = vpop.eup %7486 }
 0x296   :  { %v244_v12 = vmul.f32 %v240_v10, %v188_v9  ;;  %v241_v14 = vmul.f32 %v7487_v11, %v209_v40  ;;  %v7331_v40 = vld [vmem:[%s9071_s3 + $0x118] sm:$0xff]  }
 0x297   :  { %v7489_v15 = vpop.eup %7488 }
 0x298   :  { %v245_v18 = vmul.f32 %v241_v14, %v188_v9  ;;  %v242_v19 = vmul.f32 %v7489_v15, %v210_v43  ;;  %v248_v20 = vadd.f32 %v244_v12, %v189_v17  ;;  %v280_v43 = vld [vmem:[%s9076_s8 + $0x11] ss:$0 sm:$0xff] }
 0x29a   :  { %v249_v21 = vadd.f32 %v245_v18, %v189_v17  ;;  %v246_v25 = vmul.f32 %v242_v19, %v188_v9 }
 0x29b   :  { %v7491_v22 = vpop.eup %7490 }
 0x29c   :  { %v7862_v23 = vpack.c.bf16 %v249_v21, %v248_v20  ;;  %v243_v26 = vmul.f32 %v7491_v22, %v211_v50  ;;  %v250_v30 = vadd.f32 %v246_v25, %v189_v17 }
 0x29e   :  { %v247_v29 = vmul.f32 %v243_v26, %v188_v9  ;;  %6746 = vmatprep.mubr.msk.bf16.mxu1 %vm190_vm6, %v7862_v23 }
 0x2a0   :  { %v251_v32 = vadd.f32 %v247_v29, %v189_v17  ;;  %v7925_v17 = vshrl.u32 %v38_v13, 7 }
 0x2a2   :  { %v7866_v33 = vpack.c.bf16 %v251_v32, %v250_v30  ;;  %v183_v21 = vadd.s32 8, %v7925_v17  ;;  %vm184_vm9 = vcmp.le.s32.totalorder %v7805_v16, %v7925_v17  ;;  %v7712_v30 = vmov -1e+30  }
 0x2a3   :  { %v7931_v32 = vsel %vm184_vm9, 0.0, %v7712_v30 }
 0x2a4   :  { %6747 = vmatmul.mubr.msk.bf16.vlgmr.msra.gmra.mrb[0].mxu1 %vm190_vm6, %v7866_v33  ;;  %vm185_vm10 = vcmp.le.s32.totalorder %v7805_v16, %v183_v21 }
 0x2a5   :  { %6751 = vmatpush3.bf16.msra.mxu1 %v7324_v58  ;;  %6758 = vmatprep.mubr.msk.bf16.mxu1 %vm190_vm6, %v7862_v23 }
 0x2a6   :  { %6752 = vmatprep.subr.bf16.mxu1 %v7325_v34 }
 0x2a9   :  { %6753 = vmatpush3.bf16.msra.mxu1 %v7325_v34 }
 0x2aa   :  { %6754 = vmatprep.subr.bf16.mxu1 %v7326_v35 }
 0x2ad   :  { %6755 = vmatpush3.bf16.msra.mxu1 %v7326_v35 }
 0x2ae   :  { %6756 = vmatprep.subr.bf16.mxu1 %v7327_v36 }
 0x2b1   :  { %6757 = vmatpush3.bf16.msra.mxu1 %v7327_v36 }
 0x2b2   :  { %6762 = vmatprep.subr.bf16.mxu1 %v7328_v37 }
 0x2b4   :  { %6759 = vmatmul.mubr.msk.bf16.vlgmr.msra.gmra.mrb[4].mxu1 %vm190_vm6, %v7866_v33 }
 0x2b5   :  { %6763 = vmatpush3.bf16.msra.mxu1 %v7328_v37  ;;  %6770 = vmatprep.mubr.msk.bf16.mxu1 %vm190_vm6, %v7862_v23 }
 0x2b6   :  { %6764 = vmatprep.subr.bf16.mxu1 %v7329_v38 }
 0x2b9   :  { %6765 = vmatpush3.bf16.msra.mxu1 %v7329_v38  ;;  %v7934_v38 = vsel %vm185_vm10, 0.0, %v7712_v30  ;;  %v7338_v30 = vld [vmem:[%s9071_s3 + $0xb8] sm:$0xff]  }
 0x2ba   :  { %6766 = vmatprep.subr.bf16.mxu1 %v7330_v39 }
 0x2bd   :  { %6767 = vmatpush3.bf16.msra.mxu1 %v7330_v39 }
 0x2be   :  { %6768 = vmatprep.subr.bf16.mxu1 %v7331_v40 }
 0x2c1   :  { %6769 = vmatpush3.bf16.msra.mxu1 %v7331_v40 }
 0x2c2   :  { %6774 = vmatprep.subr.bf16.mxu1 %v7710_v41 }
 0x2c4   :  { %6771 = vmatmul.mubr.msk.bf16.vlgmr.msra.gmra.mrb[8].mxu1 %vm190_vm6, %v7866_v33 }
 0x2c5   :  { %6776 = vmatprep.mubr.msk.bf16.mxu1 %vm7711_vm7, %v7710_v41 }
 0x377   :  { %v6748_v42 = vpop.f32.mrb[0].mxu1 }
 0x378   :  { %v347_v44 = vpop.f32.mrb[1].mxu1  ;;  %v356_v46 = vadd.f32 %v6748_v42, %v280_v43 }
 0x379   :  { %v6749_v45 = vpop.f32.mrb[2].mxu1  ;;  %v348_v49 = vadd.f32 %v347_v44, %v280_v43 }
 0x37a   :  { %v359_v47 = vadd.f32 %v6749_v45, %v280_v43  ;;  %v350_v48 = vpop.f32.mrb[3].mxu1 }
 0x37b   :  { %v351_v50 = vadd.f32 %v350_v48, %v280_v43 }
 0x37c   :  { %v509_v51 = vpack.c.bf16 %v359_v47, %v356_v46 }
 0x37d   :  { %v508_v52 = vpack.c.bf16 %v351_v50, %v348_v49 }
 0x387   :  { %v6760_v53 = vpop.f32.mrb[4].mxu1 }
 0x388   :  { %v420_v55 = vpop.f32.mrb[5].mxu1  ;;  %v429_v57 = vadd.f32 %v6760_v53, %v281_v54 }
 0x389   :  { %v6761_v56 = vpop.f32.mrb[6].mxu1  ;;  %v421_v60 = vadd.f32 %v420_v55, %v281_v54 }
 0x38a   :  { %v432_v58 = vadd.f32 %v6761_v56, %v281_v54  ;;  %v423_v59 = vpop.f32.mrb[7].mxu1 }
 0x38b   :  { %v424_v61 = vadd.f32 %v423_v59, %v281_v54 }
 0x38c   :  { %v511_v62 = vpack.c.bf16 %v432_v58, %v429_v57 }
 0x38d   :  { %v510_v63 = vpack.c.bf16 %v424_v61, %v421_v60 }
 0x38e   :  { %v564_v4 = vsel %vm512_vm8, %v511_v62, 0 }
 0x38f   :  { %v517_v0 = vsel %vm512_vm8, %v510_v63, 0 }
 0x390   :  { %6775 = vmatpush3.bf16.xpose.msra.mxu1 %v517_v0 }
 0x391   :  { %6780 = vmatprep.subr.bf16.mxu1 %v7710_v41 }
 0x397   :  { %v6772_v1 = vpop.f32.mrb[8].mxu1  ;;  %6777 = vmatmul.mubr.msk.bf16.vlgmr.msra.gmra.mrb[12].mxu1 %vm512_vm8, %v508_v52 }
 0x398   :  { %v493_v5 = vpop.f32.mrb[9].mxu1  ;;  %6781 = vmatpush3.bf16.xpose.msra.mxu1 %v564_v4  ;;  %6782 = vmatprep.mubr.msk.bf16.mxu1 %vm7711_vm7, %v7710_v41  ;;  %v502_v7 = vadd.f32 %v6772_v1, %v282_v3  ;;  %v7333_v4 = vld [vmem:[%s9071_s3 + $0x20] sm:$0xff]  }
 0x399   :  { %v6773_v6 = vpop.f32.mrb[10].mxu1  ;;  %6792 = vmatprep.subr.bf16.mxu1 %v7710_v41  ;;  %v494_v10 = vadd.f32 %v493_v5, %v282_v3 }
 0x39a   :  { %v505_v8 = vadd.f32 %v6773_v6, %v282_v3  ;;  %v496_v9 = vpop.f32.mrb[11].mxu1 }
 0x39b   :  { %v497_v11 = vadd.f32 %v496_v9, %v282_v3  ;;  %v7332_v3 = vld [vmem:[%s9071_s3 + $0xa0] sm:$0xff]  }
 0x39c   :  { %v662_v12 = vpack.c.bf16 %v505_v8, %v502_v7 }
 0x39d   :  { %v661_v14 = vpack.c.bf16 %v497_v11, %v494_v10 }
 0x39f   :  { %6783 = vmatmul.mubr.msk.bf16.vlgmr.msra.gmra.mrb[16].mxu1 %vm512_vm8, %v509_v51  ;;  %6787 = vmatpush3.bf16.msra.mxu0 %v661_v14 }
 0x3a0   :  { %6793 = vmatpush3.bf16.msra.mxu1 %v662_v12  ;;  %6794 = vmatprep.mubr.msk.bf16.mxu1 %vm7711_vm7, %v7710_v41 }
 0x3a1   :  { %6810 = vmatprep.subr.bf16.mxu1 %v7332_v3  ;;  %6798 = vmatprep.subr.bf16.mxu0 %v7333_v4 }
 0x46a   :  { %v553_v15 = vpop.f32.mrb[12].mxu1 }
 0x46b   :  { %v6778_v18 = vpop.f32.mrb[13].mxu1  ;;  %v607_v25 = vmul.f32 0.25, %v553_v15 }
 0x46c   :  { %v556_v19 = vpop.f32.mrb[14].mxu1  ;;  %v7334_v18 = vld [vmem:[%s9071_s3 + $0xa8] sm:$0xff]  }
 0x46d   :  { %v6779_v20 = vpop.f32.mrb[15].mxu1  ;;  %v608_v13 = vmul.f32 0.25, %v556_v19  ;;  %v611_v16 = vadd.f32 %v607_v25, %v7931_v32  ;;  %v7335_v25 = vld [vmem:[%s9071_s3 + $0x28] sm:$0xff]  }
 0x46f   :  { %v612_v43 = vadd.f32 %v608_v13, %v7934_v38  ;;  %v615_v44 = vsel %vm512_vm8, %v611_v16, -inf  ;;  %v7340_v13 = vld [vmem:[%s9071_s3 + $0x120] sm:$0xff]  }
 0x471   :  { %v618_v45 = vsel %vm512_vm8, %v612_v43, -inf }
 0x472   :  { %v600_v22 = vpop.f32.mrb[16].mxu1 }
 0x473   :  { %v609_v26 = vmul.f32 0.25, %v600_v22  ;;  %v6784_v29 = vpop.f32.mrb[17].mxu1 }
 0x474   :  { %v603_v34 = vpop.f32.mrb[18].mxu1  ;;  %v7337_v29 = vld [vmem:[%s9071_s3 + $0x30] sm:$0xff]  }
 0x475   :  { %v610_v35 = vmul.f32 0.25, %v603_v34  ;;  %v6785_v36 = vpop.f32.mrb[19].mxu1  ;;  %v613_v37 = vadd.f32 %v609_v26, %v7931_v32  ;;  %v7336_v26 = vld [vmem:[%s9071_s3 + $0xb0] sm:$0xff]   ;;  %v7339_v34 = vld [vmem:[%s9071_s3 + $0x38] sm:$0xff]  }
 0x476   :  { %v7342_v36 = vld [vmem:[%s9071_s3 + $0x130] sm:$0xff]  }
 0x477   :  { %v621_v39 = vsel %vm512_vm8, %v613_v37, -inf  ;;  %v614_v40 = vadd.f32 %v610_v35, %v7934_v38  ;;  %v7341_v35 = vld [vmem:[%s9071_s3 + $0x128] sm:$0xff]  }
 0x478   :  { %622 = vmax.xlane.f32.xlu1 %v621_v39 }
 0x479   :  { %v624_v42 = vsel %vm512_vm8, %v614_v40, -inf }
 0x47a   :  { %625 = vmax.xlane.f32.xlu0 %v624_v42 }
 0x47c   :  { %616 = vmax.xlane.f32.xlu1 %v615_v44 }
 0x47e   :  { %619 = vmax.xlane.f32.xlu0 %v618_v45 }
 0x505   :  { %v623_v46 = vpop.xlane.xlu1 %622 }
 0x506   :  { %v629_v47 = vsub.f32 %v613_v37, %v623_v46  ;;  %v7343_v37 = vld [vmem:[%s9071_s3 + $0x138] sm:$0xff]  }
 0x507   :  { %v626_v48 = vpop.xlane.xlu0 %625 }
 0x508   :  { %v635_v49 = vmul.f32 1.442695, %v629_v47  ;;  %v630_v50 = vsub.f32 %v614_v40, %v626_v48 }
 0x509   :  { %v617_v51 = vpop.xlane.xlu1 %616 }
 0x50a   :  { %7492 = vpow2.f32 %v635_v49  ;;  %v637_v52 = vmul.f32 1.442695, %v630_v50  ;;  %v627_v53 = vsub.f32 %v611_v16, %v617_v51  ;;  %v783_v50 = vld [vmem:[%s9076_s8 + $0x16] ss:$0 sm:$0xff] }
 0x50b   :  { %v620_v54 = vpop.xlane.xlu0 %619 }
 0x50c   :  { %7494 = vpow2.f32 %v637_v52  ;;  %v631_v55 = vmul.f32 1.442695, %v627_v53  ;;  %v628_v56 = vsub.f32 %v612_v43, %v620_v54 }
 0x50e   :  { %7496 = vpow2.f32 %v631_v55  ;;  %v633_v57 = vmul.f32 1.442695, %v628_v56 }
 0x510   :  { %7498 = vpow2.f32 %v633_v57 }
 0x514   :  { %v7493_v58 = vpop.eup %7492 }
 0x515   :  { %v645_v59 = vsel %vm512_vm8, %v7493_v58, 0.0 }
 0x516   :  { %v7495_v60 = vpop.eup %7494  ;;  %646 = vadd.xlane.f32.xlu1 %v645_v59  ;;  %v782_v59 = vld [vmem:[%s9076_s8 + $0x12] ss:$0 sm:$0xff] }
 0x517   :  { %v648_v61 = vsel %vm512_vm8, %v7495_v60, 0.0 }
 0x518   :  { %v7497_v62 = vpop.eup %7496  ;;  %649 = vadd.xlane.f32.xlu0 %v648_v61 }
 0x519   :  { %v639_v63 = vsel %vm512_vm8, %v7497_v62, 0.0 }
 0x51a   :  { %v7499_v0 = vpop.eup %7498  ;;  %640 = vadd.xlane.f32.xlu1 %v639_v63 }
 0x51b   :  { %v642_v1 = vsel %vm512_vm8, %v7499_v0, 0.0 }
 0x51c   :  { %643 = vadd.xlane.f32.xlu0 %v642_v1 }
 0x5a3   :  { %v647_v5 = vpop.xlane.xlu1 %646 }
 0x5a4   :  { %7500 = vrcp.f32 %v647_v5 }
 0x5a5   :  { %v650_v6 = vpop.xlane.xlu0 %649 }
 0x5a6   :  { %7502 = vrcp.f32 %v650_v6 }
 0x5a7   :  { %v641_v7 = vpop.xlane.xlu1 %640 }
 0x5a8   :  { %7504 = vrcp.f32 %v641_v7 }
 0x5a9   :  { %v644_v8 = vpop.xlane.xlu0 %643 }
 0x5aa   :  { %7506 = vrcp.f32 %v644_v8 }
 0x5ae   :  { %v7501_v9 = vpop.eup %7500 }
 0x5af   :  { %v657_v11 = vmul.f32 %v7501_v9, %v7493_v58 }
 0x5b0   :  { %v7503_v10 = vpop.eup %7502 }
 0x5b1   :  { %v658_v12 = vmul.f32 %v7503_v10, %v7495_v60 }
 0x5b2   :  { %v7505_v14 = vpop.eup %7504 }
 0x5b3   :  { %v660_v15 = vpack.c.bf16 %v658_v12, %v657_v11  ;;  %v655_v20 = vmul.f32 %v7505_v14, %v7497_v62  ;;  %v784_v11 = vld [vmem:[%s9076_s8 + $0x22] ss:$0 sm:$0xff] }
 0x5b4   :  { %v7507_v19 = vpop.eup %7506 }
 0x5b5   :  { %v656_v21 = vmul.f32 %v7507_v19, %v7499_v0  ;;  %6795 = vmatmul.mubr.msk.bf16.vlgmr.msra.gmra.mrb[20].mxu1 %vm512_vm8, %v660_v15 }
 0x5b6   :  { %6811 = vmatpush3.bf16.msra.mxu1 %v7332_v3  ;;  %6818 = vmatprep.mubr.msk.bf16.mxu1 %vm190_vm6, %v7862_v23 }
 0x5b7   :  { %6812 = vmatprep.subr.bf16.mxu1 %v7334_v18  ;;  %v659_v22 = vpack.c.bf16 %v656_v21, %v655_v20 }
 0x5b9   :  { %6789 = vmatmul.mubr.msk.bf16.vlgmr.msra.gmra.mrb[4].mxu0 %vm512_vm8, %v659_v22 }
 0x5ba   :  { %6799 = vmatpush3.bf16.msra.mxu0 %v7333_v4  ;;  %6813 = vmatpush3.bf16.msra.mxu1 %v7334_v18 }
 0x5bb   :  { %6806 = vmatprep.mubr.msk.bf16.mxu0 %vm190_vm6, %v7862_v23  ;;  %6800 = vmatprep.subr.bf16.mxu0 %v7335_v25 }
 0x5bc   :  { %6814 = vmatprep.subr.bf16.mxu1 %v7336_v26 }
 0x5be   :  { %6801 = vmatpush3.bf16.msra.mxu0 %v7335_v25  ;;  %6815 = vmatpush3.bf16.msra.mxu1 %v7336_v26 }
 0x5bf   :  { %6802 = vmatprep.subr.bf16.mxu0 %v7337_v29  ;;  %6816 = vmatprep.subr.bf16.mxu1 %v7338_v30 }
 0x5c2   :  { %6803 = vmatpush3.bf16.msra.mxu0 %v7337_v29  ;;  %6817 = vmatpush3.bf16.msra.mxu1 %v7338_v30 }
 0x5c3   :  { %6804 = vmatprep.subr.bf16.mxu0 %v7339_v34  ;;  %6834 = vmatprep.subr.bf16.mxu1 %v7710_v41 }
 0x5c5   :  { %6819 = vmatmul.mubr.msk.bf16.vlgmr.msra.gmra.mrb[24].mxu1 %vm190_vm6, %v7866_v33 }
 0x5c6   :  { %6805 = vmatpush3.bf16.msra.mxu0 %v7339_v34  ;;  %6836 = vmatprep.mubr.msk.bf16.mxu1 %vm7711_vm7, %v7710_v41 }
 0x5c7   :  { %6822 = vmatprep.subr.bf16.mxu0 %v7340_v13 }
 0x5c9   :  { %6807 = vmatmul.mubr.msk.bf16.vlgmr.msra.gmra.mrb[8].mxu0 %vm190_vm6, %v7866_v33 }
 0x5ca   :  { %6823 = vmatpush3.bf16.msra.mxu0 %v7340_v13  ;;  %6830 = vmatprep.mubr.msk.bf16.mxu0 %vm190_vm6, %v7862_v23 }
 0x5cb   :  { %6824 = vmatprep.subr.bf16.mxu0 %v7341_v35 }
 0x5ce   :  { %6825 = vmatpush3.bf16.msra.mxu0 %v7341_v35 }
 0x5cf   :  { %6826 = vmatprep.subr.bf16.mxu0 %v7342_v36 }
 0x5d2   :  { %6827 = vmatpush3.bf16.msra.mxu0 %v7342_v36 }
 0x5d3   :  { %6828 = vmatprep.subr.bf16.mxu0 %v7343_v37 }
 0x5d6   :  { %6829 = vmatpush3.bf16.msra.mxu0 %v7343_v37 }
 0x5d7   :  { %6846 = vmatprep.subr.bf16.mxu0 %v7710_v41 }
 0x5d9   :  { %6831 = vmatmul.mubr.msk.bf16.vlgmr.msra.gmra.mrb[12].mxu0 %vm190_vm6, %v7866_v33 }
 0x5da   :  { %6848 = vmatprep.mubr.msk.bf16.mxu0 %vm7711_vm7, %v7710_v41 }
 0x688   :  { %v8003_v39 = vpop.f32.mrb[20].mxu1 }
 0x689   :  { %v6796_v40 = vpop.f32.mrb[21].mxu1 }
 0x68a   :  { %v8005_v16 = vpop.f32.mrb[22].mxu1 }
 0x68b   :  { %v752_v42 = vpack.c.bf16 %v8005_v16, %v8003_v39  ;;  %v6797_v43 = vpop.f32.mrb[23].mxu1  ;;  %v7357_v39 = vld [vmem:[%s9071_s3 + $0xd8] sm:$0xff]  }
 0x68c   :  { %v8009_v44 = vpop.f32.mrb[4].mxu0 }
 0x68d   :  { %v6790_v45 = vpop.f32.mrb[5].mxu0 }
 0x68e   :  { %v8011_v46 = vpop.f32.mrb[6].mxu0 }
 0x68f   :  { %v751_v47 = vpack.c.bf16 %v8011_v46, %v8009_v44  ;;  %v6791_v48 = vpop.f32.mrb[7].mxu0 }
 0x698   :  { %v6820_v49 = vpop.f32.mrb[24].mxu1 }
 0x699   :  { %v916_v51 = vpop.f32.mrb[25].mxu1  ;;  %v925_v53 = vadd.f32 %v6820_v49, %v783_v50 }
 0x69a   :  { %v6821_v52 = vpop.f32.mrb[26].mxu1  ;;  %v917_v56 = vadd.f32 %v916_v51, %v783_v50 }
 0x69b   :  { %v928_v54 = vadd.f32 %v6821_v52, %v783_v50  ;;  %v919_v55 = vpop.f32.mrb[27].mxu1 }
 0x69c   :  { %v920_v57 = vadd.f32 %v919_v55, %v783_v50  ;;  %v6808_v58 = vpop.f32.mrb[8].mxu0 }
 0x69d   :  { %v1007_v60 = vpack.c.bf16 %v928_v54, %v925_v53  ;;  %v843_v61 = vpop.f32.mrb[9].mxu0  ;;  %v852_v0 = vadd.f32 %v6808_v58, %v782_v59 }
 0x69e   :  { %v1006_v62 = vpack.c.bf16 %v920_v57, %v917_v56  ;;  %v6809_v63 = vpop.f32.mrb[10].mxu0  ;;  %v844_v4 = vadd.f32 %v843_v61, %v782_v59 }
 0x69f   :  { %v855_v1 = vadd.f32 %v6809_v63, %v782_v59  ;;  %v846_v3 = vpop.f32.mrb[11].mxu0  ;;  %v1059_v9 = vsel %vm512_vm8, %v1007_v60, 0 }
 0x6a0   :  { %v847_v5 = vadd.f32 %v846_v3, %v782_v59  ;;  %v1012_v6 = vsel %vm512_vm8, %v1006_v62, 0 }
 0x6a1   :  { %v1005_v7 = vpack.c.bf16 %v855_v1, %v852_v0  ;;  %6835 = vmatpush3.bf16.xpose.msra.mxu1 %v1012_v6 }
 0x6a2   :  { %v1004_v8 = vpack.c.bf16 %v847_v5, %v844_v4  ;;  %6840 = vmatprep.subr.bf16.mxu1 %v7710_v41 }
 0x6a8   :  { %6837 = vmatmul.mubr.msk.bf16.vlgmr.msra.gmra.mrb[28].mxu1 %vm512_vm8, %v1004_v8 }
 0x6a9   :  { %6841 = vmatpush3.bf16.xpose.msra.mxu1 %v1059_v9  ;;  %6842 = vmatprep.mubr.msk.bf16.mxu1 %vm7711_vm7, %v7710_v41 }
 0x6aa   :  { %6852 = vmatprep.subr.bf16.mxu1 %v7710_v41 }
 0x6ac   :  { %v6832_v10 = vpop.f32.mrb[12].mxu0 }
 0x6ad   :  { %v989_v12 = vpop.f32.mrb[13].mxu0  ;;  %v998_v15 = vadd.f32 %v6832_v10, %v784_v11 }
 0x6ae   :  { %v6833_v14 = vpop.f32.mrb[14].mxu0  ;;  %v990_v20 = vadd.f32 %v989_v12, %v784_v11 }
 0x6af   :  { %v1001_v18 = vadd.f32 %v6833_v14, %v784_v11  ;;  %v992_v19 = vpop.f32.mrb[15].mxu0 }
 0x6b0   :  { %v993_v21 = vadd.f32 %v992_v19, %v784_v11  ;;  %6843 = vmatmul.mubr.msk.bf16.vlgmr.msra.gmra.mrb[32].mxu1 %vm512_vm8, %v1005_v7 }
 0x6b1   :  { %v1157_v22 = vpack.c.bf16 %v1001_v18, %v998_v15  ;;  %6854 = vmatprep.mubr.msk.bf16.mxu1 %vm7711_vm7, %v7710_v41  ;;  %v7344_v15 = vld [vmem:[%s9071_s3 + $0x40] sm:$0xff]  }
 0x6b2   :  { %v1156_v25 = vpack.c.bf16 %v993_v21, %v990_v20 }
 0x6b3   :  { %6853 = vmatpush3.bf16.msra.mxu1 %v1157_v22 }
 0x6b4   :  { %6847 = vmatpush3.bf16.msra.mxu0 %v1156_v25  ;;  %6870 = vmatprep.subr.bf16.mxu1 %v7344_v15 }
 0x77b   :  { %v1048_v26 = vpop.f32.mrb[28].mxu1 }
 0x77c   :  { %v1102_v29 = vmul.f32 0.25, %v1048_v26  ;;  %v6838_v30 = vpop.f32.mrb[29].mxu1 }
 0x77d   :  { %v1051_v34 = vpop.f32.mrb[30].mxu1 }
 0x77e   :  { %v1103_v13 = vmul.f32 0.25, %v1051_v34  ;;  %v6839_v35 = vpop.f32.mrb[31].mxu1  ;;  %v1106_v36 = vadd.f32 %v1102_v29, %v7931_v32 }
 0x780   :  { %v1110_v37 = vsel %vm512_vm8, %v1106_v36, -inf  ;;  %v1107_v40 = vadd.f32 %v1103_v13, %v7934_v38 }
 0x781   :  { %1111 = vmax.xlane.f32.xlu1 %v1110_v37 }
 0x782   :  { %v1113_v43 = vsel %vm512_vm8, %v1107_v40, -inf }
 0x783   :  { %1114 = vmax.xlane.f32.xlu0 %v1113_v43  ;;  %v1095_v45 = vpop.f32.mrb[32].mxu1  ;;  %v7346_v43 = vld [vmem:[%s9071_s3 + $0x50] sm:$0xff]  }
 0x784   :  { %v1104_v48 = vmul.f32 0.25, %v1095_v45  ;;  %v6844_v49 = vpop.f32.mrb[33].mxu1  ;;  %v7347_v45 = vld [vmem:[%s9071_s3 + $0x58] sm:$0xff]  }
 0x785   :  { %v1098_v50 = vpop.f32.mrb[34].mxu1  ;;  %v7349_v49 = vld [vmem:[%s9071_s3 + $0x148] sm:$0xff]  }
 0x786   :  { %v1105_v51 = vmul.f32 0.25, %v1098_v50  ;;  %v6845_v52 = vpop.f32.mrb[35].mxu1  ;;  %v1108_v53 = vadd.f32 %v1104_v48, %v7931_v32  ;;  %v7348_v48 = vld [vmem:[%s9071_s3 + $0x140] sm:$0xff]   ;;  %v7350_v50 = vld [vmem:[%s9071_s3 + $0x150] sm:$0xff]  }
 0x787   :  { %v7352_v52 = vld [vmem:[%s9072_s4 + $0x8] sm:$0xff]  }
 0x788   :  { %v1116_v54 = vsel %vm512_vm8, %v1108_v53, -inf  ;;  %v1109_v55 = vadd.f32 %v1105_v51, %v7934_v38  ;;  %v7351_v51 = vld [vmem:[%s9071_s3 + $0x158] sm:$0xff]   ;;  %6858 = vmatprep.subr.bf16.mxu0 %v7352_v52 }
 0x789   :  { %1117 = vmax.xlane.f32.xlu1 %v1116_v54 }
 0x78a   :  { %v1119_v56 = vsel %vm512_vm8, %v1109_v55, -inf }
 0x78b   :  { %1120 = vmax.xlane.f32.xlu0 %v1119_v56 }
 0x80e   :  { %v1112_v57 = vpop.xlane.xlu1 %1111 }
 0x80f   :  { %v1122_v58 = vsub.f32 %v1106_v36, %v1112_v57 }
 0x810   :  { %v1115_v59 = vpop.xlane.xlu0 %1114 }
 0x811   :  { %v1126_v60 = vmul.f32 1.442695, %v1122_v58  ;;  %v1123_v61 = vsub.f32 %v1107_v40, %v1115_v59  ;;  %v7345_v40 = vld [vmem:[%s9071_s3 + $0x48] sm:$0xff]  }
 0x813   :  { %7508 = vpow2.f32 %v1126_v60  ;;  %v1128_v62 = vmul.f32 1.442695, %v1123_v61 }
 0x815   :  { %7510 = vpow2.f32 %v1128_v62 }
 0x816   :  { %v1118_v63 = vpop.xlane.xlu1 %1117 }
 0x817   :  { %v1124_v0 = vsub.f32 %v1108_v53, %v1118_v63  ;;  %v7353_v53 = vld [vmem:[%s9072_s4] sm:$0xff]  }
 0x818   :  { %v1121_v1 = vpop.xlane.xlu0 %1120 }
 0x819   :  { %v1130_v3 = vmul.f32 1.442695, %v1124_v0  ;;  %v1125_v4 = vsub.f32 %v1109_v55, %v1121_v1  ;;  %v7354_v0 = vld [vmem:[%s9071_s3 + $0xc0] sm:$0xff]   ;;  %v7355_v1 = vld [vmem:[%s9071_s3 + $0xc8] sm:$0xff]  }
 0x81b   :  { %7512 = vpow2.f32 %v1130_v3  ;;  %v1132_v5 = vmul.f32 1.442695, %v1125_v4  ;;  %v1400_v4 = vld [vmem:[%s9076_s8 + $0x13] ss:$0 sm:$0xff] }
 0x81d   :  { %v7509_v6 = vpop.eup %7508  ;;  %7514 = vpow2.f32 %v1132_v5 }
 0x81e   :  { %v1134_v7 = vsel %vm512_vm8, %v7509_v6, 0.0 }
 0x81f   :  { %v7511_v8 = vpop.eup %7510  ;;  %1135 = vadd.xlane.f32.xlu1 %v1134_v7  ;;  %v7356_v7 = vld [vmem:[%s9071_s3 + $0xd0] sm:$0xff]  }
 0x820   :  { %v1137_v9 = vsel %vm512_vm8, %v7511_v8, 0.0 }
 0x821   :  { %1138 = vadd.xlane.f32.xlu0 %v1137_v9 }
 0x825   :  { %v7513_v10 = vpop.eup %7512 }
 0x826   :  { %v1140_v11 = vsel %vm512_vm8, %v7513_v10, 0.0 }
 0x827   :  { %v7515_v12 = vpop.eup %7514  ;;  %1141 = vadd.xlane.f32.xlu1 %v1140_v11 }
 0x828   :  { %v1143_v14 = vsel %vm512_vm8, %v7515_v12, 0.0 }
 0x829   :  { %1144 = vadd.xlane.f32.xlu0 %v1143_v14 }
 0x8ac   :  { %v1136_v18 = vpop.xlane.xlu1 %1135 }
 0x8ad   :  { %7516 = vrcp.f32 %v1136_v18 }
 0x8ae   :  { %v1139_v19 = vpop.xlane.xlu0 %1138 }
 0x8af   :  { %7518 = vrcp.f32 %v1139_v19 }
 0x8b4   :  { %v1142_v20 = vpop.xlane.xlu1 %1141 }
 0x8b5   :  { %7520 = vrcp.f32 %v1142_v20 }
 0x8b6   :  { %v1145_v21 = vpop.xlane.xlu0 %1144 }
 0x8b7   :  { %v7517_v22 = vpop.eup %7516  ;;  %7522 = vrcp.f32 %v1145_v21 }
 0x8b8   :  { %v1150_v26 = vmul.f32 %v7517_v22, %v7509_v6 }
 0x8b9   :  { %v7519_v25 = vpop.eup %7518 }
 0x8ba   :  { %v1151_v29 = vmul.f32 %v7519_v25, %v7511_v8 }
 0x8bc   :  { %v1154_v30 = vpack.c.bf16 %v1151_v29, %v1150_v26  ;;  %v1401_v29 = vld [vmem:[%s9076_s8 + $0x17] ss:$0 sm:$0xff] }
 0x8be   :  { %6849 = vmatmul.mubr.msk.bf16.vlgmr.msra.gmra.mrb[16].mxu0 %vm512_vm8, %v1154_v30 }
 0x8bf   :  { %v7521_v34 = vpop.eup %7520  ;;  %6859 = vmatpush3.bf16.msra.mxu0 %v7352_v52 }
 0x8c0   :  { %v1152_v35 = vmul.f32 %v7521_v34, %v7513_v10  ;;  %6864 = vmatprep.subr.bf16.mxu0 %v7353_v53 }
 0x8c1   :  { %v7523_v13 = vpop.eup %7522 }
 0x8c2   :  { %v1153_v36 = vmul.f32 %v7523_v13, %v7515_v12 }
 0x8c4   :  { %v1155_v37 = vpack.c.bf16 %v1153_v36, %v1152_v35 }
 0x8c6   :  { %6855 = vmatmul.mubr.msk.bf16.vlgmr.msra.gmra.mrb[36].mxu1 %vm512_vm8, %v1155_v37 }
 0x8c7   :  { %6871 = vmatpush3.bf16.msra.mxu1 %v7344_v15  ;;  %6878 = vmatprep.mubr.msk.bf16.mxu1 %vm190_vm6, %v7862_v23 }
 0x8c8   :  { %6872 = vmatprep.subr.bf16.mxu1 %v7345_v40 }
 0x8cb   :  { %6873 = vmatpush3.bf16.msra.mxu1 %v7345_v40 }
 0x8cc   :  { %6874 = vmatprep.subr.bf16.mxu1 %v7346_v43 }
 0x8cf   :  { %6875 = vmatpush3.bf16.msra.mxu1 %v7346_v43 }
 0x8d0   :  { %6876 = vmatprep.subr.bf16.mxu1 %v7347_v45 }
 0x8d3   :  { %6877 = vmatpush3.bf16.msra.mxu1 %v7347_v45 }
 0x8d4   :  { %6894 = vmatprep.subr.bf16.mxu1 %v7348_v48 }
 0x8d6   :  { %6879 = vmatmul.mubr.msk.bf16.vlgmr.msra.gmra.mrb[40].mxu1 %vm190_vm6, %v7866_v33 }
 0x8d7   :  { %6895 = vmatpush3.bf16.msra.mxu1 %v7348_v48  ;;  %6902 = vmatprep.mubr.msk.bf16.mxu1 %vm190_vm6, %v7862_v23 }
 0x8d8   :  { %6896 = vmatprep.subr.bf16.mxu1 %v7349_v49 }
 0x8db   :  { %6897 = vmatpush3.bf16.msra.mxu1 %v7349_v49 }
 0x8dc   :  { %6898 = vmatprep.subr.bf16.mxu1 %v7350_v50 }
 0x8df   :  { %6899 = vmatpush3.bf16.msra.mxu1 %v7350_v50 }
 0x8e0   :  { %6900 = vmatprep.subr.bf16.mxu1 %v7351_v51 }
 0x8e3   :  { %6901 = vmatpush3.bf16.msra.mxu1 %v7351_v51 }
 0x8e4   :  { %6912 = vmatprep.subr.bf16.mxu1 %v7710_v41 }
 0x8e6   :  { %6903 = vmatmul.mubr.msk.bf16.vlgmr.msra.gmra.mrb[44].mxu1 %vm190_vm6, %v7866_v33 }
 0x8e7   :  { %6914 = vmatprep.mubr.msk.bf16.mxu1 %vm7711_vm7, %v7710_v41 }
 0x991   :  { %v1195_v54 = vpop.f32.mrb[16].mxu0 }
 0x992   :  { %v6850_v55 = vpop.f32.mrb[17].mxu0 }
 0x993   :  { %v1198_v56 = vpop.f32.mrb[18].mxu0 }
 0x994   :  { %v1246_v57 = vpack.c.bf16 %v1198_v56, %v1195_v54  ;;  %v6851_v58 = vpop.f32.mrb[19].mxu0 }
 0x996   :  { %6860 = vmatprep.mubr.msk.bf16.mxu0 %vm512_vm8, %v1246_v57 }
 0x999   :  { %v1239_v59 = vpop.f32.mrb[36].mxu1 }
 0x99a   :  { %v6856_v60 = vpop.f32.mrb[37].mxu1 }
 0x99b   :  { %v1242_v61 = vpop.f32.mrb[38].mxu1 }
 0x99c   :  { %v1247_v62 = vpack.c.bf16 %v1242_v61, %v1239_v59  ;;  %v6857_v63 = vpop.f32.mrb[39].mxu1 }
 0x99e   :  { %6861 = vmatmul.mubr.msk.bf16.vlgmr.msra.gmra.mrb[20].mxu0 %vm512_vm8, %v1247_v62 }
 0x99f   :  { %6865 = vmatpush3.bf16.msra.mxu0 %v7353_v53  ;;  %6866 = vmatprep.mubr.msk.bf16.mxu0 %vm512_vm8, %v751_v47 }
 0x9a0   :  { %6882 = vmatprep.subr.bf16.mxu0 %v7354_v0 }
 0x9a9   :  { %v6880_v3 = vpop.f32.mrb[40].mxu1 }
 0x9aa   :  { %v1461_v5 = vpop.f32.mrb[41].mxu1  ;;  %6867 = vmatmul.mubr.msk.bf16.vlgmr.msra.gmra.mrb[20].mxu0 %vm512_vm8, %v752_v42  ;;  %v1470_v44 = vadd.f32 %v6880_v3, %v1400_v4  ;;  %v1402_v42 = vld [vmem:[%s9076_s8 + $0x23] ss:$0 sm:$0xff] }
 0x9ab   :  { %v6881_v6 = vpop.f32.mrb[42].mxu1  ;;  %6883 = vmatpush3.bf16.msra.mxu0 %v7354_v0  ;;  %6890 = vmatprep.mubr.msk.bf16.mxu0 %vm190_vm6, %v7862_v23  ;;  %v1462_v8 = vadd.f32 %v1461_v5, %v1400_v4 }
 0x9ac   :  { %v1473_v46 = vadd.f32 %v6881_v6, %v1400_v4  ;;  %v1464_v47 = vpop.f32.mrb[43].mxu1  ;;  %6884 = vmatprep.subr.bf16.mxu0 %v7355_v1 }
 0x9ad   :  { %v1465_v9 = vadd.f32 %v1464_v47, %v1400_v4 }
 0x9ae   :  { %v1623_v10 = vpack.c.bf16 %v1473_v46, %v1470_v44 }
 0x9af   :  { %v1622_v11 = vpack.c.bf16 %v1465_v9, %v1462_v8  ;;  %6885 = vmatpush3.bf16.msra.mxu0 %v7355_v1 }
 0x9b0   :  { %6886 = vmatprep.subr.bf16.mxu0 %v7356_v7 }
 0x9b3   :  { %6887 = vmatpush3.bf16.msra.mxu0 %v7356_v7 }
 0x9b4   :  { %6888 = vmatprep.subr.bf16.mxu0 %v7357_v39 }
 0x9b7   :  { %6889 = vmatpush3.bf16.msra.mxu0 %v7357_v39 }
 0x9b8   :  { %6906 = vmatprep.subr.bf16.mxu0 %v7710_v41 }
 0x9b9   :  { %v6904_v16 = vpop.f32.mrb[44].mxu1 }
 0x9ba   :  { %6891 = vmatmul.mubr.msk.bf16.vlgmr.msra.gmra.mrb[24].mxu0 %vm190_vm6, %v7866_v33  ;;  %v1607_v12 = vpop.f32.mrb[45].mxu1  ;;  %v1616_v15 = vadd.f32 %v6904_v16, %v1402_v42 }
 0x9bb   :  { %v6905_v14 = vpop.f32.mrb[46].mxu1  ;;  %6908 = vmatprep.mubr.msk.bf16.mxu0 %vm7711_vm7, %v7710_v41  ;;  %v1608_v20 = vadd.f32 %v1607_v12, %v1402_v42 }
 0x9bc   :  { %v1619_v18 = vadd.f32 %v6905_v14, %v1402_v42  ;;  %v1610_v19 = vpop.f32.mrb[47].mxu1 }
 0x9bd   :  { %v1611_v21 = vadd.f32 %v1610_v19, %v1402_v42 }
 0x9be   :  { %v1775_v22 = vpack.c.bf16 %v1619_v18, %v1616_v15 }
 0x9bf   :  { %v1774_v25 = vpack.c.bf16 %v1611_v21, %v1608_v20 }
 0xa8d   :  { %v6892_v26 = vpop.f32.mrb[24].mxu0 }
 0xa8e   :  { %v1534_v30 = vpop.f32.mrb[25].mxu0  ;;  %v1543_v13 = vadd.f32 %v6892_v26, %v1401_v29  ;;  %v7358_v26 = vld [vmem:[%s9071_s3 + $0x60] sm:$0xff]  }
 0xa8f   :  { %v6893_v34 = vpop.f32.mrb[26].mxu0  ;;  %v1535_v37 = vadd.f32 %v1534_v30, %v1401_v29 }
 0xa90   :  { %v1546_v35 = vadd.f32 %v6893_v34, %v1401_v29  ;;  %v1537_v36 = vpop.f32.mrb[27].mxu0 }
 0xa91   :  { %v1538_v40 = vadd.f32 %v1537_v36, %v1401_v29 }
 0xa92   :  { %v1625_v43 = vpack.c.bf16 %v1546_v35, %v1543_v13 }
 0xa93   :  { %v1624_v45 = vpack.c.bf16 %v1538_v40, %v1535_v37 }
 0xa94   :  { %v1677_v48 = vsel %vm512_vm8, %v1625_v43, 0 }
 0xa95   :  { %6913 = vmatpush3.bf16.xpose.msra.mxu1 %v1677_v48  ;;  %v1630_v49 = vsel %vm512_vm8, %v1624_v45, 0 }
 0xa96   :  { %6907 = vmatpush3.bf16.xpose.msra.mxu0 %v1630_v49  ;;  %6924 = vmatprep.subr.bf16.mxu1 %v7710_v41 }
 0xa97   :  { %6918 = vmatprep.subr.bf16.mxu0 %v7710_v41 }
 0xa9c   :  { %6915 = vmatmul.mubr.msk.bf16.vlgmr.msra.gmra.mrb[48].mxu1 %vm512_vm8, %v1623_v10 }
 0xa9d   :  { %6909 = vmatmul.mubr.msk.bf16.vlgmr.msra.gmra.mrb[28].mxu0 %vm512_vm8, %v1622_v11  ;;  %6925 = vmatpush3.bf16.msra.mxu1 %v1775_v22 }
 0xa9e   :  { %6919 = vmatpush3.bf16.msra.mxu0 %v1774_v25  ;;  %6920 = vmatprep.mubr.msk.bf16.mxu0 %vm7711_vm7, %v7710_v41 }
 0xa9f   :  { %6926 = vmatprep.mubr.msk.bf16.mxu1 %vm7711_vm7, %v7710_v41  ;;  %6936 = vmatprep.subr.bf16.mxu1 %v7358_v26 }
 0xb6f   :  { %v1713_v50 = vpop.f32.mrb[48].mxu1 }
 0xb70   :  { %v1666_v51 = vpop.f32.mrb[28].mxu0  ;;  %v6916_v52 = vpop.f32.mrb[49].mxu1  ;;  %v1722_v53 = vmul.f32 0.25, %v1713_v50 }
 0xb71   :  { %v1720_v54 = vmul.f32 0.25, %v1666_v51  ;;  %v6910_v55 = vpop.f32.mrb[29].mxu0  ;;  %v1716_v56 = vpop.f32.mrb[50].mxu1  ;;  %v7359_v52 = vld [vmem:[%s9071_s3 + $0x68] sm:$0xff]  }
 0xb72   :  { %v1669_v57 = vpop.f32.mrb[30].mxu0  ;;  %v6917_v58 = vpop.f32.mrb[51].mxu1  ;;  %v1723_v59 = vmul.f32 0.25, %v1716_v56  ;;  %v1726_v1 = vadd.f32 %v1722_v53, %v7931_v32  ;;  %v7360_v53 = vld [vmem:[%s9071_s3 + $0x70] sm:$0xff]   ;;  %v7362_v55 = vld [vmem:[%s9071_s3 + $0x160] sm:$0xff]   ;;  %v7363_v56 = vld [vmem:[%s9071_s3 + $0x168] sm:$0xff]  }
 0xb73   :  { %v1721_v60 = vmul.f32 0.25, %v1669_v57  ;;  %v6911_v61 = vpop.f32.mrb[31].mxu0  ;;  %v1724_v62 = vadd.f32 %v1720_v54, %v7931_v32  ;;  %v7361_v54 = vld [vmem:[%s9071_s3 + $0x78] sm:$0xff]   ;;  %v7364_v57 = vld [vmem:[%s9071_s3 + $0x170] sm:$0xff]  }
 0xb74   :  { %v1727_v4 = vadd.f32 %v1723_v59, %v7934_v38  ;;  %v1734_v5 = vsel %vm512_vm8, %v1726_v1, -inf  ;;  %v7365_v58 = vld [vmem:[%s9071_s3 + $0x178] sm:$0xff]   ;;  %v7366_v59 = vld [vmem:[%s9072_s4 + $0x10] sm:$0xff]  }
 0xb75   :  { %v1728_v63 = vsel %vm512_vm8, %v1724_v62, -inf  ;;  %v1725_v0 = vadd.f32 %v1721_v60, %v7934_v38  ;;  %6930 = vmatprep.subr.bf16.mxu0 %v7366_v59  ;;  %v7367_v60 = vld [vmem:[%s9071_s3 + $0xe0] sm:$0xff]  }
 0xb76   :  { %1729 = vmax.xlane.f32.xlu1 %v1728_v63  ;;  %v1737_v6 = vsel %vm512_vm8, %v1727_v4, -inf }
 0xb77   :  { %v1731_v3 = vsel %vm512_vm8, %v1725_v0, -inf }
 0xb78   :  { %1732 = vmax.xlane.f32.xlu0 %v1731_v3 }
 0xb7a   :  { %1735 = vmax.xlane.f32.xlu1 %v1734_v5 }
 0xb7c   :  { %1738 = vmax.xlane.f32.xlu0 %v1737_v6 }
 0xc03   :  { %v1730_v44 = vpop.xlane.xlu1 %1729 }
 0xc04   :  { %v1740_v46 = vsub.f32 %v1724_v62, %v1730_v44 }
 0xc05   :  { %v1733_v47 = vpop.xlane.xlu0 %1732 }
 0xc06   :  { %v1744_v7 = vmul.f32 1.442695, %v1740_v46  ;;  %v1741_v8 = vsub.f32 %v1725_v0, %v1733_v47  ;;  %v7368_v46 = vld [vmem:[%s9071_s3 + $0xe8] sm:$0xff]   ;;  %v7369_v47 = vld [vmem:[%s9071_s3 + $0xf0] sm:$0xff]  }
 0xc07   :  { %v1736_v9 = vpop.xlane.xlu1 %1735 }
 0xc08   :  { %7524 = vpow2.f32 %v1744_v7  ;;  %v1746_v10 = vmul.f32 1.442695, %v1741_v8  ;;  %v1742_v11 = vsub.f32 %v1726_v1, %v1736_v9  ;;  %v7370_v7 = vld [vmem:[%s9071_s3 + $0xf8] sm:$0xff]   ;;  %v1961_v9 = vld [vmem:[%s9076_s8 + $0x14] ss:$0 sm:$0xff] }
 0xc09   :  { %v1739_v39 = vpop.xlane.xlu0 %1738 }
 0xc0a   :  { %7526 = vpow2.f32 %v1746_v10  ;;  %v1748_v16 = vmul.f32 1.442695, %v1742_v11  ;;  %v1743_v42 = vsub.f32 %v1727_v4, %v1739_v39 }
 0xc0c   :  { %7528 = vpow2.f32 %v1748_v16  ;;  %v1750_v12 = vmul.f32 1.442695, %v1743_v42 }
 0xc0e   :  { %7530 = vpow2.f32 %v1750_v12 }
 0xc12   :  { %v7525_v14 = vpop.eup %7524 }
 0xc13   :  { %v1752_v15 = vsel %vm512_vm8, %v7525_v14, 0.0 }
 0xc14   :  { %v7527_v18 = vpop.eup %7526  ;;  %1753 = vadd.xlane.f32.xlu1 %v1752_v15 }
 0xc15   :  { %v1755_v19 = vsel %vm512_vm8, %v7527_v18, 0.0 }
 0xc16   :  { %v7529_v20 = vpop.eup %7528  ;;  %1756 = vadd.xlane.f32.xlu0 %v1755_v19 }
 0xc17   :  { %v1758_v21 = vsel %vm512_vm8, %v7529_v20, 0.0 }
 0xc18   :  { %v7531_v22 = vpop.eup %7530  ;;  %1759 = vadd.xlane.f32.xlu1 %v1758_v21 }
 0xc19   :  { %v1761_v25 = vsel %vm512_vm8, %v7531_v22, 0.0 }
 0xc1a   :  { %1762 = vadd.xlane.f32.xlu0 %v1761_v25 }
 0xca1   :  { %v1754_v29 = vpop.xlane.xlu1 %1753 }
 0xca2   :  { %7532 = vrcp.f32 %v1754_v29 }
 0xca3   :  { %v1757_v30 = vpop.xlane.xlu0 %1756 }
 0xca4   :  { %7534 = vrcp.f32 %v1757_v30 }
 0xca5   :  { %v1760_v34 = vpop.xlane.xlu1 %1759 }
 0xca6   :  { %7536 = vrcp.f32 %v1760_v34 }
 0xca7   :  { %v1763_v13 = vpop.xlane.xlu0 %1762 }
 0xca8   :  { %7538 = vrcp.f32 %v1763_v13 }
 0xcac   :  { %v7533_v35 = vpop.eup %7532 }
 0xcad   :  { %v1768_v37 = vmul.f32 %v7533_v35, %v7525_v14  ;;  %v1962_v35 = vld [vmem:[%s9076_s8 + $0x20] ss:$0 sm:$0xff] }
 0xcae   :  { %v7535_v36 = vpop.eup %7534 }
 0xcaf   :  { %v1769_v40 = vmul.f32 %v7535_v36, %v7527_v18  ;;  %v1963_v18 = vld [vmem:[%s9076_s8 + $0x24] ss:$0 sm:$0xff] }
 0xcb0   :  { %v7537_v43 = vpop.eup %7536 }
 0xcb1   :  { %v1772_v45 = vpack.c.bf16 %v1769_v40, %v1768_v37  ;;  %v1770_v49 = vmul.f32 %v7537_v43, %v7529_v20 }
 0xcb2   :  { %v7539_v48 = vpop.eup %7538 }
 0xcb3   :  { %v1771_v50 = vmul.f32 %v7539_v48, %v7531_v22  ;;  %6921 = vmatmul.mubr.msk.bf16.vlgmr.msra.gmra.mrb[32].mxu0 %vm512_vm8, %v1772_v45 }
 0xcb4   :  { %6931 = vmatpush3.bf16.msra.mxu0 %v7366_v59 }
 0xcb5   :  { %v1773_v51 = vpack.c.bf16 %v1771_v50, %v1770_v49  ;;  %6948 = vmatprep.subr.bf16.mxu0 %v7367_v60 }
 0xcb7   :  { %6927 = vmatmul.mubr.msk.bf16.vlgmr.msra.gmra.mrb[52].mxu1 %vm512_vm8, %v1773_v51 }
 0xcb8   :  { %6937 = vmatpush3.bf16.msra.mxu1 %v7358_v26  ;;  %6944 = vmatprep.mubr.msk.bf16.mxu1 %vm190_vm6, %v7862_v23 }
 0xcb9   :  { %6938 = vmatprep.subr.bf16.mxu1 %v7359_v52 }
 0xcbc   :  { %6939 = vmatpush3.bf16.msra.mxu1 %v7359_v52 }
 0xcbd   :  { %6940 = vmatprep.subr.bf16.mxu1 %v7360_v53 }
 0xcc0   :  { %6941 = vmatpush3.bf16.msra.mxu1 %v7360_v53 }
 0xcc1   :  { %6942 = vmatprep.subr.bf16.mxu1 %v7361_v54 }
 0xcc4   :  { %6943 = vmatpush3.bf16.msra.mxu1 %v7361_v54 }
 0xcc5   :  { %6960 = vmatprep.subr.bf16.mxu1 %v7362_v55 }
 0xcc7   :  { %6945 = vmatmul.mubr.msk.bf16.vlgmr.msra.gmra.mrb[56].mxu1 %vm190_vm6, %v7866_v33 }
 0xcc8   :  { %6961 = vmatpush3.bf16.msra.mxu1 %v7362_v55  ;;  %6968 = vmatprep.mubr.msk.bf16.mxu1 %vm190_vm6, %v7862_v23 }
 0xcc9   :  { %6962 = vmatprep.subr.bf16.mxu1 %v7363_v56 }
 0xccc   :  { %6963 = vmatpush3.bf16.msra.mxu1 %v7363_v56 }
 0xccd   :  { %6964 = vmatprep.subr.bf16.mxu1 %v7364_v57 }
 0xcd0   :  { %6965 = vmatpush3.bf16.msra.mxu1 %v7364_v57 }
 0xcd1   :  { %6966 = vmatprep.subr.bf16.mxu1 %v7365_v58 }
 0xcd4   :  { %6967 = vmatpush3.bf16.msra.mxu1 %v7365_v58 }
 0xcd5   :  { %6984 = vmatprep.subr.bf16.mxu1 %v7710_v41 }
 0xcd7   :  { %6969 = vmatmul.mubr.msk.bf16.vlgmr.msra.gmra.mrb[60].mxu1 %vm190_vm6, %v7866_v33 }
 0xcd8   :  { %6986 = vmatprep.mubr.msk.bf16.mxu1 %vm7711_vm7, %v7710_v41 }
 0xd86   :  { %v1813_v61 = vpop.f32.mrb[32].mxu0 }
 0xd87   :  { %v6922_v62 = vpop.f32.mrb[33].mxu0 }
 0xd88   :  { %v1816_v63 = vpop.f32.mrb[34].mxu0 }
 0xd89   :  { %v1864_v0 = vpack.c.bf16 %v1816_v63, %v1813_v61  ;;  %v6923_v1 = vpop.f32.mrb[35].mxu0 }
 0xd8a   :  { %v1857_v3 = vpop.f32.mrb[52].mxu1 }
 0xd8b   :  { %v6928_v4 = vpop.f32.mrb[53].mxu1  ;;  %6932 = vmatprep.mubr.msk.bf16.mxu0 %vm512_vm8, %v1864_v0 }
 0xd8c   :  { %v1860_v5 = vpop.f32.mrb[54].mxu1 }
 0xd8d   :  { %v1865_v6 = vpack.c.bf16 %v1860_v5, %v1857_v3  ;;  %v6929_v44 = vpop.f32.mrb[55].mxu1 }
 0xd8f   :  { %6933 = vmatmul.mubr.msk.bf16.vlgmr.msra.gmra.mrb[20].mxu0 %vm512_vm8, %v1865_v6 }
 0xd90   :  { %6949 = vmatpush3.bf16.msra.mxu0 %v7367_v60  ;;  %6956 = vmatprep.mubr.msk.bf16.mxu0 %vm190_vm6, %v7862_v23 }
 0xd91   :  { %6950 = vmatprep.subr.bf16.mxu0 %v7368_v46 }
 0xd94   :  { %6951 = vmatpush3.bf16.msra.mxu0 %v7368_v46 }
 0xd95   :  { %6952 = vmatprep.subr.bf16.mxu0 %v7369_v47 }
 0xd98   :  { %6953 = vmatpush3.bf16.msra.mxu0 %v7369_v47 }
 0xd99   :  { %6954 = vmatprep.subr.bf16.mxu0 %v7370_v7 }
 0xd9a   :  { %v6946_v8 = vpop.f32.mrb[56].mxu1 }
 0xd9b   :  { %v2022_v10 = vpop.f32.mrb[57].mxu1  ;;  %v2031_v11 = vadd.f32 %v6946_v8, %v1961_v9 }
 0xd9c   :  { %v6947_v23 = vpop.f32.mrb[58].mxu1  ;;  %6955 = vmatpush3.bf16.msra.mxu0 %v7370_v7  ;;  %v2023_v42 = vadd.f32 %v2022_v10, %v1961_v9 }
 0xd9d   :  { %v2034_v39 = vadd.f32 %v6947_v23, %v1961_v9  ;;  %v2025_v16 = vpop.f32.mrb[59].mxu1  ;;  %6972 = vmatprep.subr.bf16.mxu0 %v7710_v41 }
 0xd9e   :  { %v2026_v12 = vadd.f32 %v2025_v16, %v1961_v9 }
 0xd9f   :  { %v2184_v14 = vpack.c.bf16 %v2034_v39, %v2031_v11  ;;  %6957 = vmatmul.mubr.msk.bf16.vlgmr.msra.gmra.mrb[36].mxu0 %vm190_vm6, %v7866_v33 }
 0xda0   :  { %v2183_v15 = vpack.c.bf16 %v2026_v12, %v2023_v42  ;;  %6974 = vmatprep.mubr.msk.bf16.mxu0 %vm7711_vm7, %v7710_v41 }
 0xdaa   :  { %v6970_v19 = vpop.f32.mrb[60].mxu1 }
 0xdab   :  { %v2177_v20 = vadd.f32 %v6970_v19, %v1963_v18  ;;  %v2168_v21 = vpop.f32.mrb[61].mxu1 }
 0xdac   :  { %v6971_v22 = vpop.f32.mrb[62].mxu1  ;;  %v2169_v29 = vadd.f32 %v2168_v21, %v1963_v18 }
 0xdad   :  { %v2180_v25 = vadd.f32 %v6971_v22, %v1963_v18  ;;  %v2171_v26 = vpop.f32.mrb[63].mxu1 }
 0xdae   :  { %v2172_v30 = vadd.f32 %v2171_v26, %v1963_v18 }
 0xdaf   :  { %v2336_v34 = vpack.c.bf16 %v2180_v25, %v2177_v20 }
 0xdb0   :  { %v2335_v13 = vpack.c.bf16 %v2172_v30, %v2169_v29 }
 0xdb2   :  { %6985 = vmatpush3.bf16.msra.mxu1 %v2335_v13 }
 0xe72   :  { %v6958_v33 = vpop.f32.mrb[36].mxu0 }
 0xe73   :  { %v2095_v36 = vpop.f32.mrb[37].mxu0  ;;  %v2104_v40 = vadd.f32 %v6958_v33, %v1962_v35 }
 0xe74   :  { %v6959_v37 = vpop.f32.mrb[38].mxu0  ;;  %v2096_v48 = vadd.f32 %v2095_v36, %v1962_v35 }
 0xe75   :  { %v2107_v43 = vadd.f32 %v6959_v37, %v1962_v35  ;;  %v2098_v45 = vpop.f32.mrb[39].mxu0 }
 0xe76   :  { %v2099_v49 = vadd.f32 %v2098_v45, %v1962_v35 }
 0xe77   :  { %v2186_v50 = vpack.c.bf16 %v2107_v43, %v2104_v40 }
 0xe78   :  { %v2185_v51 = vpack.c.bf16 %v2099_v49, %v2096_v48 }
 0xe79   :  { %v2238_v53 = vsel %vm512_vm8, %v2186_v50, 0 }
 0xe7a   :  { %v2191_v52 = vsel %vm512_vm8, %v2185_v51, 0 }
 0xe7b   :  { %6973 = vmatpush3.bf16.xpose.msra.mxu0 %v2191_v52 }
 0xe7c   :  { %6978 = vmatprep.subr.bf16.mxu0 %v7710_v41 }
 0xe82   :  { %6975 = vmatmul.mubr.msk.bf16.vlgmr.msra.gmra.mrb[40].mxu0 %vm512_vm8, %v2183_v15 }
 0xe83   :  { %6979 = vmatpush3.bf16.xpose.msra.mxu0 %v2238_v53  ;;  %6980 = vmatprep.mubr.msk.bf16.mxu0 %vm7711_vm7, %v7710_v41  ;;  %v7371_v53 = vld [vmem:[%s9072_s4 + $0x18] sm:$0xff]  }
 0xe84   :  { %6990 = vmatprep.subr.bf16.mxu0 %v7710_v41 }
 0xe8a   :  { %6981 = vmatmul.mubr.msk.bf16.vlgmr.msra.gmra.mrb[44].mxu0 %vm512_vm8, %v2184_v14 }
 0xe8b   :  { %6991 = vmatpush3.bf16.msra.mxu0 %v2336_v34  ;;  %6992 = vmatprep.mubr.msk.bf16.mxu0 %vm7711_vm7, %v7710_v41 }
 0xe8c   :  { %6996 = vmatprep.subr.bf16.mxu0 %v7371_v53 }
 0xf55   :  { %v2227_v54 = vpop.f32.mrb[40].mxu0 }
 0xf56   :  { %v2281_v55 = vmul.f32 0.25, %v2227_v54  ;;  %v6976_v56 = vpop.f32.mrb[41].mxu0 }
 0xf57   :  { %v2230_v57 = vpop.f32.mrb[42].mxu0 }
 0xf58   :  { %v2282_v58 = vmul.f32 0.25, %v2230_v57  ;;  %v6977_v59 = vpop.f32.mrb[43].mxu0  ;;  %v2285_v60 = vadd.f32 %v2281_v55, %v7931_v32 }
 0xf5a   :  { %v2289_v61 = vsel %vm512_vm8, %v2285_v60, -inf  ;;  %v2286_v62 = vadd.f32 %v2282_v58, %v7934_v38 }
 0xf5b   :  { %2290 = vmax.xlane.f32.xlu1 %v2289_v61 }
 0xf5c   :  { %v2292_v63 = vsel %vm512_vm8, %v2286_v62, -inf }
 0xf5d   :  { %2293 = vmax.xlane.f32.xlu0 %v2292_v63  ;;  %v2274_v0 = vpop.f32.mrb[44].mxu0 }
 0xf5e   :  { %v2283_v1 = vmul.f32 0.25, %v2274_v0  ;;  %v6982_v3 = vpop.f32.mrb[45].mxu0 }
 0xf5f   :  { %v2277_v4 = vpop.f32.mrb[46].mxu0 }
 0xf60   :  { %v2284_v5 = vmul.f32 0.25, %v2277_v4  ;;  %v6983_v6 = vpop.f32.mrb[47].mxu0  ;;  %v2287_v44 = vadd.f32 %v2283_v1, %v7931_v32  ;;  %v2499_v1 = vld [vmem:[%s9076_s8 + $0x2] ss:$0 sm:$0xff] }
 0xf62   :  { %v2295_v46 = vsel %vm512_vm8, %v2287_v44, -inf  ;;  %v2288_v47 = vadd.f32 %v2284_v5, %v7934_v38 }
 0xf63   :  { %2296 = vmax.xlane.f32.xlu1 %v2295_v46 }
 0xf64   :  { %v2298_v7 = vsel %vm512_vm8, %v2288_v47, -inf }
 0xf65   :  { %2299 = vmax.xlane.f32.xlu0 %v2298_v7 }
 0xfe8   :  { %v2291_v8 = vpop.xlane.xlu1 %2290 }
 0xfe9   :  { %v2301_v9 = vsub.f32 %v2285_v60, %v2291_v8 }
 0xfea   :  { %v2294_v10 = vpop.xlane.xlu0 %2293 }
 0xfeb   :  { %v2305_v23 = vmul.f32 1.442695, %v2301_v9  ;;  %v2302_v11 = vsub.f32 %v2286_v62, %v2294_v10 }
 0xfed   :  { %7540 = vpow2.f32 %v2305_v23  ;;  %v2307_v39 = vmul.f32 1.442695, %v2302_v11 }
 0xfef   :  { %7542 = vpow2.f32 %v2307_v39 }
 0xff0   :  { %v2297_v16 = vpop.xlane.xlu1 %2296 }
 0xff1   :  { %v2303_v42 = vsub.f32 %v2287_v44, %v2297_v16 }
 0xff2   :  { %v2300_v12 = vpop.xlane.xlu0 %2299 }
 0xff3   :  { %v2309_v14 = vmul.f32 1.442695, %v2303_v42  ;;  %v2304_v15 = vsub.f32 %v2288_v47, %v2300_v12 }
 0xff5   :  { %7544 = vpow2.f32 %v2309_v14  ;;  %v2311_v18 = vmul.f32 1.442695, %v2304_v15 }
 0xff7   :  { %v7541_v19 = vpop.eup %7540  ;;  %7546 = vpow2.f32 %v2311_v18 }
 0xff8   :  { %v2313_v20 = vsel %vm512_vm8, %v7541_v19, 0.0 }
 0xff9   :  { %v7543_v21 = vpop.eup %7542  ;;  %2314 = vadd.xlane.f32.xlu1 %v2313_v20 }
 0xffa   :  { %v2316_v22 = vsel %vm512_vm8, %v7543_v21, 0.0 }
 0xffb   :  { %2317 = vadd.xlane.f32.xlu0 %v2316_v22 }
 0xfff   :  { %v7545_v25 = vpop.eup %7544 }
0x1000   :  { %v2319_v26 = vsel %vm512_vm8, %v7545_v25, 0.0 }
0x1001   :  { %v7547_v29 = vpop.eup %7546  ;;  %2320 = vadd.xlane.f32.xlu1 %v2319_v26 }
0x1002   :  { %v2322_v30 = vsel %vm512_vm8, %v7547_v29, 0.0 }
0x1003   :  { %2323 = vadd.xlane.f32.xlu0 %v2322_v30 }
0x1086   :  { %v2315_v34 = vpop.xlane.xlu1 %2314 }
0x1087   :  { %7548 = vrcp.f32 %v2315_v34 }
0x1088   :  { %v2318_v13 = vpop.xlane.xlu0 %2317 }
0x1089   :  { %7550 = vrcp.f32 %v2318_v13 }
0x108e   :  { %v2321_v33 = vpop.xlane.xlu1 %2320 }
0x108f   :  { %7552 = vrcp.f32 %v2321_v33 }
0x1090   :  { %v2324_v35 = vpop.xlane.xlu0 %2323 }
0x1091   :  { %v7549_v36 = vpop.eup %7548  ;;  %7554 = vrcp.f32 %v2324_v35  ;;  %v7374_v35 = vld [vmem:[%s9073_s5 + $0x4] ss:$8 sps:$4 sm:$0xff]  }
0x1092   :  { %v2329_v40 = vmul.f32 %v7549_v36, %v7541_v19  ;;  %v7372_v36 = vld [vmem:[%s9073_s5] ss:$8 sps:$4 sm:$0xff]   ;;  %2635 = vmatprep.subr.bf16.mxu1 %v7374_v35  ;;  %v7399_v35 = vld [vmem:[%s9074_s6 + $0x38] sm:$0xff]  }
0x1093   :  { %v7551_v37 = vpop.eup %7550 }
0x1094   :  { %v2330_v43 = vmul.f32 %v7551_v37, %v7543_v21  ;;  %v7377_v37 = vld [vmem:[%s9073_s5 + $0x14] ss:$8 sps:$4 sm:$0xff]  }
0x1096   :  { %v2333_v45 = vpack.c.bf16 %v2330_v43, %v2329_v40  ;;  %v7375_v40 = vld [vmem:[%s9073_s5 + $0x10] ss:$8 sps:$4 sm:$0xff]   ;;  %v7380_v43 = vld [vmem:[%s9073_s5 + $0x24] ss:$8 sps:$4 sm:$0xff]  }
0x1098   :  { %6987 = vmatmul.mubr.msk.bf16.vlgmr.msra.gmra.mrb[64].mxu1 %vm512_vm8, %v2333_v45  ;;  %v7378_v45 = vld [vmem:[%s9073_s5 + $0x20] ss:$8 sps:$4 sm:$0xff]  }
0x1099   :  { %v7553_v48 = vpop.eup %7552  ;;  %2667 = vmatprep.mubr.bf16.mxu1 %v7708_v2  ;;  %2636 = vmatpush1.bf16.msra.mxu1 %v7372_v36  ;;  %v2581_v36 = vsub.s32 0, %v7925_v17 }
0x109a   :  { %v2331_v50 = vmul.f32 %v7553_v48, %v7545_v25  ;;  %2637 = vmatprep.subr.bf16.mxu1 %v7377_v37  ;;  %v7383_v48 = vld [vmem:[%s9073_s5 + $0x34] ss:$8 sps:$4 sm:$0xff]   ;;  %v6092_v37 = vld [vmem:[%s9076_s8 + $0x5] ss:$8 sm:$0x3] }
0x109b   :  { %v7555_v49 = vpop.eup %7554 }
0x109c   :  { %v2332_v51 = vmul.f32 %v7555_v49, %v7547_v29  ;;  %v7381_v49 = vld [vmem:[%s9073_s5 + $0x30] ss:$8 sps:$4 sm:$0xff]  }
0x109d   :  { %2638 = vmatpush1.bf16.msra.mxu1 %v7375_v40  ;;  %v2585_v40 = vsub.s32 1, %v7925_v17 }
0x109e   :  { %v2334_v52 = vpack.c.bf16 %v2332_v51, %v2331_v50  ;;  %2639 = vmatprep.subr.bf16.mxu1 %v7380_v43  ;;  %v2582_v43 = vrot.slane %v6092_v37, %v2581_v36 }
0x10a0   :  { %6993 = vmatmul.mubr.msk.bf16.vlgmr.msra.gmra.mrb[48].mxu0 %vm512_vm8, %v2334_v52 }
0x10a1   :  { %6997 = vmatpush3.bf16.msra.mxu0 %v7371_v53  ;;  %2640 = vmatpush1.bf16.msra.mxu1 %v7378_v45  ;;  %v2586_v45 = vrot.slane %v6092_v37, %v2585_v40 }
0x10a2   :  { %2641 = vmatprep.subr.bf16.mxu1 %v7383_v48 }
0x10a5   :  { %2642 = vmatpush1.bf16.msra.mxu1 %v7381_v49 }
0x116b   :  { %v2374_v54 = vpop.f32.mrb[64].mxu1 }
0x116c   :  { %v6988_v55 = vpop.f32.mrb[65].mxu1 }
0x116d   :  { %v2377_v56 = vpop.f32.mrb[66].mxu1 }
0x116e   :  { %v2425_v57 = vpack.c.bf16 %v2377_v56, %v2374_v54  ;;  %v6989_v58 = vpop.f32.mrb[67].mxu1 }
0x1170   :  { %6998 = vmatprep.mubr.msk.bf16.mxu0 %vm512_vm8, %v2425_v57 }
0x1173   :  { %v2418_v59 = vpop.f32.mrb[48].mxu0 }
0x1174   :  { %v6994_v60 = vpop.f32.mrb[49].mxu0 }
0x1175   :  { %v2421_v61 = vpop.f32.mrb[50].mxu0 }
0x1176   :  { %v2426_v62 = vpack.c.bf16 %v2421_v61, %v2418_v59  ;;  %v6995_v63 = vpop.f32.mrb[51].mxu0 }
0x1177   :  { %v2504_v63 = vld [vmem:[%s9076_s8 + $0x3] ss:$0 sm:$0xff] }
0x1178   :  { %6999 = vmatmul.mubr.msk.bf16.vlgmr.msra.gmra.mrb[20].mxu0 %vm512_vm8, %v2426_v62 }
0x124b   :  { %v7000_v0 = vpop.f32.mrb[20].mxu0 }
0x124c   :  { %v2476_v3 = vpop.f32.mrb[21].mxu0  ;;  %v2497_v4 = vadd.f32 %v7000_v0, %v7819_v27 }
0x124d   :  { %v2495_v5 = vadd.f32 %v2476_v3, %v7817_v24  ;;  %v7001_v6 = vpop.f32.mrb[22].mxu0 }
0x124e   :  { %v2479_v44 = vpop.f32.mrb[23].mxu0  ;;  %v2498_v47 = vadd.f32 %v7001_v6, %v7827_v31  ;;  %v8258_v8 = vadd.f32 %v2499_v1, %v2497_v4  ;;  %v2505_v6 = vld [vmem:[%s9076_s8 + $0x4] ss:$0 sm:$0xff] }
0x124f   :  { %v8254_v46 = vadd.f32 %v2499_v1, %v2495_v5  ;;  %v2496_v7 = vadd.f32 %v2479_v44, %v7821_v28 }
0x1250   :  { %v8264_v23 = vadd.f32 %v2499_v1, %v2498_v47  ;;  %v2512_v27 = vsel %vm190_vm6, %v8258_v8, 0.0 }
0x1251   :  { %v8260_v9 = vadd.f32 %v2499_v1, %v2496_v7  ;;  %v2506_v10 = vsel %vm190_vm6, %v8254_v46, 0.0 }
0x1252   :  { %2507 = vadd.xlane.f32.xlu1 %v2506_v10  ;;  %v2515_v28 = vsel %vm190_vm6, %v8264_v23, 0.0 }
0x1253   :  { %v2509_v24 = vsel %vm190_vm6, %v8260_v9, 0.0 }
0x1254   :  { %2510 = vadd.xlane.f32.xlu0 %v2509_v24 }
0x1256   :  { %2513 = vadd.xlane.f32.xlu1 %v2512_v27 }
0x1258   :  { %2516 = vadd.xlane.f32.xlu0 %v2515_v28 }
0x12df   :  { %v2508_v31 = vpop.xlane.xlu1 %2507 }
0x12e0   :  { %v2518_v11 = vmul.f32 0.015625, %v2508_v31 }
0x12e1   :  { %v2511_v39 = vpop.xlane.xlu0 %2510 }
0x12e2   :  { %v2522_v16 = vsub.f32 %v8254_v46, %v2518_v11  ;;  %v2519_v42 = vmul.f32 0.015625, %v2511_v39 }
0x12e3   :  { %v2514_v12 = vpop.xlane.xlu1 %2513 }
0x12e4   :  { %v2523_v14 = vsub.f32 %v8260_v9, %v2519_v42  ;;  %v2520_v15 = vmul.f32 0.015625, %v2514_v12  ;;  %v2526_v18 = vmul.f32 %v2522_v16, %v2522_v16  ;;  %v7384_v12 = vld [vmem:[%s9074_s6 + $0x40] sm:$0xff]  }
0x12e5   :  { %v2517_v19 = vpop.xlane.xlu0 %2516  ;;  %6540 = vmatprep.subr.bf16.mxu0 %v7384_v12 }
0x12e6   :  { %v2524_v20 = vsub.f32 %v8258_v8, %v2520_v15  ;;  %v2521_v21 = vmul.f32 0.015625, %v2517_v19  ;;  %v2530_v22 = vsel %vm190_vm6, %v2526_v18, 0.0  ;;  %v2527_v25 = vmul.f32 %v2523_v14, %v2523_v14  ;;  %v7386_v15 = vld [vmem:[%s9074_s6 + $0x48] sm:$0xff]   ;;  %v7388_v19 = vld [vmem:[%s9074_s6 + $0x50] sm:$0xff]  }
0x12e7   :  { %2531 = vadd.xlane.f32.xlu1 %v2530_v22  ;;  %v7387_v18 = vld [vmem:[%s9074_s6 + $0x8] sm:$0xff]   ;;  %v7391_v22 = vld [vmem:[%s9074_s6 + $0x18] sm:$0xff]  }
0x12e8   :  { %v2525_v26 = vsub.f32 %v8264_v23, %v2521_v21  ;;  %v2533_v29 = vsel %vm190_vm6, %v2527_v25, 0.0  ;;  %v2528_v30 = vmul.f32 %v2524_v20, %v2524_v20  ;;  %v7390_v21 = vld [vmem:[%s9074_s6 + $0x58] sm:$0xff]   ;;  %v7392_v25 = vld [vmem:[%s9074_s6 + $0x60] sm:$0xff]  }
0x12e9   :  { %2534 = vadd.xlane.f32.xlu0 %v2533_v29  ;;  %v7394_v29 = vld [vmem:[%s9074_s6 + $0x68] sm:$0xff]  }
0x12ea   :  { %v2536_v34 = vsel %vm190_vm6, %v2528_v30, 0.0  ;;  %v2529_v13 = vmul.f32 %v2525_v26, %v2525_v26  ;;  %v7395_v30 = vld [vmem:[%s9074_s6 + $0x28] sm:$0xff]  }
0x12eb   :  { %2537 = vadd.xlane.f32.xlu1 %v2536_v34  ;;  %v7396_v34 = vld [vmem:[%s9074_s6 + $0x70] sm:$0xff]  }
0x12ec   :  { %v2539_v33 = vsel %vm190_vm6, %v2529_v13, 0.0  ;;  %v7397_v13 = vld [vmem:[%s9074_s6 + $0x30] sm:$0xff]  }
0x12ed   :  { %2540 = vadd.xlane.f32.xlu0 %v2539_v33  ;;  %v7398_v33 = vld [vmem:[%s9074_s6 + $0x78] sm:$0xff]  }
0x1374   :  { %v2532_v50 = vpop.xlane.xlu1 %2531 }
0x1375   :  { %v2542_v51 = vmul.f32 0.015625, %v2532_v50 }
0x1376   :  { %v2535_v52 = vpop.xlane.xlu0 %2534 }
0x1377   :  { %v2546_v53 = vadd.f32 1e-05, %v2542_v51  ;;  %v2543_v54 = vmul.f32 0.015625, %v2535_v52 }
0x1378   :  { %v2538_v55 = vpop.xlane.xlu1 %2537 }
0x1379   :  { %7556 = vrsqrt.f32 %v2546_v53  ;;  %v2547_v56 = vadd.f32 1e-05, %v2543_v54  ;;  %v2544_v57 = vmul.f32 0.015625, %v2538_v55 }
0x137a   :  { %v2541_v58 = vpop.xlane.xlu0 %2540 }
0x137b   :  { %7558 = vrsqrt.f32 %v2547_v56  ;;  %v2548_v59 = vadd.f32 1e-05, %v2544_v57  ;;  %v2545_v60 = vmul.f32 0.015625, %v2541_v58 }
0x137d   :  { %7560 = vrsqrt.f32 %v2548_v59  ;;  %v2549_v61 = vadd.f32 1e-05, %v2545_v60 }
0x137f   :  { %7562 = vrsqrt.f32 %v2549_v61 }
0x1383   :  { %v7557_v62 = vpop.eup %7556 }
0x1384   :  { %v2554_v0 = vmul.f32 %v7557_v62, %v2522_v16 }
0x1385   :  { %v7559_v1 = vpop.eup %7558 }
0x1386   :  { %v2558_v3 = vmul.f32 %v2554_v0, %v2504_v63  ;;  %v2555_v4 = vmul.f32 %v7559_v1, %v2523_v14  ;;  %v7385_v14 = vld [vmem:[%s9074_s6] sm:$0xff]  }
0x1387   :  { %v7561_v5 = vpop.eup %7560  ;;  %6541 = vmatpush3.bf16.msra.mxu0 %v7385_v14 }
0x1388   :  { %v2559_v44 = vmul.f32 %v2555_v4, %v2504_v63  ;;  %v2556_v7 = vmul.f32 %v7561_v5, %v2524_v20  ;;  %v2562_v24 = vadd.f32 %v2558_v3, %v2505_v6  ;;  %6542 = vmatprep.subr.bf16.mxu0 %v7386_v15  ;;  %v7389_v20 = vld [vmem:[%s9074_s6 + $0x10] sm:$0xff]  }
0x1389   :  { %v7563_v47 = vpop.eup %7562 }
0x138a   :  { %v2557_v10 = vmul.f32 %v7563_v47, %v2525_v26  ;;  %v2563_v27 = vadd.f32 %v2559_v44, %v2505_v6  ;;  %v2560_v11 = vmul.f32 %v2556_v7, %v2504_v63  ;;  %v7393_v26 = vld [vmem:[%s9074_s6 + $0x20] sm:$0xff]  }
0x138b   :  { %6543 = vmatpush3.bf16.msra.mxu0 %v7387_v18 }
0x138c   :  { %v2566_v28 = vpack.c.bf16 %v2563_v27, %v2562_v24  ;;  %v2561_v31 = vmul.f32 %v2557_v10, %v2504_v63  ;;  %v2564_v16 = vadd.f32 %v2560_v11, %v2505_v6  ;;  %6544 = vmatprep.subr.bf16.mxu0 %v7388_v19 }
0x138e   :  { %6101 = vmatmul.mubr.msk.bf16.vlgmr.msra.gmra.mrb[68].mxu1 %vm190_vm6, %v2566_v28  ;;  %v2565_v39 = vadd.f32 %v2561_v31, %v2505_v6 }
0x138f   :  { %2677 = vmatprep.mubr.bf16.mxu1 %v7708_v2  ;;  %6545 = vmatpush3.bf16.msra.mxu0 %v7389_v20 }
0x1390   :  { %v2567_v42 = vpack.c.bf16 %v2565_v39, %v2564_v16  ;;  %6546 = vmatprep.subr.bf16.mxu0 %v7390_v21 }
0x1393   :  { %6547 = vmatpush3.bf16.msra.mxu0 %v7391_v22 }
0x1394   :  { %6548 = vmatprep.subr.bf16.mxu0 %v7392_v25 }
0x1396   :  { %6102 = vmatmul.mubr.msk.bf16.gmra.mrb[72].mxu1 %vm190_vm6, %v2567_v42 }
0x1397   :  { %6549 = vmatpush3.bf16.msra.mxu0 %v7393_v26 }
0x1398   :  { %6550 = vmatprep.subr.bf16.mxu0 %v7394_v29 }
0x139b   :  { %6551 = vmatpush3.bf16.msra.mxu0 %v7395_v30 }
0x139c   :  { %6552 = vmatprep.subr.bf16.mxu0 %v7396_v34 }
0x139f   :  { %6553 = vmatpush3.bf16.msra.mxu0 %v7397_v13 }
0x13a0   :  { %6554 = vmatprep.subr.bf16.mxu0 %v7398_v33 }
0x13a3   :  { %6555 = vmatpush3.bf16.msra.mxu0 %v7399_v35 }
0x1461   :  { %v2669_v48 = vpop.f32.mrb[68].mxu1 }
0x1462   :  { %v8370_v49 = vadd.f32 %v2669_v48, %v2582_v43  ;;  %v2671_v50 = vpop.f32.mrb[69].mxu1 }
0x1463   :  { %v8372_v51 = vadd.f32 %v2671_v50, %v2586_v45  ;;  %v2673_v52 = vpop.f32.mrb[70].mxu1 }
0x1464   :  { %v2696_v53 = vmul.f32 0.044715, %v8370_v49  ;;  %v8375_v54 = vadd.f32 %v2673_v52, %v2582_v43  ;;  %v2675_v55 = vpop.f32.mrb[71].mxu1 }
0x1465   :  { %v2697_v56 = vmul.f32 0.044715, %v8372_v51  ;;  %v8378_v57 = vadd.f32 %v2675_v55, %v2586_v45 }
0x1466   :  { %v2704_v58 = vmul.f32 %v2696_v53, %v8370_v49  ;;  %v2698_v59 = vmul.f32 0.044715, %v8375_v54 }
0x1467   :  { %v2705_v60 = vmul.f32 %v2697_v56, %v8372_v51  ;;  %v2699_v61 = vmul.f32 0.044715, %v8378_v57 }
0x1468   :  { %v2712_v62 = vmul.f32 %v2704_v58, %v8370_v49  ;;  %v2706_v63 = vmul.f32 %v2698_v59, %v8375_v54 }
0x1469   :  { %v2713_v0 = vmul.f32 %v2705_v60, %v8372_v51  ;;  %v2707_v1 = vmul.f32 %v2699_v61, %v8378_v57  ;;  %v2679_v3 = vpop.f32.mrb[72].mxu1  ;;  %v2688_v61 = vmul.f32 0.5, %v8370_v49 }
0x146a   :  { %v2720_v4 = vadd.f32 %v2712_v62, %v8370_v49  ;;  %v2714_v5 = vmul.f32 %v2706_v63, %v8375_v54  ;;  %v8390_v6 = vadd.f32 %v2679_v3, %v2582_v43  ;;  %v2681_v44 = vpop.f32.mrb[73].mxu1  ;;  %v2690_v62 = vmul.f32 0.5, %v8375_v54 }
0x146b   :  { %v2715_v47 = vmul.f32 %v2707_v1, %v8378_v57  ;;  %v8393_v7 = vadd.f32 %v2681_v44, %v2586_v45  ;;  %v2683_v10 = vpop.f32.mrb[74].mxu1  ;;  %v2721_v24 = vadd.f32 %v2713_v0, %v8372_v51  ;;  %v2689_v0 = vmul.f32 0.5, %v8372_v51 }
0x146c   :  { %v2728_v27 = vmul.f32 0.7978846, %v2720_v4  ;;  %v2722_v28 = vadd.f32 %v2714_v5, %v8375_v54  ;;  %v2700_v31 = vmul.f32 0.044715, %v8390_v6  ;;  %v2684_v11 = vadd.f32 %v2683_v10, %v2582_v43  ;;  %v2685_v39 = vpop.f32.mrb[75].mxu1 }
0x146d   :  { %v2701_v16 = vmul.f32 0.044715, %v8393_v7  ;;  %v2686_v42 = vadd.f32 %v2685_v39, %v2586_v45  ;;  %v2723_v12 = vadd.f32 %v2715_v47, %v8378_v57  ;;  %v2729_v14 = vmul.f32 0.7978846, %v2721_v24 }
0x146e   :  { %7564 = vtanh.f32 %v2728_v27  ;;  %v2730_v15 = vmul.f32 0.7978846, %v2722_v28  ;;  %v2708_v18 = vmul.f32 %v2700_v31, %v8390_v6  ;;  %v2702_v19 = vmul.f32 0.044715, %v2684_v11 }
0x146f   :  { %v2709_v20 = vmul.f32 %v2701_v16, %v8393_v7  ;;  %v2703_v21 = vmul.f32 0.044715, %v2686_v42  ;;  %v2731_v22 = vmul.f32 0.7978846, %v2723_v12  ;;  %7566 = vtanh.f32 %v2729_v14 }
0x1470   :  { %7568 = vtanh.f32 %v2730_v15  ;;  %v2716_v25 = vmul.f32 %v2708_v18, %v8390_v6  ;;  %v2710_v26 = vmul.f32 %v2702_v19, %v2684_v11  ;;  %v2691_v1 = vmul.f32 0.5, %v8378_v57 }
0x1471   :  { %v2717_v29 = vmul.f32 %v2709_v20, %v8393_v7  ;;  %v2711_v30 = vmul.f32 %v2703_v21, %v2686_v42  ;;  %7570 = vtanh.f32 %v2731_v22  ;;  %v2692_v54 = vmul.f32 0.5, %v8390_v6 }
0x1472   :  { %v2718_v34 = vmul.f32 %v2710_v26, %v2684_v11  ;;  %v2724_v13 = vadd.f32 %v2716_v25, %v8390_v6  ;;  %v2694_v51 = vmul.f32 0.5, %v2684_v11  ;;  %v2693_v57 = vmul.f32 0.5, %v8393_v7  ;;  %v2945_v6 = vld [vmem:[%s9076_s8 + $0x6] ss:$0 sm:$0xff] }
0x1473   :  { %v2719_v33 = vmul.f32 %v2711_v30, %v2686_v42  ;;  %v2725_v35 = vadd.f32 %v2717_v29, %v8393_v7  ;;  %v2695_v14 = vmul.f32 0.5, %v2686_v42 }
0x1474   :  { %v2726_v37 = vadd.f32 %v2718_v34, %v2684_v11  ;;  %v2732_v43 = vmul.f32 0.7978846, %v2724_v13 }
0x1475   :  { %v2727_v45 = vadd.f32 %v2719_v33, %v2686_v42  ;;  %v2733_v48 = vmul.f32 0.7978846, %v2725_v35 }
0x1476   :  { %v2734_v50 = vmul.f32 0.7978846, %v2726_v37  ;;  %7572 = vtanh.f32 %v2732_v43 }
0x1477   :  { %v2735_v52 = vmul.f32 0.7978846, %v2727_v45  ;;  %7574 = vtanh.f32 %v2733_v48 }
0x1478   :  { %v7565_v53 = vpop.eup %7564  ;;  %7576 = vtanh.f32 %v2734_v50 }
0x1479   :  { %v7567_v55 = vpop.eup %7566  ;;  %v2744_v56 = vadd.f32 1.0, %v7565_v53  ;;  %7578 = vtanh.f32 %v2735_v52 }
0x147a   :  { %v7569_v58 = vpop.eup %7568  ;;  %v2745_v59 = vadd.f32 1.0, %v7567_v55 }
0x147b   :  { %v7571_v60 = vpop.eup %7570  ;;  %v2746_v63 = vadd.f32 1.0, %v7569_v58  ;;  %v2752_v4 = vmul.f32 %v2744_v56, %v2688_v61 }
0x147c   :  { %v2747_v3 = vadd.f32 1.0, %v7571_v60  ;;  %v2753_v44 = vmul.f32 %v2745_v59, %v2689_v0 }
0x147d   :  { %v2754_v5 = vmul.f32 %v2746_v63, %v2690_v62 }
0x147e   :  { %v2755_v47 = vmul.f32 %v2747_v3, %v2691_v1 }
0x147f   :  { %v2760_v10 = vpack.c.bf16 %v2754_v5, %v2752_v4 }
0x1480   :  { %v7573_v24 = vpop.eup %7572  ;;  %v2761_v27 = vpack.c.bf16 %v2755_v47, %v2753_v44 }
0x1481   :  { %v7575_v28 = vpop.eup %7574  ;;  %v2748_v31 = vadd.f32 1.0, %v7573_v24 }
0x1482   :  { %v7577_v39 = vpop.eup %7576  ;;  %2924 = vmatprep.mubr.bf16.mxu0 %v2761_v27  ;;  %v2749_v49 = vadd.f32 1.0, %v7575_v28 }
0x1483   :  { %v7579_v16 = vpop.eup %7578  ;;  %2925 = vmatmul.mubr.bf16.vlgmr.msra.gmra.mrb[52].mxu0 %v2760_v10  ;;  %v2750_v12 = vadd.f32 1.0, %v7577_v39  ;;  %v2756_v18 = vmul.f32 %v2748_v31, %v2692_v54  ;;  %v7400_v54 = vld [vmem:[%s9071_s3 + $0x180] sm:$0xff]  }
0x1484   :  { %v2751_v15 = vadd.f32 1.0, %v7579_v16  ;;  %v2757_v20 = vmul.f32 %v2749_v49, %v2693_v57  ;;  %7002 = vmatprep.subr.bf16.mxu1 %v7400_v54  ;;  %v7403_v57 = vld [vmem:[%s9071_s3 + $0x288] sm:$0xff]  }
0x1485   :  { %v2758_v19 = vmul.f32 %v2750_v12, %v2694_v51  ;;  %v7401_v51 = vld [vmem:[%s9071_s3 + $0x280] sm:$0xff]   ;;  %7003 = vmatpush3.bf16.msra.mxu1 %v7400_v54  ;;  %v7402_v12 = vld [vmem:[%s9071_s3 + $0x188] sm:$0xff]  }
0x1486   :  { %v2759_v21 = vmul.f32 %v2751_v15, %v2695_v14  ;;  %7026 = vmatprep.subr.bf16.mxu0 %v7401_v51  ;;  %7004 = vmatprep.subr.bf16.mxu1 %v7402_v12  ;;  %v7404_v14 = vld [vmem:[%s9071_s3 + $0x190] sm:$0xff]  }
0x1487   :  { %v2762_v22 = vpack.c.bf16 %v2758_v19, %v2756_v18  ;;  %7027 = vmatpush3.bf16.msra.mxu0 %v7401_v51  ;;  %v7405_v15 = vld [vmem:[%s9071_s3 + $0x290] sm:$0xff]   ;;  %v7406_v18 = vld [vmem:[%s9071_s3 + $0x198] sm:$0xff]  }
0x1488   :  { %v2763_v25 = vpack.c.bf16 %v2759_v21, %v2757_v20  ;;  %7028 = vmatprep.subr.bf16.mxu0 %v7403_v57  ;;  %v7407_v19 = vld [vmem:[%s9071_s3 + $0x298] sm:$0xff]   ;;  %v7408_v20 = vld [vmem:[%s9071_s3 + $0x200] sm:$0xff]  }
0x1489   :  { %7005 = vmatpush3.bf16.msra.mxu1 %v7402_v12 }
0x148a   :  { %2932 = vmatprep.mubr.bf16.mxu0 %v2763_v25  ;;  %7006 = vmatprep.subr.bf16.mxu1 %v7404_v14 }
0x148b   :  { %2933 = vmatmul.mubr.bf16.gmra.mrb[56].mxu0 %v2762_v22 }
0x148c   :  { %7029 = vmatpush3.bf16.msra.mxu0 %v7403_v57 }
0x148d   :  { %7007 = vmatpush3.bf16.msra.mxu1 %v7404_v14  ;;  %7030 = vmatprep.subr.bf16.mxu0 %v7405_v15 }
0x148e   :  { %7008 = vmatprep.subr.bf16.mxu1 %v7406_v18 }
0x1490   :  { %7031 = vmatpush3.bf16.msra.mxu0 %v7405_v15 }
0x1491   :  { %7032 = vmatprep.subr.bf16.mxu0 %v7407_v19  ;;  %7009 = vmatpush3.bf16.msra.mxu1 %v7406_v18 }
0x1492   :  { %7014 = vmatprep.subr.bf16.mxu1 %v7408_v20 }
0x1494   :  { %7033 = vmatpush3.bf16.msra.mxu0 %v7407_v19 }
0x1495   :  { %7050 = vmatprep.subr.bf16.mxu0 %v7710_v41 }
0x1556   :  { %v6556_v26 = vpop.f32.mrb[52].mxu0 }
0x1557   :  { %v6557_v29 = vpop.f32.mrb[53].mxu0 }
0x1558   :  { %v6558_v30 = vadd.f32 %v6557_v29, %v6556_v26  ;;  %v6559_v34 = vpop.f32.mrb[54].mxu0 }
0x1559   :  { %v6560_v11 = vpop.f32.mrb[55].mxu0 }
0x155a   :  { %v2941_v7 = vadd.f32 %v6558_v30, %v8254_v46  ;;  %v6561_v42 = vadd.f32 %v6560_v11, %v6559_v34 }
0x155c   :  { %v8416_v13 = vadd.f32 %v2945_v6, %v2941_v7  ;;  %v2942_v33 = vadd.f32 %v6561_v42, %v8260_v9 }
0x155e   :  { %v8419_v35 = vadd.f32 %v2945_v6, %v2942_v33  ;;  %v6562_v37 = vpop.f32.mrb[56].mxu0  ;;  %v2953_v43 = vsel %vm190_vm6, %v8416_v13, 0.0 }
0x155f   :  { %2954 = vadd.xlane.f32.xlu1 %v2953_v43  ;;  %v6563_v45 = vpop.f32.mrb[57].mxu0  ;;  %v6119_v43 = vld [vmem:[%s9076_s8 + $0x30] ss:$0 sm:$0xff] }
0x1560   :  { %v6564_v48 = vadd.f32 %v6563_v45, %v6562_v37  ;;  %v6565_v50 = vpop.f32.mrb[58].mxu0  ;;  %v2956_v52 = vsel %vm190_vm6, %v8419_v35, 0.0 }
0x1561   :  { %2957 = vadd.xlane.f32.xlu0 %v2956_v52  ;;  %v6566_v46 = vpop.f32.mrb[59].mxu0 }
0x1562   :  { %v2943_v53 = vadd.f32 %v6564_v48, %v8258_v8  ;;  %v6567_v55 = vadd.f32 %v6566_v46, %v6565_v50  ;;  %v6120_v46 = vld [vmem:[%s9076_s8 + $0x31] ss:$0 sm:$0xff] }
0x1564   :  { %v8426_v56 = vadd.f32 %v2945_v6, %v2943_v53  ;;  %v2944_v9 = vadd.f32 %v6567_v55, %v8264_v23 }
0x1566   :  { %v8429_v58 = vadd.f32 %v2945_v6, %v2944_v9  ;;  %v2959_v59 = vsel %vm190_vm6, %v8426_v56, 0.0 }
0x1567   :  { %2960 = vadd.xlane.f32.xlu1 %v2959_v59 }
0x1568   :  { %v2962_v60 = vsel %vm190_vm6, %v8429_v58, 0.0 }
0x1569   :  { %2963 = vadd.xlane.f32.xlu0 %v2962_v60 }
0x15ec   :  { %v2955_v61 = vpop.xlane.xlu1 %2954 }
0x15ed   :  { %v2965_v62 = vmul.f32 0.015625, %v2955_v61 }
0x15ee   :  { %v2958_v63 = vpop.xlane.xlu0 %2957 }
0x15ef   :  { %v8436_v8 = vsub.f32 %v8416_v13, %v2965_v62  ;;  %v2966_v0 = vmul.f32 0.015625, %v2958_v63 }
0x15f1   :  { %v8439_v1 = vsub.f32 %v8419_v35, %v2966_v0  ;;  %v2973_v23 = vmul.f32 %v8436_v8, %v8436_v8 }
0x15f3   :  { %v2977_v3 = vsel %vm190_vm6, %v2973_v23, 0.0  ;;  %v2974_v4 = vmul.f32 %v8439_v1, %v8439_v1 }
0x15f4   :  { %2978 = vadd.xlane.f32.xlu1 %v2977_v3  ;;  %v2961_v5 = vpop.xlane.xlu1 %2960 }
0x15f5   :  { %v2967_v44 = vmul.f32 0.015625, %v2961_v5  ;;  %v2980_v47 = vsel %vm190_vm6, %v2974_v4, 0.0  ;;  %v7409_v4 = vld [vmem:[%s9071_s3 + $0x208] sm:$0xff]   ;;  %v7410_v5 = vld [vmem:[%s9071_s3 + $0x210] sm:$0xff]  }
0x15f6   :  { %2981 = vadd.xlane.f32.xlu0 %v2980_v47  ;;  %v2964_v10 = vpop.xlane.xlu0 %2963 }
0x15f7   :  { %v8448_v24 = vsub.f32 %v8426_v56, %v2967_v44  ;;  %v2968_v27 = vmul.f32 0.015625, %v2964_v10  ;;  %v7411_v44 = vld [vmem:[%s9071_s3 + $0x218] sm:$0xff]   ;;  %v6145_v10 = vld [vmem:[%s9076_s8 + $0x41] ss:$0 sm:$0xff] }
0x15f9   :  { %v8451_v28 = vsub.f32 %v8429_v58, %v2968_v27  ;;  %v2975_v31 = vmul.f32 %v8448_v24, %v8448_v24  ;;  %v6147_v27 = vld [vmem:[%s9076_s8 + $0x51] ss:$0 sm:$0xff] }
0x15fb   :  { %v2983_v39 = vsel %vm190_vm6, %v2975_v31, 0.0  ;;  %v2976_v49 = vmul.f32 %v8451_v28, %v8451_v28 }
0x15fc   :  { %2984 = vadd.xlane.f32.xlu1 %v2983_v39 }
0x15fd   :  { %v2986_v16 = vsel %vm190_vm6, %v2976_v49, 0.0 }
0x15fe   :  { %2987 = vadd.xlane.f32.xlu0 %v2986_v16 }
0x1681   :  { %v2979_v21 = vpop.xlane.xlu1 %2978 }
0x1682   :  { %v2989_v22 = vmul.f32 0.015625, %v2979_v21 }
0x1683   :  { %v2982_v25 = vpop.xlane.xlu0 %2981 }
0x1684   :  { %v2993_v26 = vadd.f32 1e-05, %v2989_v22  ;;  %v2990_v29 = vmul.f32 0.015625, %v2982_v25 }
0x1686   :  { %7580 = vrsqrt.f32 %v2993_v26  ;;  %v2994_v30 = vadd.f32 1e-05, %v2990_v29 }
0x1688   :  { %7582 = vrsqrt.f32 %v2994_v30  ;;  %v6146_v30 = vld [vmem:[%s9076_s8 + $0x45] ss:$0 sm:$0xff] }
0x1689   :  { %v2985_v34 = vpop.xlane.xlu1 %2984 }
0x168a   :  { %v2991_v6 = vmul.f32 0.015625, %v2985_v34 }
0x168b   :  { %v2988_v11 = vpop.xlane.xlu0 %2987 }
0x168c   :  { %v2995_v7 = vadd.f32 1e-05, %v2991_v6  ;;  %v2992_v42 = vmul.f32 0.015625, %v2988_v11 }
0x168e   :  { %7584 = vrsqrt.f32 %v2995_v7  ;;  %v2996_v33 = vadd.f32 1e-05, %v2992_v42 }
0x1690   :  { %v7581_v37 = vpop.eup %7580  ;;  %7586 = vrsqrt.f32 %v2996_v33 }
0x1691   :  { %v3001_v45 = vmul.f32 %v7581_v37, %v8436_v8 }
0x1692   :  { %v7583_v48 = vpop.eup %7582 }
0x1693   :  { %v3005_v50 = vmul.f32 %v6119_v43, %v3001_v45  ;;  %v3002_v52 = vmul.f32 %v7583_v48, %v8439_v1 }
0x1695   :  { %v3006_v53 = vmul.f32 %v6119_v43, %v3002_v52  ;;  %v3009_v55 = vadd.f32 %v6120_v46, %v3005_v50 }
0x1697   :  { %v3010_v9 = vadd.f32 %v6120_v46, %v3006_v53 }
0x1698   :  { %v7585_v59 = vpop.eup %7584 }
0x1699   :  { %v8495_v60 = vpack.c.bf16 %v3010_v9, %v3009_v55  ;;  %v3003_v61 = vmul.f32 %v7585_v59, %v8448_v24 }
0x169a   :  { %v7587_v62 = vpop.eup %7586 }
0x169b   :  { %v3007_v63 = vmul.f32 %v6119_v43, %v3003_v61  ;;  %v3004_v8 = vmul.f32 %v7587_v62, %v8451_v28  ;;  %7010 = vmatprep.mubr.msk.bf16.mxu1 %vm190_vm6, %v8495_v60  ;;  %7034 = vmatprep.mubr.msk.bf16.mxu0 %vm190_vm6, %v8495_v60 }
0x169d   :  { %v3008_v0 = vmul.f32 %v6119_v43, %v3004_v8  ;;  %v3011_v1 = vadd.f32 %v6120_v46, %v3007_v63 }
0x169f   :  { %v3012_v23 = vadd.f32 %v6120_v46, %v3008_v0 }
0x16a1   :  { %v8503_v3 = vpack.c.bf16 %v3012_v23, %v3011_v1 }
0x16a3   :  { %7011 = vmatmul.mubr.msk.bf16.vlgmr.msra.gmra.mrb[76].mxu1 %vm190_vm6, %v8503_v3  ;;  %7035 = vmatmul.mubr.msk.bf16.vlgmr.msra.gmra.mrb[60].mxu0 %vm190_vm6, %v8503_v3 }
0x16a4   :  { %7015 = vmatpush3.bf16.msra.mxu1 %v7408_v20  ;;  %7022 = vmatprep.mubr.msk.bf16.mxu1 %vm190_vm6, %v8495_v60 }
0x16a5   :  { %7016 = vmatprep.subr.bf16.mxu1 %v7409_v4  ;;  %7052 = vmatprep.mubr.msk.bf16.mxu0 %vm7711_vm7, %v7710_v41 }
0x16a8   :  { %7017 = vmatpush3.bf16.msra.mxu1 %v7409_v4 }
0x16a9   :  { %7018 = vmatprep.subr.bf16.mxu1 %v7410_v5 }
0x16ac   :  { %7019 = vmatpush3.bf16.msra.mxu1 %v7410_v5 }
0x16ad   :  { %7020 = vmatprep.subr.bf16.mxu1 %v7411_v44 }
0x16b0   :  { %7021 = vmatpush3.bf16.msra.mxu1 %v7411_v44 }
0x16b1   :  { %7038 = vmatprep.subr.bf16.mxu1 %v7710_v41 }
0x16b3   :  { %7023 = vmatmul.mubr.msk.bf16.vlgmr.msra.gmra.mrb[80].mxu1 %vm190_vm6, %v8503_v3 }
0x16b4   :  { %7040 = vmatprep.mubr.msk.bf16.mxu1 %vm7711_vm7, %v7710_v41 }
0x1776   :  { %v7012_v47 = vpop.f32.mrb[76].mxu1  ;;  %v7036_v24 = vpop.f32.mrb[60].mxu0 }
0x1777   :  { %v3109_v28 = vpop.f32.mrb[77].mxu1  ;;  %v3255_v31 = vpop.f32.mrb[61].mxu0  ;;  %v3118_v16 = vadd.f32 %v7012_v47, %v6145_v10  ;;  %v3264_v54 = vadd.f32 %v7036_v24, %v6147_v27 }
0x1778   :  { %v7013_v39 = vpop.f32.mrb[78].mxu1  ;;  %v7037_v49 = vpop.f32.mrb[62].mxu0  ;;  %v3110_v15 = vadd.f32 %v6145_v10, %v3109_v28  ;;  %v3256_v18 = vadd.f32 %v6147_v27, %v3255_v31 }
0x1779   :  { %v3121_v51 = vadd.f32 %v7013_v39, %v6145_v10  ;;  %v3267_v12 = vadd.f32 %v7037_v49, %v6147_v27  ;;  %v3112_v57 = vpop.f32.mrb[79].mxu1  ;;  %v3258_v14 = vpop.f32.mrb[63].mxu0 }
0x177a   :  { %v3113_v19 = vadd.f32 %v6145_v10, %v3112_v57  ;;  %v3259_v20 = vadd.f32 %v6147_v27, %v3258_v14 }
0x177b   :  { %v3271_v21 = vpack.c.bf16 %v3121_v51, %v3118_v16  ;;  %v3423_v22 = vpack.c.bf16 %v3267_v12, %v3264_v54 }
0x177c   :  { %v3270_v25 = vpack.c.bf16 %v3113_v19, %v3110_v15  ;;  %v3422_v26 = vpack.c.bf16 %v3259_v20, %v3256_v18 }
0x177e   :  { %7051 = vmatpush3.bf16.msra.mxu0 %v3422_v26 }
0x1786   :  { %v7024_v29 = vpop.f32.mrb[80].mxu1 }
0x1787   :  { %v3182_v34 = vpop.f32.mrb[81].mxu1  ;;  %v3191_v11 = vadd.f32 %v7024_v29, %v6146_v30 }
0x1788   :  { %v7025_v6 = vpop.f32.mrb[82].mxu1  ;;  %v3183_v33 = vadd.f32 %v6146_v30, %v3182_v34  ;;  %v7412_v34 = vld [vmem:[%s9071_s3 + $0x220] sm:$0xff]  }
0x1789   :  { %v3194_v7 = vadd.f32 %v7025_v6, %v6146_v30  ;;  %v3185_v42 = vpop.f32.mrb[83].mxu1  ;;  %v7413_v6 = vld [vmem:[%s9071_s3 + $0x1a0] sm:$0xff]  }
0x178a   :  { %v3186_v37 = vadd.f32 %v6146_v30, %v3185_v42  ;;  %7062 = vmatprep.subr.bf16.mxu0 %v7413_v6 }
0x178b   :  { %v3273_v43 = vpack.c.bf16 %v3194_v7, %v3191_v11 }
0x178c   :  { %v3272_v45 = vpack.c.bf16 %v3186_v37, %v3183_v33 }
0x178d   :  { %v3325_v50 = vsel %vm512_vm8, %v3273_v43, 0 }
0x178e   :  { %v3278_v48 = vsel %vm512_vm8, %v3272_v45, 0 }
0x178f   :  { %7039 = vmatpush3.bf16.xpose.msra.mxu1 %v3278_v48 }
0x1790   :  { %7044 = vmatprep.subr.bf16.mxu1 %v7710_v41 }
0x1796   :  { %7041 = vmatmul.mubr.msk.bf16.vlgmr.msra.gmra.mrb[84].mxu1 %vm512_vm8, %v3270_v25 }
0x1797   :  { %7045 = vmatpush3.bf16.xpose.msra.mxu1 %v3325_v50  ;;  %7046 = vmatprep.mubr.msk.bf16.mxu1 %vm7711_vm7, %v7710_v41 }
0x1798   :  { %7056 = vmatprep.subr.bf16.mxu1 %v7710_v41 }
0x179e   :  { %7047 = vmatmul.mubr.msk.bf16.vlgmr.msra.gmra.mrb[88].mxu1 %vm512_vm8, %v3271_v21 }
0x179f   :  { %7057 = vmatpush3.bf16.msra.mxu1 %v3423_v22  ;;  %7058 = vmatprep.mubr.msk.bf16.mxu1 %vm7711_vm7, %v7710_v41 }
0x17a0   :  { %7074 = vmatprep.subr.bf16.mxu1 %v7412_v34 }
0x1869   :  { %v3314_v52 = vpop.f32.mrb[84].mxu1 }
0x186a   :  { %v7042_v46 = vpop.f32.mrb[85].mxu1  ;;  %v3368_v59 = vmul.f32 0.25, %v3314_v52 }
0x186b   :  { %v3317_v53 = vpop.f32.mrb[86].mxu1  ;;  %v7414_v46 = vld [vmem:[%s9071_s3 + $0x228] sm:$0xff]  }
0x186c   :  { %v7043_v55 = vpop.f32.mrb[87].mxu1  ;;  %v3369_v8 = vmul.f32 0.25, %v3317_v53  ;;  %v3372_v44 = vadd.f32 %v3368_v59, %v7931_v32 }
0x186e   :  { %v3373_v10 = vadd.f32 %v3369_v8, %v7934_v38  ;;  %v3376_v24 = vsel %vm512_vm8, %v3372_v44, -inf  ;;  %v7418_v8 = vld [vmem:[%s9071_s3 + $0x238] sm:$0xff]  }
0x1870   :  { %v3379_v27 = vsel %vm512_vm8, %v3373_v10, -inf }
0x1871   :  { %v3361_v9 = vpop.f32.mrb[88].mxu1 }
0x1872   :  { %v3370_v61 = vmul.f32 0.25, %v3361_v9  ;;  %v7048_v62 = vpop.f32.mrb[89].mxu1 }
0x1873   :  { %v3364_v63 = vpop.f32.mrb[90].mxu1  ;;  %v7416_v62 = vld [vmem:[%s9071_s3 + $0x230] sm:$0xff]  }
0x1874   :  { %v3371_v0 = vmul.f32 0.25, %v3364_v63  ;;  %v7049_v1 = vpop.f32.mrb[91].mxu1  ;;  %v3374_v23 = vadd.f32 %v3370_v61, %v7931_v32  ;;  %v7415_v61 = vld [vmem:[%s9071_s3 + $0x1a8] sm:$0xff]   ;;  %v7417_v63 = vld [vmem:[%s9071_s3 + $0x1b0] sm:$0xff]  }
0x1875   :  { %v7420_v1 = vld [vmem:[%s9071_s3 + $0x2a0] sm:$0xff]  }
0x1876   :  { %v3382_v4 = vsel %vm512_vm8, %v3374_v23, -inf  ;;  %v3375_v5 = vadd.f32 %v3371_v0, %v7934_v38  ;;  %v7419_v0 = vld [vmem:[%s9071_s3 + $0x1b8] sm:$0xff]  }
0x1877   :  { %3383 = vmax.xlane.f32.xlu1 %v3382_v4  ;;  %v7422_v4 = vld [vmem:[%s9071_s3 + $0x2b0] sm:$0xff]  }
0x1878   :  { %v3385_v47 = vsel %vm512_vm8, %v3375_v5, -inf }
0x1879   :  { %3386 = vmax.xlane.f32.xlu0 %v3385_v47 }
0x187b   :  { %3377 = vmax.xlane.f32.xlu1 %v3376_v24 }
0x187d   :  { %3380 = vmax.xlane.f32.xlu0 %v3379_v27 }
0x1904   :  { %v3384_v28 = vpop.xlane.xlu1 %3383 }
0x1905   :  { %v3390_v31 = vsub.f32 %v3374_v23, %v3384_v28  ;;  %v7421_v23 = vld [vmem:[%s9071_s3 + $0x2a8] sm:$0xff]  }
0x1906   :  { %v3387_v39 = vpop.xlane.xlu0 %3386 }
0x1907   :  { %v3396_v49 = vmul.f32 1.442695, %v3390_v31  ;;  %v3391_v16 = vsub.f32 %v3375_v5, %v3387_v39  ;;  %v7423_v5 = vld [vmem:[%s9071_s3 + $0x2b8] sm:$0xff]  }
0x1908   :  { %v3378_v54 = vpop.xlane.xlu1 %3377 }
0x1909   :  { %7588 = vpow2.f32 %v3396_v49  ;;  %v3398_v51 = vmul.f32 1.442695, %v3391_v16  ;;  %v3388_v12 = vsub.f32 %v3372_v44, %v3378_v54 }
0x190a   :  { %v3381_v57 = vpop.xlane.xlu0 %3380 }
0x190b   :  { %7590 = vpow2.f32 %v3398_v51  ;;  %v3392_v14 = vmul.f32 1.442695, %v3388_v12  ;;  %v3389_v15 = vsub.f32 %v3373_v10, %v3381_v57  ;;  %v6197_v51 = vld [vmem:[%s9076_s8 + $0x46] ss:$0 sm:$0xff] }
0x190d   :  { %7592 = vpow2.f32 %v3392_v14  ;;  %v3394_v18 = vmul.f32 1.442695, %v3389_v15 }
0x190f   :  { %7594 = vpow2.f32 %v3394_v18 }
0x1913   :  { %v7589_v19 = vpop.eup %7588 }
0x1914   :  { %v3406_v20 = vsel %vm512_vm8, %v7589_v19, 0.0 }
0x1915   :  { %v7591_v21 = vpop.eup %7590  ;;  %3407 = vadd.xlane.f32.xlu1 %v3406_v20 }
0x1916   :  { %v3409_v22 = vsel %vm512_vm8, %v7591_v21, 0.0 }
0x1917   :  { %v7593_v25 = vpop.eup %7592  ;;  %3410 = vadd.xlane.f32.xlu0 %v3409_v22  ;;  %v6196_v22 = vld [vmem:[%s9076_s8 + $0x42] ss:$0 sm:$0xff] }
0x1918   :  { %v3400_v26 = vsel %vm512_vm8, %v7593_v25, 0.0 }
0x1919   :  { %v7595_v29 = vpop.eup %7594  ;;  %3401 = vadd.xlane.f32.xlu1 %v3400_v26 }
0x191a   :  { %v3403_v30 = vsel %vm512_vm8, %v7595_v29, 0.0 }
0x191b   :  { %3404 = vadd.xlane.f32.xlu0 %v3403_v30 }
0x19a2   :  { %v3408_v11 = vpop.xlane.xlu1 %3407 }
0x19a3   :  { %7596 = vrcp.f32 %v3408_v11 }
0x19a4   :  { %v3411_v7 = vpop.xlane.xlu0 %3410 }
0x19a5   :  { %7598 = vrcp.f32 %v3411_v7 }
0x19a6   :  { %v3402_v42 = vpop.xlane.xlu1 %3401 }
0x19a7   :  { %7600 = vrcp.f32 %v3402_v42 }
0x19a8   :  { %v3405_v33 = vpop.xlane.xlu0 %3404 }
0x19a9   :  { %7602 = vrcp.f32 %v3405_v33 }
0x19ad   :  { %v7597_v37 = vpop.eup %7596 }
0x19ae   :  { %v3418_v45 = vmul.f32 %v7597_v37, %v7589_v19 }
0x19af   :  { %v7599_v43 = vpop.eup %7598 }
0x19b0   :  { %v3419_v48 = vmul.f32 %v7599_v43, %v7591_v21 }
0x19b1   :  { %v7601_v50 = vpop.eup %7600 }
0x19b2   :  { %v3421_v52 = vpack.c.bf16 %v3419_v48, %v3418_v45  ;;  %v3416_v55 = vmul.f32 %v7601_v50, %v7593_v25  ;;  %v6198_v50 = vld [vmem:[%s9076_s8 + $0x52] ss:$0 sm:$0xff] }
0x19b3   :  { %v7603_v53 = vpop.eup %7602 }
0x19b4   :  { %v3417_v9 = vmul.f32 %v7603_v53, %v7595_v29  ;;  %7059 = vmatmul.mubr.msk.bf16.vlgmr.msra.gmra.mrb[92].mxu1 %vm512_vm8, %v3421_v52 }
0x19b5   :  { %7075 = vmatpush3.bf16.msra.mxu1 %v7412_v34  ;;  %7082 = vmatprep.mubr.msk.bf16.mxu1 %vm190_vm6, %v8495_v60 }
0x19b6   :  { %7076 = vmatprep.subr.bf16.mxu1 %v7414_v46  ;;  %v3420_v59 = vpack.c.bf16 %v3417_v9, %v3416_v55 }
0x19b8   :  { %7053 = vmatmul.mubr.msk.bf16.vlgmr.msra.gmra.mrb[64].mxu0 %vm512_vm8, %v3420_v59 }
0x19b9   :  { %7063 = vmatpush3.bf16.msra.mxu0 %v7413_v6  ;;  %7077 = vmatpush3.bf16.msra.mxu1 %v7414_v46 }
0x19ba   :  { %7070 = vmatprep.mubr.msk.bf16.mxu0 %vm190_vm6, %v8495_v60  ;;  %7064 = vmatprep.subr.bf16.mxu0 %v7415_v61 }
0x19bb   :  { %7078 = vmatprep.subr.bf16.mxu1 %v7416_v62 }
0x19bd   :  { %7065 = vmatpush3.bf16.msra.mxu0 %v7415_v61  ;;  %7079 = vmatpush3.bf16.msra.mxu1 %v7416_v62 }
0x19be   :  { %7066 = vmatprep.subr.bf16.mxu0 %v7417_v63  ;;  %7080 = vmatprep.subr.bf16.mxu1 %v7418_v8 }
0x19c1   :  { %7067 = vmatpush3.bf16.msra.mxu0 %v7417_v63  ;;  %7081 = vmatpush3.bf16.msra.mxu1 %v7418_v8 }
0x19c2   :  { %7068 = vmatprep.subr.bf16.mxu0 %v7419_v0  ;;  %7098 = vmatprep.subr.bf16.mxu1 %v7710_v41 }
0x19c4   :  { %7083 = vmatmul.mubr.msk.bf16.vlgmr.msra.gmra.mrb[96].mxu1 %vm190_vm6, %v8503_v3 }
0x19c5   :  { %7069 = vmatpush3.bf16.msra.mxu0 %v7419_v0  ;;  %7100 = vmatprep.mubr.msk.bf16.mxu1 %vm7711_vm7, %v7710_v41 }
0x19c6   :  { %7086 = vmatprep.subr.bf16.mxu0 %v7420_v1 }
0x19c8   :  { %7071 = vmatmul.mubr.msk.bf16.vlgmr.msra.gmra.mrb[68].mxu0 %vm190_vm6, %v8503_v3 }
0x19c9   :  { %7087 = vmatpush3.bf16.msra.mxu0 %v7420_v1  ;;  %7094 = vmatprep.mubr.msk.bf16.mxu0 %vm190_vm6, %v8495_v60 }
0x19ca   :  { %7088 = vmatprep.subr.bf16.mxu0 %v7421_v23 }
0x19cd   :  { %7089 = vmatpush3.bf16.msra.mxu0 %v7421_v23 }
0x19ce   :  { %7090 = vmatprep.subr.bf16.mxu0 %v7422_v4 }
0x19d1   :  { %7091 = vmatpush3.bf16.msra.mxu0 %v7422_v4 }
0x19d2   :  { %7092 = vmatprep.subr.bf16.mxu0 %v7423_v5 }
0x19d5   :  { %7093 = vmatpush3.bf16.msra.mxu0 %v7423_v5 }
0x19d6   :  { %7110 = vmatprep.subr.bf16.mxu0 %v7710_v41 }
0x19d8   :  { %7095 = vmatmul.mubr.msk.bf16.vlgmr.msra.gmra.mrb[72].mxu0 %vm190_vm6, %v8503_v3 }
0x19d9   :  { %7112 = vmatprep.mubr.msk.bf16.mxu0 %vm7711_vm7, %v7710_v41 }
0x1a87   :  { %v8614_v44 = vpop.f32.mrb[92].mxu1 }
0x1a88   :  { %v7060_v47 = vpop.f32.mrb[93].mxu1 }
0x1a89   :  { %v8616_v10 = vpop.f32.mrb[94].mxu1 }
0x1a8a   :  { %v3513_v24 = vpack.c.bf16 %v8616_v10, %v8614_v44  ;;  %v7061_v27 = vpop.f32.mrb[95].mxu1  ;;  %v7437_v44 = vld [vmem:[%s9071_s3 + $0x258] sm:$0xff]  }
0x1a8b   :  { %v8620_v28 = vpop.f32.mrb[64].mxu0 }
0x1a8c   :  { %v7054_v31 = vpop.f32.mrb[65].mxu0 }
0x1a8d   :  { %v8622_v39 = vpop.f32.mrb[66].mxu0 }
0x1a8e   :  { %v3512_v49 = vpack.c.bf16 %v8622_v39, %v8620_v28  ;;  %v7055_v16 = vpop.f32.mrb[67].mxu0 }
0x1a97   :  { %v7084_v54 = vpop.f32.mrb[96].mxu1 }
0x1a98   :  { %v3678_v12 = vpop.f32.mrb[97].mxu1  ;;  %v3687_v14 = vadd.f32 %v7084_v54, %v6197_v51 }
0x1a99   :  { %v7085_v57 = vpop.f32.mrb[98].mxu1  ;;  %v3679_v19 = vadd.f32 %v6197_v51, %v3678_v12 }
0x1a9a   :  { %v3690_v15 = vadd.f32 %v7085_v57, %v6197_v51  ;;  %v3681_v18 = vpop.f32.mrb[99].mxu1 }
0x1a9b   :  { %v3682_v20 = vadd.f32 %v6197_v51, %v3681_v18  ;;  %v7072_v21 = vpop.f32.mrb[68].mxu0 }
0x1a9c   :  { %v3769_v25 = vpack.c.bf16 %v3690_v15, %v3687_v14  ;;  %v3605_v26 = vpop.f32.mrb[69].mxu0  ;;  %v3614_v34 = vadd.f32 %v7072_v21, %v6196_v22 }
0x1a9d   :  { %v3768_v29 = vpack.c.bf16 %v3682_v20, %v3679_v19  ;;  %v7073_v30 = vpop.f32.mrb[70].mxu0  ;;  %v3606_v7 = vadd.f32 %v6196_v22, %v3605_v26 }
0x1a9e   :  { %v3617_v6 = vadd.f32 %v7073_v30, %v6196_v22  ;;  %v3608_v11 = vpop.f32.mrb[71].mxu0  ;;  %v3821_v45 = vsel %vm512_vm8, %v3769_v25, 0 }
0x1a9f   :  { %v3609_v42 = vadd.f32 %v6196_v22, %v3608_v11  ;;  %v3774_v33 = vsel %vm512_vm8, %v3768_v29, 0 }
0x1aa0   :  { %v3767_v37 = vpack.c.bf16 %v3617_v6, %v3614_v34  ;;  %7099 = vmatpush3.bf16.xpose.msra.mxu1 %v3774_v33 }
0x1aa1   :  { %v3766_v43 = vpack.c.bf16 %v3609_v42, %v3606_v7  ;;  %7104 = vmatprep.subr.bf16.mxu1 %v7710_v41 }
0x1aa7   :  { %7101 = vmatmul.mubr.msk.bf16.vlgmr.msra.gmra.mrb[100].mxu1 %vm512_vm8, %v3766_v43 }
0x1aa8   :  { %7105 = vmatpush3.bf16.xpose.msra.mxu1 %v3821_v45  ;;  %7106 = vmatprep.mubr.msk.bf16.mxu1 %vm7711_vm7, %v7710_v41 }
0x1aa9   :  { %7116 = vmatprep.subr.bf16.mxu1 %v7710_v41 }
0x1aab   :  { %v7096_v48 = vpop.f32.mrb[72].mxu0 }
0x1aac   :  { %v3751_v52 = vpop.f32.mrb[73].mxu0  ;;  %v3760_v53 = vadd.f32 %v7096_v48, %v6198_v50 }
0x1aad   :  { %v7097_v46 = vpop.f32.mrb[74].mxu0  ;;  %v3752_v59 = vadd.f32 %v6198_v50, %v3751_v52 }
0x1aae   :  { %v3763_v55 = vadd.f32 %v7097_v46, %v6198_v50  ;;  %v3754_v9 = vpop.f32.mrb[75].mxu0 }
0x1aaf   :  { %v3755_v61 = vadd.f32 %v6198_v50, %v3754_v9  ;;  %7107 = vmatmul.mubr.msk.bf16.vlgmr.msra.gmra.mrb[104].mxu1 %vm512_vm8, %v3767_v37  ;;  %v7424_v9 = vld [vmem:[%s9071_s3 + $0x1c0] sm:$0xff]  }
0x1ab0   :  { %v3919_v62 = vpack.c.bf16 %v3763_v55, %v3760_v53  ;;  %7118 = vmatprep.mubr.msk.bf16.mxu1 %vm7711_vm7, %v7710_v41 }
0x1ab1   :  { %v3918_v63 = vpack.c.bf16 %v3755_v61, %v3752_v59 }
0x1ab2   :  { %7117 = vmatpush3.bf16.msra.mxu1 %v3919_v62 }
0x1ab3   :  { %7111 = vmatpush3.bf16.msra.mxu0 %v3918_v63  ;;  %7134 = vmatprep.subr.bf16.mxu1 %v7424_v9 }
0x1b7a   :  { %v3810_v8 = vpop.f32.mrb[100].mxu1 }
0x1b7b   :  { %v3864_v0 = vmul.f32 0.25, %v3810_v8  ;;  %v7102_v1 = vpop.f32.mrb[101].mxu1 }
0x1b7c   :  { %v3813_v23 = vpop.f32.mrb[102].mxu1 }
0x1b7d   :  { %v3865_v4 = vmul.f32 0.25, %v3813_v23  ;;  %v7103_v5 = vpop.f32.mrb[103].mxu1  ;;  %v3868_v47 = vadd.f32 %v3864_v0, %v7931_v32 }
0x1b7f   :  { %v3872_v27 = vsel %vm512_vm8, %v3868_v47, -inf  ;;  %v3869_v31 = vadd.f32 %v3865_v4, %v7934_v38 }
0x1b80   :  { %3873 = vmax.xlane.f32.xlu1 %v3872_v27 }
0x1b81   :  { %v3875_v16 = vsel %vm512_vm8, %v3869_v31, -inf }
0x1b82   :  { %3876 = vmax.xlane.f32.xlu0 %v3875_v16  ;;  %v3857_v54 = vpop.f32.mrb[104].mxu1 }
0x1b83   :  { %v3866_v51 = vmul.f32 0.25, %v3857_v54  ;;  %v7108_v12 = vpop.f32.mrb[105].mxu1  ;;  %v7425_v54 = vld [vmem:[%s9071_s3 + $0x1c8] sm:$0xff]  }
0x1b84   :  { %v3860_v57 = vpop.f32.mrb[106].mxu1  ;;  %v7427_v12 = vld [vmem:[%s9071_s3 + $0x1d8] sm:$0xff]  }
0x1b85   :  { %v3867_v14 = vmul.f32 0.25, %v3860_v57  ;;  %v7109_v15 = vpop.f32.mrb[107].mxu1  ;;  %v3870_v18 = vadd.f32 %v3866_v51, %v7931_v32  ;;  %v7426_v51 = vld [vmem:[%s9071_s3 + $0x1d0] sm:$0xff]   ;;  %v7428_v57 = vld [vmem:[%s9071_s3 + $0x2c0] sm:$0xff]  }
0x1b86   :  { %v7430_v15 = vld [vmem:[%s9071_s3 + $0x2d0] sm:$0xff]  }
0x1b87   :  { %v3878_v19 = vsel %vm512_vm8, %v3870_v18, -inf  ;;  %v3871_v20 = vadd.f32 %v3867_v14, %v7934_v38  ;;  %v7429_v14 = vld [vmem:[%s9071_s3 + $0x2c8] sm:$0xff]  }
0x1b88   :  { %3879 = vmax.xlane.f32.xlu1 %v3878_v19  ;;  %v7432_v19 = vld [vmem:[%s9072_s4 + $0x28] sm:$0xff]  }
0x1b89   :  { %v3881_v21 = vsel %vm512_vm8, %v3871_v20, -inf  ;;  %7122 = vmatprep.subr.bf16.mxu0 %v7432_v19 }
0x1b8a   :  { %3882 = vmax.xlane.f32.xlu0 %v3881_v21 }
0x1c0d   :  { %v3874_v22 = vpop.xlane.xlu1 %3873 }
0x1c0e   :  { %v3884_v25 = vsub.f32 %v3868_v47, %v3874_v22 }
0x1c0f   :  { %v3877_v26 = vpop.xlane.xlu0 %3876 }
0x1c10   :  { %v3888_v29 = vmul.f32 1.442695, %v3884_v25  ;;  %v3885_v30 = vsub.f32 %v3869_v31, %v3877_v26 }
0x1c12   :  { %7604 = vpow2.f32 %v3888_v29  ;;  %v3890_v34 = vmul.f32 1.442695, %v3885_v30 }
0x1c14   :  { %7606 = vpow2.f32 %v3890_v34 }
0x1c15   :  { %v3880_v6 = vpop.xlane.xlu1 %3879 }
0x1c16   :  { %v3886_v11 = vsub.f32 %v3870_v18, %v3880_v6  ;;  %v7431_v18 = vld [vmem:[%s9071_s3 + $0x2d8] sm:$0xff]  }
0x1c17   :  { %v3883_v7 = vpop.xlane.xlu0 %3882 }
0x1c18   :  { %v3892_v42 = vmul.f32 1.442695, %v3886_v11  ;;  %v3887_v33 = vsub.f32 %v3871_v20, %v3883_v7  ;;  %v7433_v20 = vld [vmem:[%s9072_s4 + $0x20] sm:$0xff]  }
0x1c1a   :  { %7608 = vpow2.f32 %v3892_v42  ;;  %v3894_v37 = vmul.f32 1.442695, %v3887_v33  ;;  %v7434_v42 = vld [vmem:[%s9071_s3 + $0x240] sm:$0xff]   ;;  %v7435_v33 = vld [vmem:[%s9071_s3 + $0x248] sm:$0xff]  }
0x1c1c   :  { %v7605_v43 = vpop.eup %7604  ;;  %7610 = vpow2.f32 %v3894_v37 }
0x1c1d   :  { %v3896_v45 = vsel %vm512_vm8, %v7605_v43, 0.0 }
0x1c1e   :  { %v7607_v48 = vpop.eup %7606  ;;  %3897 = vadd.xlane.f32.xlu1 %v3896_v45 }
0x1c1f   :  { %v3899_v50 = vsel %vm512_vm8, %v7607_v48, 0.0 }
0x1c20   :  { %3900 = vadd.xlane.f32.xlu0 %v3899_v50  ;;  %v7436_v50 = vld [vmem:[%s9071_s3 + $0x250] sm:$0xff]  }
0x1c24   :  { %v7609_v52 = vpop.eup %7608 }
0x1c25   :  { %v3902_v46 = vsel %vm512_vm8, %v7609_v52, 0.0 }
0x1c26   :  { %v7611_v53 = vpop.eup %7610  ;;  %3903 = vadd.xlane.f32.xlu1 %v3902_v46 }
0x1c27   :  { %v3905_v55 = vsel %vm512_vm8, %v7611_v53, 0.0 }
0x1c28   :  { %3906 = vadd.xlane.f32.xlu0 %v3905_v55 }
0x1cab   :  { %v3898_v59 = vpop.xlane.xlu1 %3897 }
0x1cac   :  { %7612 = vrcp.f32 %v3898_v59 }
0x1cad   :  { %v3901_v61 = vpop.xlane.xlu0 %3900 }
0x1cae   :  { %7614 = vrcp.f32 %v3901_v61 }
0x1cb3   :  { %v3904_v62 = vpop.xlane.xlu1 %3903 }
0x1cb4   :  { %7616 = vrcp.f32 %v3904_v62 }
0x1cb5   :  { %v3907_v63 = vpop.xlane.xlu0 %3906 }
0x1cb6   :  { %v7613_v8 = vpop.eup %7612  ;;  %7618 = vrcp.f32 %v3907_v63 }
0x1cb7   :  { %v3912_v1 = vmul.f32 %v7613_v8, %v7605_v43  ;;  %v6253_v43 = vld [vmem:[%s9076_s8 + $0x43] ss:$0 sm:$0xff] }
0x1cb8   :  { %v7615_v0 = vpop.eup %7614 }
0x1cb9   :  { %v3913_v23 = vmul.f32 %v7615_v0, %v7607_v48 }
0x1cbb   :  { %v3916_v4 = vpack.c.bf16 %v3913_v23, %v3912_v1 }
0x1cbd   :  { %7113 = vmatmul.mubr.msk.bf16.vlgmr.msra.gmra.mrb[76].mxu0 %vm512_vm8, %v3916_v4 }
0x1cbe   :  { %v7617_v5 = vpop.eup %7616  ;;  %7123 = vmatpush3.bf16.msra.mxu0 %v7432_v19 }
0x1cbf   :  { %v3914_v27 = vmul.f32 %v7617_v5, %v7609_v52  ;;  %7128 = vmatprep.subr.bf16.mxu0 %v7433_v20  ;;  %v6254_v5 = vld [vmem:[%s9076_s8 + $0x47] ss:$0 sm:$0xff] }
0x1cc0   :  { %v7619_v47 = vpop.eup %7618 }
0x1cc1   :  { %v3915_v31 = vmul.f32 %v7619_v47, %v7611_v53 }
0x1cc3   :  { %v3917_v16 = vpack.c.bf16 %v3915_v31, %v3914_v27 }
0x1cc5   :  { %7119 = vmatmul.mubr.msk.bf16.vlgmr.msra.gmra.mrb[108].mxu1 %vm512_vm8, %v3917_v16 }
0x1cc6   :  { %7135 = vmatpush3.bf16.msra.mxu1 %v7424_v9  ;;  %7142 = vmatprep.mubr.msk.bf16.mxu1 %vm190_vm6, %v8495_v60 }
0x1cc7   :  { %7136 = vmatprep.subr.bf16.mxu1 %v7425_v54 }
0x1cca   :  { %7137 = vmatpush3.bf16.msra.mxu1 %v7425_v54 }
0x1ccb   :  { %7138 = vmatprep.subr.bf16.mxu1 %v7426_v51 }
0x1cce   :  { %7139 = vmatpush3.bf16.msra.mxu1 %v7426_v51 }
0x1ccf   :  { %7140 = vmatprep.subr.bf16.mxu1 %v7427_v12 }
0x1cd2   :  { %7141 = vmatpush3.bf16.msra.mxu1 %v7427_v12 }
0x1cd3   :  { %7158 = vmatprep.subr.bf16.mxu1 %v7428_v57 }
0x1cd5   :  { %7143 = vmatmul.mubr.msk.bf16.vlgmr.msra.gmra.mrb[112].mxu1 %vm190_vm6, %v8503_v3 }
0x1cd6   :  { %7159 = vmatpush3.bf16.msra.mxu1 %v7428_v57  ;;  %7166 = vmatprep.mubr.msk.bf16.mxu1 %vm190_vm6, %v8495_v60 }
0x1cd7   :  { %7160 = vmatprep.subr.bf16.mxu1 %v7429_v14 }
0x1cda   :  { %7161 = vmatpush3.bf16.msra.mxu1 %v7429_v14 }
0x1cdb   :  { %7162 = vmatprep.subr.bf16.mxu1 %v7430_v15 }
0x1cde   :  { %7163 = vmatpush3.bf16.msra.mxu1 %v7430_v15 }
0x1cdf   :  { %7164 = vmatprep.subr.bf16.mxu1 %v7431_v18 }
0x1ce2   :  { %7165 = vmatpush3.bf16.msra.mxu1 %v7431_v18 }
0x1ce3   :  { %7176 = vmatprep.subr.bf16.mxu1 %v7710_v41 }
0x1ce5   :  { %7167 = vmatmul.mubr.msk.bf16.vlgmr.msra.gmra.mrb[116].mxu1 %vm190_vm6, %v8503_v3 }
0x1ce6   :  { %7178 = vmatprep.mubr.msk.bf16.mxu1 %vm7711_vm7, %v7710_v41 }
0x1d90   :  { %v3957_v21 = vpop.f32.mrb[76].mxu0 }
0x1d91   :  { %v7114_v22 = vpop.f32.mrb[77].mxu0 }
0x1d92   :  { %v3960_v25 = vpop.f32.mrb[78].mxu0 }
0x1d93   :  { %v4008_v26 = vpack.c.bf16 %v3960_v25, %v3957_v21  ;;  %v7115_v29 = vpop.f32.mrb[79].mxu0 }
0x1d95   :  { %7124 = vmatprep.mubr.msk.bf16.mxu0 %vm512_vm8, %v4008_v26 }
0x1d98   :  { %v4001_v30 = vpop.f32.mrb[108].mxu1 }
0x1d99   :  { %v7120_v34 = vpop.f32.mrb[109].mxu1 }
0x1d9a   :  { %v4004_v6 = vpop.f32.mrb[110].mxu1 }
0x1d9b   :  { %v4009_v11 = vpack.c.bf16 %v4004_v6, %v4001_v30  ;;  %v7121_v7 = vpop.f32.mrb[111].mxu1 }
0x1d9d   :  { %7125 = vmatmul.mubr.msk.bf16.vlgmr.msra.gmra.mrb[80].mxu0 %vm512_vm8, %v4009_v11 }
0x1d9e   :  { %7129 = vmatpush3.bf16.msra.mxu0 %v7433_v20  ;;  %7130 = vmatprep.mubr.msk.bf16.mxu0 %vm512_vm8, %v3512_v49 }
0x1d9f   :  { %7146 = vmatprep.subr.bf16.mxu0 %v7434_v42 }
0x1da8   :  { %v7144_v37 = vpop.f32.mrb[112].mxu1 }
0x1da9   :  { %v4223_v45 = vpop.f32.mrb[113].mxu1  ;;  %7131 = vmatmul.mubr.msk.bf16.vlgmr.msra.gmra.mrb[80].mxu0 %vm512_vm8, %v3513_v24  ;;  %v4232_v28 = vadd.f32 %v7144_v37, %v6253_v43  ;;  %v6255_v24 = vld [vmem:[%s9076_s8 + $0x53] ss:$0 sm:$0xff] }
0x1daa   :  { %v7145_v48 = vpop.f32.mrb[114].mxu1  ;;  %7147 = vmatpush3.bf16.msra.mxu0 %v7434_v42  ;;  %7154 = vmatprep.mubr.msk.bf16.mxu0 %vm190_vm6, %v8495_v60  ;;  %v4224_v52 = vadd.f32 %v6253_v43, %v4223_v45 }
0x1dab   :  { %v4235_v39 = vadd.f32 %v7145_v48, %v6253_v43  ;;  %v4226_v49 = vpop.f32.mrb[115].mxu1  ;;  %7148 = vmatprep.subr.bf16.mxu0 %v7435_v33 }
0x1dac   :  { %v4227_v46 = vadd.f32 %v6253_v43, %v4226_v49 }
0x1dad   :  { %v4385_v53 = vpack.c.bf16 %v4235_v39, %v4232_v28 }
0x1dae   :  { %v4384_v55 = vpack.c.bf16 %v4227_v46, %v4224_v52  ;;  %7149 = vmatpush3.bf16.msra.mxu0 %v7435_v33 }
0x1daf   :  { %7150 = vmatprep.subr.bf16.mxu0 %v7436_v50 }
0x1db2   :  { %7151 = vmatpush3.bf16.msra.mxu0 %v7436_v50 }
0x1db3   :  { %7152 = vmatprep.subr.bf16.mxu0 %v7437_v44 }
0x1db6   :  { %7153 = vmatpush3.bf16.msra.mxu0 %v7437_v44 }
0x1db7   :  { %7170 = vmatprep.subr.bf16.mxu0 %v7710_v41 }
0x1db8   :  { %v7168_v10 = vpop.f32.mrb[116].mxu1 }
0x1db9   :  { %7155 = vmatmul.mubr.msk.bf16.vlgmr.msra.gmra.mrb[84].mxu0 %vm190_vm6, %v8503_v3  ;;  %v4369_v9 = vpop.f32.mrb[117].mxu1  ;;  %v4378_v61 = vadd.f32 %v7168_v10, %v6255_v24 }
0x1dba   :  { %v7169_v59 = vpop.f32.mrb[118].mxu1  ;;  %7172 = vmatprep.mubr.msk.bf16.mxu0 %vm7711_vm7, %v7710_v41  ;;  %v4370_v8 = vadd.f32 %v6255_v24, %v4369_v9 }
0x1dbb   :  { %v4381_v62 = vadd.f32 %v7169_v59, %v6255_v24  ;;  %v4372_v63 = vpop.f32.mrb[119].mxu1 }
0x1dbc   :  { %v4373_v0 = vadd.f32 %v6255_v24, %v4372_v63 }
0x1dbd   :  { %v4537_v1 = vpack.c.bf16 %v4381_v62, %v4378_v61 }
0x1dbe   :  { %v4536_v23 = vpack.c.bf16 %v4373_v0, %v4370_v8 }
0x1e8c   :  { %v7156_v4 = vpop.f32.mrb[84].mxu0 }
0x1e8d   :  { %v4296_v47 = vpop.f32.mrb[85].mxu0  ;;  %v4305_v31 = vadd.f32 %v7156_v4, %v6254_v5 }
0x1e8e   :  { %v7157_v27 = vpop.f32.mrb[86].mxu0  ;;  %v4297_v51 = vadd.f32 %v6254_v5, %v4296_v47  ;;  %v7438_v47 = vld [vmem:[%s9071_s3 + $0x1e0] sm:$0xff]  }
0x1e8f   :  { %v4308_v16 = vadd.f32 %v7157_v27, %v6254_v5  ;;  %v4299_v54 = vpop.f32.mrb[87].mxu0 }
0x1e90   :  { %v4300_v12 = vadd.f32 %v6254_v5, %v4299_v54 }
0x1e91   :  { %v4387_v57 = vpack.c.bf16 %v4308_v16, %v4305_v31 }
0x1e92   :  { %v4386_v14 = vpack.c.bf16 %v4300_v12, %v4297_v51 }
0x1e93   :  { %v4439_v15 = vsel %vm512_vm8, %v4387_v57, 0 }
0x1e94   :  { %7177 = vmatpush3.bf16.xpose.msra.mxu1 %v4439_v15  ;;  %v4392_v18 = vsel %vm512_vm8, %v4386_v14, 0 }
0x1e95   :  { %7171 = vmatpush3.bf16.xpose.msra.mxu0 %v4392_v18  ;;  %7188 = vmatprep.subr.bf16.mxu1 %v7710_v41 }
0x1e96   :  { %7182 = vmatprep.subr.bf16.mxu0 %v7710_v41 }
0x1e9b   :  { %7179 = vmatmul.mubr.msk.bf16.vlgmr.msra.gmra.mrb[120].mxu1 %vm512_vm8, %v4385_v53 }
0x1e9c   :  { %7173 = vmatmul.mubr.msk.bf16.vlgmr.msra.gmra.mrb[88].mxu0 %vm512_vm8, %v4384_v55  ;;  %7189 = vmatpush3.bf16.msra.mxu1 %v4537_v1 }
0x1e9d   :  { %7183 = vmatpush3.bf16.msra.mxu0 %v4536_v23  ;;  %7184 = vmatprep.mubr.msk.bf16.mxu0 %vm7711_vm7, %v7710_v41 }
0x1e9e   :  { %7190 = vmatprep.mubr.msk.bf16.mxu1 %vm7711_vm7, %v7710_v41  ;;  %7200 = vmatprep.subr.bf16.mxu1 %v7438_v47 }
0x1f6e   :  { %v4475_v19 = vpop.f32.mrb[120].mxu1 }
0x1f6f   :  { %v4428_v20 = vpop.f32.mrb[88].mxu0  ;;  %v7180_v21 = vpop.f32.mrb[121].mxu1  ;;  %v4484_v22 = vmul.f32 0.25, %v4475_v19 }
0x1f70   :  { %v4482_v25 = vmul.f32 0.25, %v4428_v20  ;;  %v7174_v26 = vpop.f32.mrb[89].mxu0  ;;  %v4478_v29 = vpop.f32.mrb[122].mxu1 }
0x1f71   :  { %v4431_v30 = vpop.f32.mrb[90].mxu0  ;;  %v7181_v34 = vpop.f32.mrb[123].mxu1  ;;  %v4485_v6 = vmul.f32 0.25, %v4478_v29  ;;  %v4488_v43 = vadd.f32 %v4484_v22, %v7931_v32  ;;  %v7440_v26 = vld [vmem:[%s9071_s3 + $0x1f0] sm:$0xff]   ;;  %v7441_v29 = vld [vmem:[%s9071_s3 + $0x1f8] sm:$0xff]  }
0x1f72   :  { %v4483_v11 = vmul.f32 0.25, %v4431_v30  ;;  %v7175_v7 = vpop.f32.mrb[91].mxu0  ;;  %v4486_v42 = vadd.f32 %v4482_v25, %v7931_v32  ;;  %v7439_v25 = vld [vmem:[%s9071_s3 + $0x1e8] sm:$0xff]   ;;  %v7442_v30 = vld [vmem:[%s9071_s3 + $0x2e0] sm:$0xff]  }
0x1f73   :  { %v4489_v48 = vadd.f32 %v4485_v6, %v7934_v38  ;;  %v4496_v28 = vsel %vm512_vm8, %v4488_v43, -inf  ;;  %v7443_v34 = vld [vmem:[%s9071_s3 + $0x2e8] sm:$0xff]   ;;  %v7444_v6 = vld [vmem:[%s9071_s3 + $0x2f0] sm:$0xff]  }
0x1f74   :  { %v4490_v33 = vsel %vm512_vm8, %v4486_v42, -inf  ;;  %v4487_v37 = vadd.f32 %v4483_v11, %v7934_v38  ;;  %v7445_v11 = vld [vmem:[%s9071_s3 + $0x2f8] sm:$0xff]   ;;  %v7446_v7 = vld [vmem:[%s9072_s4 + $0x30] sm:$0xff]  }
0x1f75   :  { %4491 = vmax.xlane.f32.xlu1 %v4490_v33  ;;  %v4499_v39 = vsel %vm512_vm8, %v4489_v48, -inf  ;;  %7194 = vmatprep.subr.bf16.mxu0 %v7446_v7 }
0x1f76   :  { %v4493_v45 = vsel %vm512_vm8, %v4487_v37, -inf }
0x1f77   :  { %4494 = vmax.xlane.f32.xlu0 %v4493_v45 }
0x1f79   :  { %4497 = vmax.xlane.f32.xlu1 %v4496_v28 }
0x1f7b   :  { %4500 = vmax.xlane.f32.xlu0 %v4499_v39 }
0x2002   :  { %v4492_v49 = vpop.xlane.xlu1 %4491 }
0x2003   :  { %v4502_v50 = vsub.f32 %v4486_v42, %v4492_v49  ;;  %v7447_v42 = vld [vmem:[%s9071_s3 + $0x260] sm:$0xff]  }
0x2004   :  { %v4495_v52 = vpop.xlane.xlu0 %4494 }
0x2005   :  { %v4506_v46 = vmul.f32 1.442695, %v4502_v50  ;;  %v4503_v53 = vsub.f32 %v4487_v37, %v4495_v52 }
0x2006   :  { %v4498_v55 = vpop.xlane.xlu1 %4497 }
0x2007   :  { %7620 = vpow2.f32 %v4506_v46  ;;  %v4508_v44 = vmul.f32 1.442695, %v4503_v53  ;;  %v4504_v10 = vsub.f32 %v4488_v43, %v4498_v55  ;;  %v7448_v46 = vld [vmem:[%s9071_s3 + $0x268] sm:$0xff]   ;;  %v7449_v53 = vld [vmem:[%s9071_s3 + $0x270] sm:$0xff]   ;;  %v7450_v55 = vld [vmem:[%s9071_s3 + $0x278] sm:$0xff]  }
0x2008   :  { %v4501_v24 = vpop.xlane.xlu0 %4500 }
0x2009   :  { %7622 = vpow2.f32 %v4508_v44  ;;  %v4510_v9 = vmul.f32 1.442695, %v4504_v10  ;;  %v4505_v59 = vsub.f32 %v4489_v48, %v4501_v24  ;;  %v6307_v10 = vld [vmem:[%s9076_s8 + $0x44] ss:$0 sm:$0xff] }
0x200b   :  { %7624 = vpow2.f32 %v4510_v9  ;;  %v4512_v61 = vmul.f32 1.442695, %v4505_v59 }
0x200d   :  { %7626 = vpow2.f32 %v4512_v61 }
0x2011   :  { %v7621_v62 = vpop.eup %7620 }
0x2012   :  { %v4514_v63 = vsel %vm512_vm8, %v7621_v62, 0.0 }
0x2013   :  { %v7623_v8 = vpop.eup %7622  ;;  %4515 = vadd.xlane.f32.xlu1 %v4514_v63 }
0x2014   :  { %v4517_v0 = vsel %vm512_vm8, %v7623_v8, 0.0 }
0x2015   :  { %v7625_v1 = vpop.eup %7624  ;;  %4518 = vadd.xlane.f32.xlu0 %v4517_v0 }
0x2016   :  { %v4520_v23 = vsel %vm512_vm8, %v7625_v1, 0.0 }
0x2017   :  { %v7627_v4 = vpop.eup %7626  ;;  %4521 = vadd.xlane.f32.xlu1 %v4520_v23 }
0x2018   :  { %v4523_v5 = vsel %vm512_vm8, %v7627_v4, 0.0 }
0x2019   :  { %4524 = vadd.xlane.f32.xlu0 %v4523_v5 }
0x20a0   :  { %v4516_v27 = vpop.xlane.xlu1 %4515 }
0x20a1   :  { %7628 = vrcp.f32 %v4516_v27 }
0x20a2   :  { %v4519_v31 = vpop.xlane.xlu0 %4518 }
0x20a3   :  { %7630 = vrcp.f32 %v4519_v31 }
0x20a4   :  { %v4522_v16 = vpop.xlane.xlu1 %4521 }
0x20a5   :  { %7632 = vrcp.f32 %v4522_v16 }
0x20a6   :  { %v4525_v54 = vpop.xlane.xlu0 %4524 }
0x20a7   :  { %7634 = vrcp.f32 %v4525_v54 }
0x20ab   :  { %v7629_v51 = vpop.eup %7628 }
0x20ac   :  { %v4530_v57 = vmul.f32 %v7629_v51, %v7621_v62 }
0x20ad   :  { %v7631_v12 = vpop.eup %7630 }
0x20ae   :  { %v4531_v14 = vmul.f32 %v7631_v12, %v7623_v8 }
0x20af   :  { %v7633_v15 = vpop.eup %7632 }
0x20b0   :  { %v4534_v18 = vpack.c.bf16 %v4531_v14, %v4530_v57  ;;  %v4532_v20 = vmul.f32 %v7633_v15, %v7625_v1  ;;  %v6309_v1 = vld [vmem:[%s9076_s8 + $0x54] ss:$0 sm:$0xff]  ;;  %v6308_v57 = vld [vmem:[%s9076_s8 + $0x50] ss:$0 sm:$0xff] }
0x20b1   :  { %v7635_v19 = vpop.eup %7634 }
0x20b2   :  { %v4533_v21 = vmul.f32 %v7635_v19, %v7627_v4  ;;  %7185 = vmatmul.mubr.msk.bf16.vlgmr.msra.gmra.mrb[92].mxu0 %vm512_vm8, %v4534_v18 }
0x20b3   :  { %7195 = vmatpush3.bf16.msra.mxu0 %v7446_v7 }
0x20b4   :  { %v4535_v22 = vpack.c.bf16 %v4533_v21, %v4532_v20  ;;  %7212 = vmatprep.subr.bf16.mxu0 %v7447_v42 }
0x20b6   :  { %7191 = vmatmul.mubr.msk.bf16.vlgmr.msra.gmra.mrb[124].mxu1 %vm512_vm8, %v4535_v22 }
0x20b7   :  { %7201 = vmatpush3.bf16.msra.mxu1 %v7438_v47  ;;  %7208 = vmatprep.mubr.msk.bf16.mxu1 %vm190_vm6, %v8495_v60 }
0x20b8   :  { %7202 = vmatprep.subr.bf16.mxu1 %v7439_v25 }
0x20bb   :  { %7203 = vmatpush3.bf16.msra.mxu1 %v7439_v25 }
0x20bc   :  { %7204 = vmatprep.subr.bf16.mxu1 %v7440_v26 }
0x20bf   :  { %7205 = vmatpush3.bf16.msra.mxu1 %v7440_v26 }
0x20c0   :  { %7206 = vmatprep.subr.bf16.mxu1 %v7441_v29 }
0x20c3   :  { %7207 = vmatpush3.bf16.msra.mxu1 %v7441_v29 }
0x20c4   :  { %7224 = vmatprep.subr.bf16.mxu1 %v7442_v30 }
0x20c6   :  { %7209 = vmatmul.mubr.msk.bf16.vlgmr.msra.gmra.mrb[128].mxu1 %vm190_vm6, %v8503_v3 }
0x20c7   :  { %7225 = vmatpush3.bf16.msra.mxu1 %v7442_v30  ;;  %7232 = vmatprep.mubr.msk.bf16.mxu1 %vm190_vm6, %v8495_v60 }
0x20c8   :  { %7226 = vmatprep.subr.bf16.mxu1 %v7443_v34 }
0x20cb   :  { %7227 = vmatpush3.bf16.msra.mxu1 %v7443_v34 }
0x20cc   :  { %7228 = vmatprep.subr.bf16.mxu1 %v7444_v6 }
0x20cf   :  { %7229 = vmatpush3.bf16.msra.mxu1 %v7444_v6 }
0x20d0   :  { %7230 = vmatprep.subr.bf16.mxu1 %v7445_v11 }
0x20d3   :  { %7231 = vmatpush3.bf16.msra.mxu1 %v7445_v11 }
0x20d4   :  { %7248 = vmatprep.subr.bf16.mxu1 %v7710_v41 }
0x20d6   :  { %7233 = vmatmul.mubr.msk.bf16.vlgmr.msra.gmra.mrb[132].mxu1 %vm190_vm6, %v8503_v3 }
0x20d7   :  { %7250 = vmatprep.mubr.msk.bf16.mxu1 %vm7711_vm7, %v7710_v41 }
0x2185   :  { %v4575_v33 = vpop.f32.mrb[92].mxu0 }
0x2186   :  { %v7186_v37 = vpop.f32.mrb[93].mxu0 }
0x2187   :  { %v4578_v43 = vpop.f32.mrb[94].mxu0 }
0x2188   :  { %v4626_v45 = vpack.c.bf16 %v4578_v43, %v4575_v33  ;;  %v7187_v48 = vpop.f32.mrb[95].mxu0 }
0x2189   :  { %v4619_v28 = vpop.f32.mrb[124].mxu1 }
0x218a   :  { %v7192_v39 = vpop.f32.mrb[125].mxu1  ;;  %7196 = vmatprep.mubr.msk.bf16.mxu0 %vm512_vm8, %v4626_v45 }
0x218b   :  { %v4622_v49 = vpop.f32.mrb[126].mxu1 }
0x218c   :  { %v4627_v50 = vpack.c.bf16 %v4622_v49, %v4619_v28  ;;  %v7193_v52 = vpop.f32.mrb[127].mxu1 }
0x218e   :  { %7197 = vmatmul.mubr.msk.bf16.vlgmr.msra.gmra.mrb[80].mxu0 %vm512_vm8, %v4627_v50 }
0x218f   :  { %7213 = vmatpush3.bf16.msra.mxu0 %v7447_v42  ;;  %7220 = vmatprep.mubr.msk.bf16.mxu0 %vm190_vm6, %v8495_v60 }
0x2190   :  { %7214 = vmatprep.subr.bf16.mxu0 %v7448_v46 }
0x2193   :  { %7215 = vmatpush3.bf16.msra.mxu0 %v7448_v46 }
0x2194   :  { %7216 = vmatprep.subr.bf16.mxu0 %v7449_v53 }
0x2197   :  { %7217 = vmatpush3.bf16.msra.mxu0 %v7449_v53 }
0x2198   :  { %7218 = vmatprep.subr.bf16.mxu0 %v7450_v55 }
0x2199   :  { %v7210_v44 = vpop.f32.mrb[128].mxu1 }
0x219a   :  { %v4784_v24 = vpop.f32.mrb[129].mxu1  ;;  %v4793_v9 = vadd.f32 %v7210_v44, %v6307_v10 }
0x219b   :  { %v7211_v60 = vpop.f32.mrb[130].mxu1  ;;  %7219 = vmatpush3.bf16.msra.mxu0 %v7450_v55  ;;  %v4785_v62 = vadd.f32 %v6307_v10, %v4784_v24 }
0x219c   :  { %v4796_v59 = vadd.f32 %v7211_v60, %v6307_v10  ;;  %v4787_v61 = vpop.f32.mrb[131].mxu1  ;;  %7236 = vmatprep.subr.bf16.mxu0 %v7710_v41 }
0x219d   :  { %v4788_v63 = vadd.f32 %v6307_v10, %v4787_v61 }
0x219e   :  { %v4946_v8 = vpack.c.bf16 %v4796_v59, %v4793_v9  ;;  %7221 = vmatmul.mubr.msk.bf16.vlgmr.msra.gmra.mrb[96].mxu0 %vm190_vm6, %v8503_v3 }
0x219f   :  { %v4945_v0 = vpack.c.bf16 %v4788_v63, %v4785_v62  ;;  %7238 = vmatprep.mubr.msk.bf16.mxu0 %vm7711_vm7, %v7710_v41 }
0x21a9   :  { %v7234_v23 = vpop.f32.mrb[132].mxu1 }
0x21aa   :  { %v4939_v4 = vadd.f32 %v7234_v23, %v6309_v1  ;;  %v4930_v5 = vpop.f32.mrb[133].mxu1 }
0x21ab   :  { %v7235_v47 = vpop.f32.mrb[134].mxu1  ;;  %v4931_v16 = vadd.f32 %v6309_v1, %v4930_v5 }
0x21ac   :  { %v4942_v27 = vadd.f32 %v7235_v47, %v6309_v1  ;;  %v4933_v31 = vpop.f32.mrb[135].mxu1 }
0x21ad   :  { %v4934_v54 = vadd.f32 %v6309_v1, %v4933_v31 }
0x21ae   :  { %v5098_v51 = vpack.c.bf16 %v4942_v27, %v4939_v4 }
0x21af   :  { %v5097_v12 = vpack.c.bf16 %v4934_v54, %v4931_v16 }
0x21b1   :  { %7249 = vmatpush3.bf16.msra.mxu1 %v5097_v12 }
0x2271   :  { %v7222_v3 = vpop.f32.mrb[96].mxu0 }
0x2272   :  { %v4857_v14 = vpop.f32.mrb[97].mxu0  ;;  %v4866_v18 = vadd.f32 %v7222_v3, %v6308_v57 }
0x2273   :  { %v7223_v15 = vpop.f32.mrb[98].mxu0  ;;  %v4858_v21 = vadd.f32 %v6308_v57, %v4857_v14 }
0x2274   :  { %v4869_v19 = vadd.f32 %v7223_v15, %v6308_v57  ;;  %v4860_v20 = vpop.f32.mrb[99].mxu0 }
0x2275   :  { %v4861_v22 = vadd.f32 %v6308_v57, %v4860_v20 }
0x2276   :  { %v4948_v25 = vpack.c.bf16 %v4869_v19, %v4866_v18 }
0x2277   :  { %v4947_v26 = vpack.c.bf16 %v4861_v22, %v4858_v21 }
0x2278   :  { %v5000_v30 = vsel %vm512_vm8, %v4948_v25, 0 }
0x2279   :  { %v4953_v29 = vsel %vm512_vm8, %v4947_v26, 0 }
0x227a   :  { %7237 = vmatpush3.bf16.xpose.msra.mxu0 %v4953_v29  ;;  %v7451_v29 = vld [vmem:[%s9072_s4 + $0x38] sm:$0xff]  }
0x227b   :  { %7242 = vmatprep.subr.bf16.mxu0 %v7710_v41 }
0x2281   :  { %7239 = vmatmul.mubr.msk.bf16.vlgmr.msra.gmra.mrb[100].mxu0 %vm512_vm8, %v4945_v0 }
0x2282   :  { %7243 = vmatpush3.bf16.xpose.msra.mxu0 %v5000_v30  ;;  %7244 = vmatprep.mubr.msk.bf16.mxu0 %vm7711_vm7, %v7710_v41 }
0x2283   :  { %7254 = vmatprep.subr.bf16.mxu0 %v7710_v41 }
0x2289   :  { %7245 = vmatmul.mubr.msk.bf16.vlgmr.msra.gmra.mrb[104].mxu0 %vm512_vm8, %v4946_v8 }
0x228a   :  { %7255 = vmatpush3.bf16.msra.mxu0 %v5098_v51  ;;  %7256 = vmatprep.mubr.msk.bf16.mxu0 %vm7711_vm7, %v7710_v41 }
0x228b   :  { %7260 = vmatprep.subr.bf16.mxu0 %v7451_v29 }
0x2354   :  { %v4989_v34 = vpop.f32.mrb[100].mxu0 }
0x2355   :  { %v5043_v6 = vmul.f32 0.25, %v4989_v34  ;;  %v7240_v11 = vpop.f32.mrb[101].mxu0 }
0x2356   :  { %v4992_v7 = vpop.f32.mrb[102].mxu0 }
0x2357   :  { %v5044_v42 = vmul.f32 0.25, %v4992_v7  ;;  %v7241_v33 = vpop.f32.mrb[103].mxu0  ;;  %v5047_v37 = vadd.f32 %v5043_v6, %v7931_v32 }
0x2359   :  { %v5051_v43 = vsel %vm512_vm8, %v5047_v37, -inf  ;;  %v5048_v45 = vadd.f32 %v5044_v42, %v7934_v38 }
0x235a   :  { %5052 = vmax.xlane.f32.xlu1 %v5051_v43 }
0x235b   :  { %v5054_v48 = vsel %vm512_vm8, %v5048_v45, -inf }
0x235c   :  { %5055 = vmax.xlane.f32.xlu0 %v5054_v48  ;;  %v5036_v28 = vpop.f32.mrb[104].mxu0 }
0x235d   :  { %v5045_v39 = vmul.f32 0.25, %v5036_v28  ;;  %v7246_v49 = vpop.f32.mrb[105].mxu0  ;;  %v6337_v28 = vld [vmem:[%s9076_s8 + $0x32] ss:$0 sm:$0xff] }
0x235e   :  { %v5039_v41 = vpop.f32.mrb[106].mxu0 }
0x235f   :  { %v5046_v50 = vmul.f32 0.25, %v5039_v41  ;;  %v7247_v52 = vpop.f32.mrb[107].mxu0  ;;  %v5049_v46 = vadd.f32 %v5045_v39, %v7931_v32 }
0x2361   :  { %v5057_v53 = vsel %vm512_vm8, %v5049_v46, -inf  ;;  %v5050_v55 = vadd.f32 %v5046_v50, %v7934_v38 }
0x2362   :  { %5058 = vmax.xlane.f32.xlu1 %v5057_v53 }
0x2363   :  { %v5060_v44 = vsel %vm512_vm8, %v5050_v55, -inf }
0x2364   :  { %5061 = vmax.xlane.f32.xlu0 %v5060_v44 }
0x23e7   :  { %v5053_v10 = vpop.xlane.xlu1 %5052 }
0x23e8   :  { %v5063_v24 = vsub.f32 %v5047_v37, %v5053_v10 }
0x23e9   :  { %v5056_v60 = vpop.xlane.xlu0 %5055 }
0x23ea   :  { %v5067_v9 = vmul.f32 1.442695, %v5063_v24  ;;  %v5064_v59 = vsub.f32 %v5048_v45, %v5056_v60 }
0x23ec   :  { %7636 = vpow2.f32 %v5067_v9  ;;  %v5069_v61 = vmul.f32 1.442695, %v5064_v59 }
0x23ee   :  { %7638 = vpow2.f32 %v5069_v61 }
0x23ef   :  { %v5059_v62 = vpop.xlane.xlu1 %5058 }
0x23f0   :  { %v5065_v63 = vsub.f32 %v5049_v46, %v5059_v62 }
0x23f1   :  { %v5062_v8 = vpop.xlane.xlu0 %5061 }
0x23f2   :  { %v5071_v32 = vmul.f32 1.442695, %v5065_v63  ;;  %v5066_v0 = vsub.f32 %v5050_v55, %v5062_v8 }
0x23f4   :  { %7640 = vpow2.f32 %v5071_v32  ;;  %v5073_v1 = vmul.f32 1.442695, %v5066_v0 }
0x23f6   :  { %v7637_v38 = vpop.eup %7636  ;;  %7642 = vpow2.f32 %v5073_v1 }
0x23f7   :  { %v5075_v23 = vsel %vm512_vm8, %v7637_v38, 0.0 }
0x23f8   :  { %v7639_v4 = vpop.eup %7638  ;;  %5076 = vadd.xlane.f32.xlu1 %v5075_v23 }
0x23f9   :  { %v5078_v5 = vsel %vm512_vm8, %v7639_v4, 0.0 }
0x23fa   :  { %5079 = vadd.xlane.f32.xlu0 %v5078_v5 }
0x23fe   :  { %v7641_v47 = vpop.eup %7640 }
0x23ff   :  { %v5081_v27 = vsel %vm512_vm8, %v7641_v47, 0.0 }
0x2400   :  { %v7643_v31 = vpop.eup %7642  ;;  %5082 = vadd.xlane.f32.xlu1 %v5081_v27 }
0x2401   :  { %v5084_v16 = vsel %vm512_vm8, %v7643_v31, 0.0 }
0x2402   :  { %5085 = vadd.xlane.f32.xlu0 %v5084_v16 }
0x2485   :  { %v5077_v54 = vpop.xlane.xlu1 %5076 }
0x2486   :  { %7644 = vrcp.f32 %v5077_v54 }
0x2487   :  { %v5080_v51 = vpop.xlane.xlu0 %5079 }
0x2488   :  { %7646 = vrcp.f32 %v5080_v51 }
0x248d   :  { %v5083_v12 = vpop.xlane.xlu1 %5082 }
0x248e   :  { %7648 = vrcp.f32 %v5083_v12  ;;  %v7454_v12 = vld [vmem:[%s9073_s5 + $0x44] ss:$8 sps:$4 sm:$0xff]  }
0x248f   :  { %v5086_v3 = vpop.xlane.xlu0 %5085  ;;  %5398 = vmatprep.subr.bf16.mxu1 %v7454_v12 }
0x2490   :  { %v7645_v57 = vpop.eup %7644  ;;  %7650 = vrcp.f32 %v5086_v3  ;;  %v7452_v3 = vld [vmem:[%s9073_s5 + $0x40] ss:$8 sps:$4 sm:$0xff]  }
0x2491   :  { %v5091_v15 = vmul.f32 %v7645_v57, %v7637_v38  ;;  %v7457_v57 = vld [vmem:[%s9073_s5 + $0x54] ss:$8 sps:$4 sm:$0xff]  }
0x2492   :  { %v7647_v14 = vpop.eup %7646 }
0x2493   :  { %v5092_v18 = vmul.f32 %v7647_v14, %v7639_v4  ;;  %v7455_v14 = vld [vmem:[%s9073_s5 + $0x50] ss:$8 sps:$4 sm:$0xff]  }
0x2495   :  { %v5095_v19 = vpack.c.bf16 %v5092_v18, %v5091_v15  ;;  %v7460_v15 = vld [vmem:[%s9073_s5 + $0x64] ss:$8 sps:$4 sm:$0xff]   ;;  %v7458_v18 = vld [vmem:[%s9073_s5 + $0x60] ss:$8 sps:$4 sm:$0xff]  }
0x2497   :  { %7251 = vmatmul.mubr.msk.bf16.vlgmr.msra.gmra.mrb[136].mxu1 %vm512_vm8, %v5095_v19  ;;  %v7461_v19 = vld [vmem:[%s9073_s5 + $0x70] ss:$8 sps:$4 sm:$0xff]  }
0x2498   :  { %v7649_v20 = vpop.eup %7648  ;;  %5430 = vmatprep.mubr.bf16.mxu1 %v7708_v2  ;;  %5399 = vmatpush1.bf16.msra.mxu1 %v7452_v3 }
0x2499   :  { %v5093_v22 = vmul.f32 %v7649_v20, %v7641_v47  ;;  %5400 = vmatprep.subr.bf16.mxu1 %v7457_v57  ;;  %v7463_v20 = vld [vmem:[%s9073_s5 + $0x74] ss:$8 sps:$4 sm:$0xff]  }
0x249a   :  { %v7651_v21 = vpop.eup %7650 }
0x249b   :  { %v5094_v25 = vmul.f32 %v7651_v21, %v7643_v31 }
0x249c   :  { %5401 = vmatpush1.bf16.msra.mxu1 %v7455_v14 }
0x249d   :  { %v5096_v26 = vpack.c.bf16 %v5094_v25, %v5093_v22  ;;  %5402 = vmatprep.subr.bf16.mxu1 %v7460_v15 }
0x249f   :  { %7257 = vmatmul.mubr.msk.bf16.vlgmr.msra.gmra.mrb[108].mxu0 %vm512_vm8, %v5096_v26 }
0x24a0   :  { %7261 = vmatpush3.bf16.msra.mxu0 %v7451_v29  ;;  %5403 = vmatpush1.bf16.msra.mxu1 %v7458_v18 }
0x24a1   :  { %5404 = vmatprep.subr.bf16.mxu1 %v7463_v20 }
0x24a4   :  { %5405 = vmatpush1.bf16.msra.mxu1 %v7461_v19 }
0x256a   :  { %v5136_v30 = vpop.f32.mrb[136].mxu1 }
0x256b   :  { %v7252_v34 = vpop.f32.mrb[137].mxu1 }
0x256c   :  { %v5139_v6 = vpop.f32.mrb[138].mxu1 }
0x256d   :  { %v5187_v11 = vpack.c.bf16 %v5139_v6, %v5136_v30  ;;  %v7253_v7 = vpop.f32.mrb[139].mxu1 }
0x256f   :  { %7262 = vmatprep.mubr.msk.bf16.mxu0 %vm512_vm8, %v5187_v11 }
0x2572   :  { %v5180_v42 = vpop.f32.mrb[108].mxu0 }
0x2573   :  { %v7258_v33 = vpop.f32.mrb[109].mxu0 }
0x2574   :  { %v5183_v37 = vpop.f32.mrb[110].mxu0 }
0x2575   :  { %v5188_v43 = vpack.c.bf16 %v5183_v37, %v5180_v42  ;;  %v7259_v45 = vpop.f32.mrb[111].mxu0 }
0x2577   :  { %7263 = vmatmul.mubr.msk.bf16.vlgmr.msra.gmra.mrb[80].mxu0 %vm512_vm8, %v5188_v43  ;;  %v6338_v43 = vld [vmem:[%s9076_s8 + $0x33] ss:$0 sm:$0xff] }
0x264a   :  { %v7264_v48 = vpop.f32.mrb[80].mxu0 }
0x264b   :  { %v5238_v39 = vpop.f32.mrb[81].mxu0  ;;  %v5259_v49 = vadd.f32 %v7264_v48, %v8426_v56 }
0x264c   :  { %v5257_v41 = vadd.f32 %v5238_v39, %v8416_v13  ;;  %v7265_v50 = vpop.f32.mrb[82].mxu0 }
0x264d   :  { %v5241_v52 = vpop.f32.mrb[83].mxu0  ;;  %v5260_v53 = vadd.f32 %v7265_v50, %v8429_v58  ;;  %v8869_v44 = vadd.f32 %v6337_v28, %v5259_v49 }
0x264e   :  { %v8865_v46 = vadd.f32 %v6337_v28, %v5257_v41  ;;  %v5258_v55 = vadd.f32 %v5241_v52, %v8419_v35  ;;  %v6339_v41 = vld [vmem:[%s9076_s8 + $0x34] ss:$0 sm:$0xff] }
0x264f   :  { %v8875_v60 = vadd.f32 %v6337_v28, %v5260_v53  ;;  %v5274_v56 = vsel %vm190_vm6, %v8869_v44, 0.0 }
0x2650   :  { %v8871_v10 = vadd.f32 %v6337_v28, %v5258_v55  ;;  %v5268_v24 = vsel %vm190_vm6, %v8865_v46, 0.0 }
0x2651   :  { %5269 = vadd.xlane.f32.xlu1 %v5268_v24  ;;  %v5277_v35 = vsel %vm190_vm6, %v8875_v60, 0.0 }
0x2652   :  { %v5271_v13 = vsel %vm190_vm6, %v8871_v10, 0.0 }
0x2653   :  { %5272 = vadd.xlane.f32.xlu0 %v5271_v13 }
0x2655   :  { %5275 = vadd.xlane.f32.xlu1 %v5274_v56 }
0x2657   :  { %5278 = vadd.xlane.f32.xlu0 %v5277_v35 }
0x26de   :  { %v5270_v58 = vpop.xlane.xlu1 %5269 }
0x26df   :  { %v5280_v9 = vmul.f32 0.015625, %v5270_v58 }
0x26e0   :  { %v5273_v59 = vpop.xlane.xlu0 %5272 }
0x26e1   :  { %v5284_v61 = vsub.f32 %v8865_v46, %v5280_v9  ;;  %v5281_v62 = vmul.f32 0.015625, %v5273_v59 }
0x26e2   :  { %v5276_v63 = vpop.xlane.xlu1 %5275 }
0x26e3   :  { %v5285_v8 = vsub.f32 %v8871_v10, %v5281_v62  ;;  %v5282_v32 = vmul.f32 0.015625, %v5276_v63  ;;  %v5288_v0 = vmul.f32 %v5284_v61, %v5284_v61  ;;  %v7464_v62 = vld [vmem:[%s9074_s6 + $0xc0] sm:$0xff]  }
0x26e4   :  { %v5279_v1 = vpop.xlane.xlu0 %5278  ;;  %v7465_v63 = vld [vmem:[%s9074_s6 + $0x80] sm:$0xff]   ;;  %6684 = vmatprep.subr.bf16.mxu0 %v7464_v62 }
0x26e5   :  { %v5286_v38 = vsub.f32 %v8869_v44, %v5282_v32  ;;  %v5283_v23 = vmul.f32 0.015625, %v5279_v1  ;;  %v5292_v4 = vsel %vm190_vm6, %v5288_v0, 0.0  ;;  %v5289_v5 = vmul.f32 %v5285_v8, %v5285_v8  ;;  %6685 = vmatpush3.bf16.msra.mxu0 %v7465_v63  ;;  %v7468_v32 = vld [vmem:[%s9074_s6 + $0xd0] sm:$0xff]   ;;  %v7470_v1 = vld [vmem:[%s9074_s6 + $0xd8] sm:$0xff]  }
0x26e6   :  { %5293 = vadd.xlane.f32.xlu1 %v5292_v4  ;;  %v7469_v0 = vld [vmem:[%s9074_s6 + $0x90] sm:$0xff]   ;;  %v7473_v4 = vld [vmem:[%s9074_s6 + $0xa0] sm:$0xff]  }
0x26e7   :  { %v5287_v47 = vsub.f32 %v8875_v60, %v5283_v23  ;;  %v5295_v27 = vsel %vm190_vm6, %v5289_v5, 0.0  ;;  %v5290_v31 = vmul.f32 %v5286_v38, %v5286_v38  ;;  %v7472_v23 = vld [vmem:[%s9074_s6 + $0xe0] sm:$0xff]   ;;  %v7474_v5 = vld [vmem:[%s9074_s6 + $0xe8] sm:$0xff]  }
0x26e8   :  { %5296 = vadd.xlane.f32.xlu0 %v5295_v27  ;;  %v7476_v27 = vld [vmem:[%s9074_s6 + $0xf0] sm:$0xff]  }
0x26e9   :  { %v5298_v16 = vsel %vm190_vm6, %v5290_v31, 0.0  ;;  %v5291_v54 = vmul.f32 %v5287_v47, %v5287_v47  ;;  %v7477_v31 = vld [vmem:[%s9074_s6 + $0xb0] sm:$0xff]  }
0x26ea   :  { %5299 = vadd.xlane.f32.xlu1 %v5298_v16  ;;  %v7478_v16 = vld [vmem:[%s9074_s6 + $0xf8] sm:$0xff]  }
0x26eb   :  { %v5301_v51 = vsel %vm190_vm6, %v5291_v54, 0.0  ;;  %v7479_v54 = vld [vmem:[%s9074_s6 + $0xb8] sm:$0xff]  }
0x26ec   :  { %5302 = vadd.xlane.f32.xlu0 %v5301_v51  ;;  %v6348_v51 = vld [vmem:[%s9076_s8 + $0x35] ss:$8 sm:$0x3] }
0x26ed   :  { %v5345_v12 = vrot.slane %v6348_v51, %v2581_v36  ;;  %v5349_v3 = vrot.slane %v6348_v51, %v2585_v40 }
0x2773   :  { %v5294_v21 = vpop.xlane.xlu1 %5293 }
0x2774   :  { %v5304_v22 = vmul.f32 0.015625, %v5294_v21 }
0x2775   :  { %v5297_v25 = vpop.xlane.xlu0 %5296 }
0x2776   :  { %v5308_v26 = vadd.f32 1e-05, %v5304_v22  ;;  %v5305_v29 = vmul.f32 0.015625, %v5297_v25 }
0x2777   :  { %v5300_v30 = vpop.xlane.xlu1 %5299 }
0x2778   :  { %7652 = vrsqrt.f32 %v5308_v26  ;;  %v5309_v34 = vadd.f32 1e-05, %v5305_v29  ;;  %v5306_v6 = vmul.f32 0.015625, %v5300_v30 }
0x2779   :  { %v5303_v11 = vpop.xlane.xlu0 %5302 }
0x277a   :  { %7654 = vrsqrt.f32 %v5309_v34  ;;  %v5310_v7 = vadd.f32 1e-05, %v5306_v6  ;;  %v5307_v42 = vmul.f32 0.015625, %v5303_v11 }
0x277c   :  { %7656 = vrsqrt.f32 %v5310_v7  ;;  %v5311_v33 = vadd.f32 1e-05, %v5307_v42 }
0x277e   :  { %7658 = vrsqrt.f32 %v5311_v33 }
0x2782   :  { %v7653_v37 = vpop.eup %7652 }
0x2783   :  { %v5316_v45 = vmul.f32 %v7653_v37, %v5284_v61 }
0x2784   :  { %v7655_v48 = vpop.eup %7654 }
0x2785   :  { %v5320_v28 = vmul.f32 %v6338_v43, %v5316_v45  ;;  %v5317_v39 = vmul.f32 %v7655_v48, %v5285_v8  ;;  %v7466_v8 = vld [vmem:[%s9074_s6 + $0xc8] sm:$0xff]  }
0x2786   :  { %v7657_v49 = vpop.eup %7656  ;;  %6686 = vmatprep.subr.bf16.mxu0 %v7466_v8 }
0x2787   :  { %v5321_v50 = vmul.f32 %v6338_v43, %v5317_v39  ;;  %v5318_v53 = vmul.f32 %v7657_v49, %v5286_v38  ;;  %v5324_v24 = vadd.f32 %v6339_v41, %v5320_v28  ;;  %v7471_v38 = vld [vmem:[%s9074_s6 + $0x98] sm:$0xff]  }
0x2788   :  { %v7659_v52 = vpop.eup %7658 }
0x2789   :  { %v5319_v55 = vmul.f32 %v7659_v52, %v5287_v47  ;;  %v5325_v13 = vadd.f32 %v6339_v41, %v5321_v50  ;;  %v5322_v58 = vmul.f32 %v6338_v43, %v5318_v53  ;;  %v7475_v47 = vld [vmem:[%s9074_s6 + $0xa8] sm:$0xff]  }
0x278b   :  { %v5328_v56 = vpack.c.bf16 %v5325_v13, %v5324_v24  ;;  %v5323_v35 = vmul.f32 %v6338_v43, %v5319_v55  ;;  %v5326_v59 = vadd.f32 %v6339_v41, %v5322_v58 }
0x278d   :  { %6357 = vmatmul.mubr.msk.bf16.vlgmr.msra.gmra.mrb[140].mxu1 %vm190_vm6, %v5328_v56  ;;  %v5327_v9 = vadd.f32 %v6339_v41, %v5323_v35 }
0x278e   :  { %5440 = vmatprep.mubr.bf16.mxu1 %v7708_v2  ;;  %v7467_v2 = vld [vmem:[%s9074_s6 + $0x88] sm:$0xff]  }
0x278f   :  { %v5329_v61 = vpack.c.bf16 %v5327_v9, %v5326_v59  ;;  %6687 = vmatpush3.bf16.msra.mxu0 %v7467_v2 }
0x2790   :  { %6688 = vmatprep.subr.bf16.mxu0 %v7468_v32 }
0x2793   :  { %6689 = vmatpush3.bf16.msra.mxu0 %v7469_v0 }
0x2794   :  { %6690 = vmatprep.subr.bf16.mxu0 %v7470_v1 }
0x2795   :  { %6358 = vmatmul.mubr.msk.bf16.gmra.mrb[144].mxu1 %vm190_vm6, %v5329_v61 }
0x2797   :  { %6691 = vmatpush3.bf16.msra.mxu0 %v7471_v38 }
0x2798   :  { %6692 = vmatprep.subr.bf16.mxu0 %v7472_v23 }
0x279b   :  { %6693 = vmatpush3.bf16.msra.mxu0 %v7473_v4 }
0x279c   :  { %6694 = vmatprep.subr.bf16.mxu0 %v7474_v5 }
0x279f   :  { %6695 = vmatpush3.bf16.msra.mxu0 %v7475_v47 }
0x27a0   :  { %6696 = vmatprep.subr.bf16.mxu0 %v7476_v27 }
0x27a3   :  { %6697 = vmatpush3.bf16.msra.mxu0 %v7477_v31 }
0x27a4   :  { %6698 = vmatprep.subr.bf16.mxu0 %v7478_v16 }
0x27a7   :  { %6699 = vmatpush3.bf16.msra.mxu0 %v7479_v54 }
0x2860   :  { %v5432_v57 = vpop.f32.mrb[140].mxu1 }
0x2861   :  { %v8979_v14 = vadd.f32 %v5432_v57, %v5345_v12  ;;  %v5434_v15 = vpop.f32.mrb[141].mxu1 }
0x2862   :  { %v8981_v18 = vadd.f32 %v5434_v15, %v5349_v3  ;;  %v5436_v19 = vpop.f32.mrb[142].mxu1 }
0x2863   :  { %v5459_v20 = vmul.f32 0.044715, %v8979_v14  ;;  %v8984_v21 = vadd.f32 %v5436_v19, %v5345_v12  ;;  %v5438_v22 = vpop.f32.mrb[143].mxu1  ;;  %v5451_v19 = vmul.f32 0.5, %v8979_v14 }
0x2864   :  { %v5460_v25 = vmul.f32 0.044715, %v8981_v18  ;;  %v8987_v26 = vadd.f32 %v5438_v22, %v5349_v3 }
0x2865   :  { %v5467_v36 = vmul.f32 %v5459_v20, %v8979_v14  ;;  %v5461_v17 = vmul.f32 0.044715, %v8984_v21  ;;  %v5453_v20 = vmul.f32 0.5, %v8984_v21 }
0x2866   :  { %v5468_v40 = vmul.f32 %v5460_v25, %v8981_v18  ;;  %v5462_v29 = vmul.f32 0.044715, %v8987_v26  ;;  %v5452_v25 = vmul.f32 0.5, %v8981_v18 }
0x2867   :  { %v5475_v30 = vmul.f32 %v5467_v36, %v8979_v14  ;;  %v5469_v34 = vmul.f32 %v5461_v17, %v8984_v21  ;;  %v5454_v36 = vmul.f32 0.5, %v8987_v26 }
0x2868   :  { %v5476_v6 = vmul.f32 %v5468_v40, %v8981_v18  ;;  %v5470_v11 = vmul.f32 %v5462_v29, %v8987_v26  ;;  %v5442_v7 = vpop.f32.mrb[144].mxu1 }
0x2869   :  { %v5483_v42 = vadd.f32 %v5475_v30, %v8979_v14  ;;  %v5477_v33 = vmul.f32 %v5469_v34, %v8984_v21  ;;  %v8999_v37 = vadd.f32 %v5442_v7, %v5345_v12  ;;  %v5444_v43 = vpop.f32.mrb[145].mxu1 }
0x286a   :  { %v5478_v45 = vmul.f32 %v5470_v11, %v8987_v26  ;;  %v9002_v48 = vadd.f32 %v5444_v43, %v5349_v3  ;;  %v5446_v28 = vpop.f32.mrb[146].mxu1  ;;  %v5484_v39 = vadd.f32 %v5476_v6, %v8981_v18 }
0x286b   :  { %v5491_v49 = vmul.f32 0.7978846, %v5483_v42  ;;  %v5485_v41 = vadd.f32 %v5477_v33, %v8984_v21  ;;  %v5463_v50 = vmul.f32 0.044715, %v8999_v37  ;;  %v5447_v52 = vadd.f32 %v5446_v28, %v5345_v12  ;;  %v5448_v53 = vpop.f32.mrb[147].mxu1 }
0x286c   :  { %v5464_v55 = vmul.f32 0.044715, %v9002_v48  ;;  %v5449_v24 = vadd.f32 %v5448_v53, %v5349_v3  ;;  %v5486_v13 = vadd.f32 %v5478_v45, %v8987_v26  ;;  %v5492_v56 = vmul.f32 0.7978846, %v5484_v39 }
0x286d   :  { %7660 = vtanh.f32 %v5491_v49  ;;  %v5493_v35 = vmul.f32 0.7978846, %v5485_v41  ;;  %v5471_v58 = vmul.f32 %v5463_v50, %v8999_v37  ;;  %v5465_v9 = vmul.f32 0.044715, %v5447_v52 }
0x286e   :  { %v5472_v59 = vmul.f32 %v5464_v55, %v9002_v48  ;;  %v5466_v61 = vmul.f32 0.044715, %v5449_v24  ;;  %v5494_v62 = vmul.f32 0.7978846, %v5486_v13  ;;  %7662 = vtanh.f32 %v5492_v56 }
0x286f   :  { %7664 = vtanh.f32 %v5493_v35  ;;  %v5479_v63 = vmul.f32 %v5471_v58, %v8999_v37  ;;  %v5473_v8 = vmul.f32 %v5465_v9, %v5447_v52  ;;  %v5455_v21 = vmul.f32 0.5, %v8999_v37 }
0x2870   :  { %v5480_v2 = vmul.f32 %v5472_v59, %v9002_v48  ;;  %v5474_v32 = vmul.f32 %v5466_v61, %v5449_v24  ;;  %7666 = vtanh.f32 %v5494_v62  ;;  %v5457_v18 = vmul.f32 0.5, %v5447_v52 }
0x2871   :  { %v5481_v0 = vmul.f32 %v5473_v8, %v5447_v52  ;;  %v5487_v1 = vadd.f32 %v5479_v63, %v8999_v37  ;;  %v5456_v26 = vmul.f32 0.5, %v9002_v48  ;;  %v5458_v39 = vmul.f32 0.5, %v5449_v24  ;;  %v6407_v37 = vld [vmem:[%s9076_s8 + $0x36] ss:$0 sm:$0xff] }
0x2872   :  { %v5482_v38 = vmul.f32 %v5474_v32, %v5449_v24  ;;  %v5488_v23 = vadd.f32 %v5480_v2, %v9002_v48 }
0x2873   :  { %v5489_v4 = vadd.f32 %v5481_v0, %v5447_v52  ;;  %v5495_v5 = vmul.f32 0.7978846, %v5487_v1 }
0x2874   :  { %v5490_v47 = vadd.f32 %v5482_v38, %v5449_v24  ;;  %v5496_v27 = vmul.f32 0.7978846, %v5488_v23 }
0x2875   :  { %v5497_v31 = vmul.f32 0.7978846, %v5489_v4  ;;  %7668 = vtanh.f32 %v5495_v5 }
0x2876   :  { %v5498_v16 = vmul.f32 0.7978846, %v5490_v47  ;;  %7670 = vtanh.f32 %v5496_v27 }
0x2877   :  { %v7661_v54 = vpop.eup %7660  ;;  %7672 = vtanh.f32 %v5497_v31 }
0x2878   :  { %v7663_v51 = vpop.eup %7662  ;;  %v5507_v12 = vadd.f32 1.0, %v7661_v54  ;;  %7674 = vtanh.f32 %v5498_v16 }
0x2879   :  { %v7665_v3 = vpop.eup %7664  ;;  %v5508_v57 = vadd.f32 1.0, %v7663_v51 }
0x287a   :  { %v7667_v15 = vpop.eup %7666  ;;  %v5509_v22 = vadd.f32 1.0, %v7665_v3  ;;  %v5515_v40 = vmul.f32 %v5507_v12, %v5451_v19 }
0x287b   :  { %v5510_v17 = vadd.f32 1.0, %v7667_v15  ;;  %v5516_v30 = vmul.f32 %v5508_v57, %v5452_v25 }
0x287c   :  { %v5517_v29 = vmul.f32 %v5509_v22, %v5453_v20 }
0x287d   :  { %v5518_v34 = vmul.f32 %v5510_v17, %v5454_v36 }
0x287e   :  { %v5523_v6 = vpack.c.bf16 %v5517_v29, %v5515_v40 }
0x287f   :  { %v7669_v11 = vpop.eup %7668  ;;  %v5524_v7 = vpack.c.bf16 %v5518_v34, %v5516_v30 }
0x2880   :  { %v7671_v42 = vpop.eup %7670  ;;  %v5511_v33 = vadd.f32 1.0, %v7669_v11  ;;  %v7480_v11 = vld [vmem:[%s9075_s7] sm:$0xff]  }
0x2881   :  { %v7673_v43 = vpop.eup %7672  ;;  %5688 = vmatprep.mubr.bf16.mxu0 %v5524_v7  ;;  %v5512_v14 = vadd.f32 1.0, %v7671_v42  ;;  %7266 = vmatprep.subr.bf16.mxu1 %v7480_v11  ;;  %v7481_v7 = vld [vmem:[%s9075_s7 + $0x8] sm:$0xff]   ;;  %v7482_v42 = vld [vmem:[%s9075_s7 + $0x10] sm:$0xff]  }
0x2882   :  { %v7675_v45 = vpop.eup %7674  ;;  %5689 = vmatmul.mubr.bf16.vlgmr.msra.gmra.mrb[112].mxu0 %v5523_v6  ;;  %v5513_v28 = vadd.f32 1.0, %v7673_v43  ;;  %v5519_v41 = vmul.f32 %v5511_v33, %v5455_v21  ;;  %7267 = vmatpush3.bf16.msra.mxu1 %v7480_v11  ;;  %v7483_v33 = vld [vmem:[%s9075_s7 + $0x18] sm:$0xff]  }
0x2883   :  { %v5514_v49 = vadd.f32 1.0, %v7675_v45  ;;  %v5520_v53 = vmul.f32 %v5512_v14, %v5456_v26  ;;  %7268 = vmatprep.subr.bf16.mxu1 %v7481_v7 }
0x2884   :  { %v5521_v50 = vmul.f32 %v5513_v28, %v5457_v18 }
0x2885   :  { %v5522_v55 = vmul.f32 %v5514_v49, %v5458_v39 }
0x2886   :  { %v5525_v13 = vpack.c.bf16 %v5521_v50, %v5519_v41  ;;  %7269 = vmatpush3.bf16.msra.mxu1 %v7481_v7 }
0x2887   :  { %v5526_v56 = vpack.c.bf16 %v5522_v55, %v5520_v53  ;;  %7270 = vmatprep.subr.bf16.mxu1 %v7482_v42 }
0x2889   :  { %5696 = vmatprep.mubr.bf16.mxu0 %v5526_v56 }
0x288a   :  { %5697 = vmatmul.mubr.bf16.gmra.mrb[116].mxu0 %v5525_v13  ;;  %7271 = vmatpush3.bf16.msra.mxu1 %v7482_v42  ;;  %v5714_v13 = vld [vmem:[%s9076_s8 + $0x7] ss:$0 sm:$0xff] }
0x288b   :  { %7272 = vmatprep.subr.bf16.mxu1 %v7483_v33 }
0x288e   :  { %7273 = vmatpush3.bf16.msra.mxu1 %v7483_v33 }
0x2955   :  { %v6700_v35 = vpop.f32.mrb[112].mxu0 }
0x2956   :  { %v6701_v58 = vpop.f32.mrb[113].mxu0 }
0x2957   :  { %v6702_v9 = vadd.f32 %v6701_v58, %v6700_v35  ;;  %v6703_v59 = vpop.f32.mrb[114].mxu0 }
0x2958   :  { %v6704_v61 = vpop.f32.mrb[115].mxu0 }
0x2959   :  { %v5705_v48 = vadd.f32 %v6702_v9, %v8865_v46  ;;  %v6705_v52 = vadd.f32 %v6704_v61, %v6703_v59  ;;  %v5715_v59 = vld [vmem:[%s9076_s8 + $0x10] ss:$0 sm:$0xff]  ;;  %s7684_s8 = scalar_lea.vmem %s5875_s13, 512 }
0x295a   :  { %p7685_p0 = scmp.ne.s32.totalorder %s5875_s13, %s7684_s8  ;;  %p7690_p2 = scmp.lt.s32.totalorder %s7684_s8, %s7684_s8 }
0x295b   :  { %v5706_v24 = vadd.f32 %v6705_v52, %v8871_v10  ;;  %v5710_v62 = vadd.f32 %v6407_v37, %v5705_v48 }
0x295c   :  { %p7691_p3 = por %p7690_p2, %p7689_p1 }
0x295d   :  { %v6706_v63 = vpop.f32.mrb[116].mxu0  ;;  %v5716_v8 = vsel %vm190_vm6, %v5710_v62, 0.0  ;;  %v5711_v2 = vadd.f32 %v6407_v37, %v5706_v24 }
0x295e   :  { %5717 = vadd.xlane.f32.xlu1 %v5716_v8  ;;  %v6707_v32 = vpop.f32.mrb[117].mxu0  ;;  %p7692_p4 = pnand %p7691_p3, %p7685_p0 }
0x295f   :  { %v6708_v0 = vadd.f32 %v6707_v32, %v6706_v63  ;;  %v6709_v1 = vpop.f32.mrb[118].mxu0  ;;  %v5719_v38 = vsel %vm190_vm6, %v5711_v2, 0.0 }
0x2960   :  { %5720 = vadd.xlane.f32.xlu0 %v5719_v38  ;;  %v6710_v23 = vpop.f32.mrb[119].mxu0 }
0x2961   :  { %v5707_v4 = vadd.f32 %v6708_v0, %v8869_v44  ;;  %v6711_v5 = vadd.f32 %v6710_v23, %v6709_v1 }
0x2963   :  { %v5708_v46 = vadd.f32 %v6711_v5, %v8875_v60  ;;  %v5712_v47 = vadd.f32 %v6407_v37, %v5707_v4 }
0x2965   :  { %v5722_v10 = vsel %vm190_vm6, %v5712_v47, 0.0  ;;  %v5713_v27 = vadd.f32 %v6407_v37, %v5708_v46 }
0x2966   :  { %5723 = vadd.xlane.f32.xlu1 %v5722_v10 }
0x2967   :  { %v5725_v31 = vsel %vm190_vm6, %v5713_v27, 0.0 }
0x2968   :  { %5726 = vadd.xlane.f32.xlu0 %v5725_v31 }
0x29eb   :  { %v5718_v16 = vpop.xlane.xlu1 %5717 }
0x29ec   :  { %v5728_v54 = vmul.f32 0.015625, %v5718_v16 }
0x29ed   :  { %v5721_v51 = vpop.xlane.xlu0 %5720 }
0x29ee   :  { %v5732_v12 = vsub.f32 %v5710_v62, %v5728_v54  ;;  %v5729_v3 = vmul.f32 0.015625, %v5721_v51 }
0x29f0   :  { %v5733_v57 = vsub.f32 %v5711_v2, %v5729_v3  ;;  %v5736_v15 = vmul.f32 %v5732_v12, %v5732_v12 }
0x29f2   :  { %v5740_v44 = vsel %vm190_vm6, %v5736_v15, 0.0  ;;  %v5737_v19 = vmul.f32 %v5733_v57, %v5733_v57 }
0x29f3   :  { %5741 = vadd.xlane.f32.xlu1 %v5740_v44  ;;  %v5724_v60 = vpop.xlane.xlu1 %5723 }
0x29f4   :  { %v5730_v20 = vmul.f32 0.015625, %v5724_v60  ;;  %v5743_v22 = vsel %vm190_vm6, %v5737_v19, 0.0 }
0x29f5   :  { %5744 = vadd.xlane.f32.xlu0 %v5743_v22  ;;  %v5727_v25 = vpop.xlane.xlu0 %5726 }
0x29f6   :  { %v5734_v36 = vsub.f32 %v5712_v47, %v5730_v20  ;;  %v5731_v17 = vmul.f32 0.015625, %v5727_v25 }
0x29f8   :  { %v5735_v40 = vsub.f32 %v5713_v27, %v5731_v17  ;;  %v5738_v29 = vmul.f32 %v5734_v36, %v5734_v36 }
0x29fa   :  { %v5746_v30 = vsel %vm190_vm6, %v5738_v29, 0.0  ;;  %v5739_v34 = vmul.f32 %v5735_v40, %v5735_v40 }
0x29fb   :  { %5747 = vadd.xlane.f32.xlu1 %v5746_v30 }
0x29fc   :  { %v5749_v6 = vsel %vm190_vm6, %v5739_v34, 0.0 }
0x29fd   :  { %5750 = vadd.xlane.f32.xlu0 %v5749_v6 }
0x2a80   :  { %v5742_v43 = vpop.xlane.xlu1 %5741 }
0x2a81   :  { %v5752_v14 = vmul.f32 0.015625, %v5742_v43 }
0x2a82   :  { %v5745_v45 = vpop.xlane.xlu0 %5744 }
0x2a83   :  { %v5756_v21 = vadd.f32 1e-05, %v5752_v14  ;;  %v5753_v18 = vmul.f32 0.015625, %v5745_v45 }
0x2a85   :  { %7676 = vrsqrt.f32 %v5756_v21  ;;  %v5757_v28 = vadd.f32 1e-05, %v5753_v18 }
0x2a87   :  { %7678 = vrsqrt.f32 %v5757_v28 }
0x2a88   :  { %v5748_v26 = vpop.xlane.xlu1 %5747 }
0x2a89   :  { %v5754_v39 = vmul.f32 0.015625, %v5748_v26 }
0x2a8a   :  { %v5751_v49 = vpop.xlane.xlu0 %5750 }
0x2a8b   :  { %v5758_v41 = vadd.f32 1e-05, %v5754_v39  ;;  %v5755_v50 = vmul.f32 0.015625, %v5751_v49 }
0x2a8d   :  { %7680 = vrsqrt.f32 %v5758_v41  ;;  %v5759_v53 = vadd.f32 1e-05, %v5755_v50 }
0x2a8f   :  { %v7677_v55 = vpop.eup %7676  ;;  %7682 = vrsqrt.f32 %v5759_v53 }
0x2a90   :  { %v5764_v56 = vmul.f32 %v7677_v55, %v5732_v12 }
0x2a91   :  { %v7679_v35 = vpop.eup %7678 }
0x2a92   :  { %v5765_v58 = vmul.f32 %v7679_v35, %v5733_v57  ;;  %v5768_v9 = vmul.f32 %v5764_v56, %v5714_v13 }
0x2a94   :  { %v5769_v61 = vmul.f32 %v5765_v58, %v5714_v13  ;;  %v5772_v37 = vadd.f32 %v5768_v9, %v5715_v59 }
0x2a96   :  { %v5773_v48 = vadd.f32 %v5769_v61, %v5715_v59 }
0x2a97   :  { %v7681_v52 = vpop.eup %7680 }
0x2a98   :  { %v5766_v24 = vmul.f32 %v7681_v52, %v5734_v36  ;;  %v5776_v62 = vpack.c.bf16 %v5773_v48, %v5772_v37 }
0x2a99   :  { %v7683_v63 = vpop.eup %7682 }
0x2a9a   :  { %v5770_v8 = vmul.f32 %v5766_v24, %v5714_v13  ;;  %v5767_v2 = vmul.f32 %v7683_v63, %v5735_v40  ;;  %7274 = vmatprep.mubr.msk.bf16.mxu1 %vm190_vm6, %v5776_v62 }
0x2a9c   :  { %v5771_v32 = vmul.f32 %v5767_v2, %v5714_v13  ;;  %v5774_v0 = vadd.f32 %v5770_v8, %v5715_v59 }
0x2a9e   :  { %v5775_v1 = vadd.f32 %v5771_v32, %v5715_v59 }
0x2aa0   :  { %v5777_v38 = vpack.c.bf16 %v5775_v1, %v5774_v0 }
0x2aa2   :  { %7275 = vmatmul.mubr.msk.bf16.vlgmr.msra.gmra.mrb[148].mxu1 %vm190_vm6, %v5777_v38 }
0x2b75   :  { %v7276_v23 = vpop.f32.mrb[148].mxu1 }
0x2b76   :  { %5867 = vst [vmem:[#allocation2 + $0x10] sm:$0xff] %v7276_v23  ;;  %v5850_v4 = vpop.f32.mrb[149].mxu1 }
0x2b77   :  { %5865 = vst [vmem:[#allocation2] sm:$0xff] %v5850_v4  ;;  %v7277_v5 = vpop.f32.mrb[150].mxu1 }
0x2b78   :  { %5868 = vst [vmem:[#allocation2 + $0x18] sm:$0xff] %v7277_v5  ;;  %v5853_v46 = vpop.f32.mrb[151].mxu1 }
0x2b79   :  { %5866 = vst [vmem:[#allocation2 + $0x8] sm:$0xff] %v5853_v46 }
0x2b7a   :  { %7695 = shalt.err (!%p7692_p4)
}
0x2b7b   :  { %s7696_s5 = scalar_lea.hbm %s9077_s9, 512 }
0x2b7c   :  { %p7697_p5 = scmp.ne.s32.totalorder %s9077_s9, %s7696_s5  ;;  %p7700_p6 = scmp.lt.u32.totalorder %s7696_s5, %s9077_s9 }
0x2b7e   :  { %p7702_p7 = pnand %p7700_p6, %p7697_p5 }
0x2b80   :  { %7705 = shalt.err (!%p7702_p7)
}
0x2b81   :  { %s7714_s18 = smov 128   ;;  %s7715_s19 = smov 8  }
0x2b82   :  { %5880 = dma.vmem_to_hbm [thread:$0]  %s5875_s13, 512, %s9077_s9, [#allocation3], %s7714_s18, %s7714_s18, %s7715_s19  }
0x2b83   :  { %7706 = dma.done.wait [#allocation3], 512  }
0x2b84   :  { %7707 = vsyncadd [#allocation3], 4294966784 }
0x2b85   :  { %5884 = vsyncpa [#allocation3], 1 }

</bundles_post_ra>
